<compile_context>
chip_gen: v7x
topology: tpu7x:2x2x1
jax: 0.10.0
libtpu: 0.0.40
codegen_flags: <defaults>
</compile_context>

<pallas_src>
import numpy as np

import jax
import jax.numpy as jnp
from jax.experimental import pallas as pl
from jax.experimental.pallas import tpu as pltpu


# --------------------------------------------------------------------------- #
# Fused per-(batch, iteration) kernel                                          #
# --------------------------------------------------------------------------- #
def _build_projga_kernel(n, m, l1, c_scale, eps=1e-12):
    """Returns the fused Pallas kernel for one (batch, iteration) grid step."""
    n_f = float(n)
    sqrt_n = float(n) ** 0.5

    def cmm(ar, ai, br, bi):
        """Complex matmul with Gauss's 3-multiply trick (f32 MXU accumulate)."""
        p1 = jnp.dot(ar, br, preferred_element_type=jnp.float32)
        p2 = jnp.dot(ai, bi, preferred_element_type=jnp.float32)
        p3 = jnp.dot(ar + ai, br + bi, preferred_element_type=jnp.float32)
        return p1 - p2, p3 - p1 - p2

    def phase_proj(xr, xi):
        # torch: w / |w + eps|  (eps is added to the real part only)
        # TODO(synk): eps=1e-12 matches the f64 reference; it is below f32 eps and
        #             only prevents 0/0 (result stays finite).
        yr = xr + eps
        inv_mag = jax.lax.rsqrt(yr * yr + xi * xi)   # EUP rsqrt, no sqrt+div
        return xr * inv_mag, xi * inv_mag

    def cov(hr, hi, war, wai, wdr, wdi, eye):
        """T = hs @ wa @ wd ;  C = I + T T^H  (Hermitian PD, (n, n))."""
        ur, ui = cmm(hr, hi, war, wai)            # (n, l1)
        tr, ti = cmm(ur, ui, wdr, wdi)            # (n, n)
        cr, ci = cmm(tr, ti, tr.T, -ti.T)         # T @ T^H
        return tr, ti, cr + eye, ci

    def cinv_logdet(cr, ci, eye):
        """Gauss-Jordan inverse + log|det| of an HPD complex n x n matrix.

        C is Hermitian PD (I + T T^H), so unpivoted elimination is stable and
        the pivots' product equals det(C) (real, positive).
        """
        a_r, a_i = cr, ci
        b_r, b_i = eye, jnp.zeros_like(eye)
        logdet = jnp.zeros((1, 1), jnp.float32)
        for k in range(n):                        # n is static -> fully unrolled
            pr = a_r[k:k + 1, k:k + 1]            # (1, 1) pivot (real/imag)
            pi = a_i[k:k + 1, k:k + 1]
            den = pr * pr + pi * pi
            inv_den = 1.0 / den
            logdet = logdet + 0.5 * jnp.log(den)
            # scaled pivot row: row_k / pivot = row_k * conj(pivot) / |pivot|^2
            sar = (a_r[k:k + 1, :] * pr + a_i[k:k + 1, :] * pi) * inv_den
            sai = (a_i[k:k + 1, :] * pr - a_r[k:k + 1, :] * pi) * inv_den
            sbr = (b_r[k:k + 1, :] * pr + b_i[k:k + 1, :] * pi) * inv_den
            sbi = (b_i[k:k + 1, :] * pr - b_r[k:k + 1, :] * pi) * inv_den
            # elimination factors; f_k := pivot - 1 makes row k land on the scaled row
            onehot = eye[:, k:k + 1]              # (n, 1)
            fr = a_r[:, k:k + 1] - onehot
            fi = a_i[:, k:k + 1]
            a_r = a_r - (fr * sar - fi * sai)
            a_i = a_i - (fr * sai + fi * sar)
            b_r = b_r - (fr * sbr - fi * sbi)
            b_i = b_i - (fr * sbi + fi * sbr)
        return b_r, b_i, logdet

    def kernel(h_r_ref, h_i_ref, va_r_ref, va_i_ref, wd0_r_ref, wd0_i_ref,
               lra_ref, lrb_ref,
               war_out, wai_out, wdr_out, wdi_out, obj_out,
               wa_r_s, wa_i_s, wd_r_s, wd_i_s):
        x = pl.program_id(1)

        # hs = sqrt(1/(n*noise_var)) * h  (scaled in-kernel, rides free on the VPU)
        hr = h_r_ref[...] * c_scale
        hi = h_i_ref[...] * c_scale
        hrt, hit = hr.T, hi.T

        # identity built once per step (broadcasted_iota), reused by cov / inverse
        row_ids = jax.lax.broadcasted_iota(jnp.int32, (n, n), 0)
        col_ids = jax.lax.broadcasted_iota(jnp.int32, (n, n), 1)
        eye = (row_ids == col_ids).astype(jnp.float32)

        # ---------------- iteration-0 state init (per batch element) ----------
        @pl.when(x == 0)
        def _init():
            # wa0 = phase projection of the top-l1 right singular vectors
            pwr, pwi = phase_proj(va_r_ref[...], va_i_ref[...])
            wa_r_s[...] = pwr
            wa_i_s[...] = pwi
            # wd0 = randn scaled to ||wa0 @ wd0||_F^2 = n
            w0r, w0i = wd0_r_ref[...], wd0_i_ref[...]
            qr, qi = cmm(pwr, pwi, w0r, w0i)
            s = sqrt_n * jax.lax.rsqrt(jnp.sum(qr * qr + qi * qi))
            wd_r_s[...] = s * w0r
            wd_i_s[...] = s * w0i

        war, wai = wa_r_s[...], wa_i_s[...]       # (m, l1)
        wdr, wdi = wd_r_s[...], wd_i_s[...]       # (l1, n)
        lr0 = lra_ref[0, 0]
        lr1 = lrb_ref[0, 0]

        # ---------------- analog precoder step --------------------------------
        # grad_wa = hs^T @ C1^{-T} @ conj(T1) @ wd^T ,  C1 = I + T1 T1^H,
        # T1 = hs @ wa_old @ wd_old
        t1r, t1i, c1r, c1i = cov(hr, hi, war, wai, wdr, wdi, eye)
        i1r, i1i, _ = cinv_logdet(c1r, c1i, eye)
        g1r, g1i = cmm(hrt, hit, i1r.T, i1i.T)    # (m, n)
        g2r, g2i = cmm(g1r, g1i, t1r, -t1i)       # (m, n)
        gar, gai = cmm(g2r, g2i, wdr.T, wdi.T)    # (m, l1)
        war_n, wai_n = phase_proj(war + lr0 * gar, wai + lr0 * gai)

        # ---------------- digital precoder step -------------------------------
        # grad_wd = wa_new^T @ hs^T @ C2^{-T} @ conj(T2),
        # T2 = hs @ wa_new @ wd_old, C2 = I + T2 T2^H
        t2r, t2i, c2r, c2i = cov(hr, hi, war_n, wai_n, wdr, wdi, eye)
        i2r, i2i, _ = cinv_logdet(c2r, c2i, eye)
        d1r, d1i = cmm(war_n.T, wai_n.T, hrt, hit)    # (l1, n)
        d2r, d2i = cmm(d1r, d1i, i2r.T, i2i.T)        # (l1, n)
        gdr, gdi = cmm(d2r, d2i, t2r, -t2i)           # (l1, n)
        wdtr = wdr + lr1 * gdr
        wdti = wdi + lr1 * gdi
        # power normalization:  wd = sqrt(n / ||wa_new @ wd_t||_F^2) * wd_t
        qr, qi = cmm(war_n, wai_n, wdtr, wdti)        # (m, n)
        s = sqrt_n * jax.lax.rsqrt(jnp.sum(qr * qr + qi * qi))
        wdr_n = s * wdtr
        wdi_n = s * wdti

        # ---------------- objective |log det(I + T3 T3^H)| --------------------
        _, _, c3r, c3i = cov(hr, hi, war_n, wai_n, wdr_n, wdi_n, eye)
        _, _, ld3 = cinv_logdet(c3r, c3i, eye)

        # ---------------- write state + outputs -------------------------------
        wa_r_s[...] = war_n
        wa_i_s[...] = wai_n
        wd_r_s[...] = wdr_n
        wd_i_s[...] = wdi_n
        war_out[...] = war_n
        wai_out[...] = wai_n
        wdr_out[...] = wdr_n
        wdi_out[...] = wdi_n
        obj_out[...] = jnp.abs(ld3)

    return kernel


# --------------------------------------------------------------------------- #
# ProjGA forward                                                               #
# --------------------------------------------------------------------------- #
def proj_ga_forward(hyp, h, n, l1, num_of_iter, noise_var, key):
    """h: complex64 (B, n, m); hyp: float32 (num_of_iter, 2)."""
    B, n_h, m = h.shape
    assert n_h == n

    h_r = jnp.real(h).astype(jnp.float32)
    h_i = jnp.imag(h).astype(jnp.float32)

    # TODO(synk): complex SVD has no Pallas equivalent; it is one-time init glue,
    #             computed on host in f64 for accuracy.
    h_np = np.asarray(jax.device_get(h)).astype(np.complex128)
    _, _, vh = np.linalg.svd(h_np, full_matrices=True)
    va = vh[:, :, :l1]                                  # (B, m, l1)
    va_r = jnp.asarray(np.real(va), dtype=jnp.float32)
    va_i = jnp.asarray(np.imag(va), dtype=jnp.float32)

    # TODO(synk): torch.manual_seed(42)+torch.randn replaced by deterministic
    #             jax.random (RNG streams are not bit-compatible).
    k1, k2 = jax.random.split(key)
    wd0_r = jax.random.normal(k1, (B, l1, n), dtype=jnp.float32)
    wd0_i = jax.random.normal(k2, (B, l1, n), dtype=jnp.float32)

    lr_a = jnp.asarray(hyp[:, 0], jnp.float32).reshape(num_of_iter, 1, 1)
    lr_b = jnp.asarray(hyp[:, 1], jnp.float32).reshape(num_of_iter, 1, 1)

    c_scale = float(np.sqrt(1.0 / (n * noise_var)))
    kernel = _build_projga_kernel(n=n, m=m, l1=l1, c_scale=c_scale, eps=1e-12)

    in_specs = [
        pl.BlockSpec((None, n, m), lambda b, x: (b, 0, 0)),    # h_r
        pl.BlockSpec((None, n, m), lambda b, x: (b, 0, 0)),    # h_i
        pl.BlockSpec((None, m, l1), lambda b, x: (b, 0, 0)),   # va_r
        pl.BlockSpec((None, m, l1), lambda b, x: (b, 0, 0)),   # va_i
        pl.BlockSpec((None, l1, n), lambda b, x: (b, 0, 0)),   # wd0_r
        pl.BlockSpec((None, l1, n), lambda b, x: (b, 0, 0)),   # wd0_i
        pl.BlockSpec((None, 1, 1), lambda b, x: (x, 0, 0)),    # lr_a (per-iter step)
        pl.BlockSpec((None, 1, 1), lambda b, x: (x, 0, 0)),    # lr_b
    ]
    # outputs flattened to (num_of_iter*B, ...) so blocks stay 2-D inside the kernel
    wa_out_spec = pl.BlockSpec((None, m, l1), lambda b, x: (x * B + b, 0, 0))
    wd_out_spec = pl.BlockSpec((None, l1, n), lambda b, x: (x * B + b, 0, 0))
    obj_out_spec = pl.BlockSpec((None, 1, 1), lambda b, x: (x * B + b, 0, 0))

    out_shape = (
        jax.ShapeDtypeStruct((num_of_iter * B, m, l1), jnp.float32),
        jax.ShapeDtypeStruct((num_of_iter * B, m, l1), jnp.float32),
        jax.ShapeDtypeStruct((num_of_iter * B, l1, n), jnp.float32),
        jax.ShapeDtypeStruct((num_of_iter * B, l1, n), jnp.float32),
        jax.ShapeDtypeStruct((num_of_iter * B, 1, 1), jnp.float32),
    )

    war, wai, wdr, wdi, obj = pl.pallas_call(
        kernel,
        out_shape=out_shape,
        grid=(B, num_of_iter),
        in_specs=in_specs,
        out_specs=(wa_out_spec, wa_out_spec, wd_out_spec, wd_out_spec,
                   obj_out_spec),
        scratch_shapes=[
            pltpu.VMEM((m, l1), jnp.float32),   # wa real (persists across iters)
            pltpu.VMEM((m, l1), jnp.float32),   # wa imag
            pltpu.VMEM((l1, n), jnp.float32),   # wd real
            pltpu.VMEM((l1, n), jnp.float32),   # wd imag
        ],
        compiler_params=pltpu.CompilerParams(
            dimension_semantics=("parallel", "arbitrary")),
    )(h_r, h_i, va_r, va_i, wd0_r, wd0_i, lr_a, lr_b)

    W_A = jax.lax.complex(war, wai).reshape(num_of_iter, B, m, l1)
    W_D = jax.lax.complex(wdr, wdi).reshape(num_of_iter, B, l1, n)
    obj = obj.reshape(num_of_iter, B)

    wa_c = W_A[-1]
    wd_c = W_D[-1]
    return jnp.transpose(obj, (1, 0)), wa_c, wd_c, W_A, W_D


# --------------------------------------------------------------------------- #
if __name__ == "__main__":
    B, n, m, l1 = 2, 4, 8, 4
    num_of_iter = 3
    noise_var = 1.0

    key = jax.random.PRNGKey(0)
    k_hr, k_hi, k_hyp, k_wd = jax.random.split(key, 4)

    h_r = jax.random.normal(k_hr, (B, n, m), dtype=jnp.float32)
    h_i = jax.random.normal(k_hi, (B, n, m), dtype=jnp.float32)
    h = (h_r + 1j * h_i).astype(jnp.complex64)

    # deterministic "nn.Parameter" step sizes, shape (num_of_iter, 2)
    hyp = jnp.abs(jax.random.normal(k_hyp, (num_of_iter, 2),
                                    dtype=jnp.float32)) * 0.05 + 0.01

    out = proj_ga_forward(hyp, h, n, l1, num_of_iter, noise_var, k_wd)
    out = jax.block_until_ready(out)

    obj, wa, wd, W_A, W_D = out
    assert obj.shape == (B, num_of_iter)
    assert wa.shape == (B, m, l1)
    assert wd.shape == (B, l1, n)
    assert W_A.shape == (num_of_iter, B, m, l1)
    assert W_D.shape == (num_of_iter, B, l1, n)
    assert bool(jnp.all(jnp.isfinite(obj)))
    assert bool(jnp.all(jnp.isfinite(jnp.abs(W_A))))
    assert bool(jnp.all(jnp.isfinite(jnp.abs(W_D))))

    print("KERNEL_OK")
</pallas_src>

<mosaic_0001>
module attributes {stable_mosaic.version = 11 : i64} {
  func.func @kernel(%arg0: i32, %arg1: i32, %arg2: memref<1x4x8xf32, #tpu.memory_space<vmem>>, %arg3: memref<1x4x8xf32, #tpu.memory_space<vmem>>, %arg4: memref<1x8x4xf32, #tpu.memory_space<vmem>>, %arg5: memref<1x8x4xf32, #tpu.memory_space<vmem>>, %arg6: memref<1x4x4xf32, #tpu.memory_space<vmem>>, %arg7: memref<1x4x4xf32, #tpu.memory_space<vmem>>, %arg8: memref<1x1x1xf32, #tpu.memory_space<vmem>>, %arg9: memref<1x1x1xf32, #tpu.memory_space<vmem>>, %arg10: memref<1x8x4xf32, #tpu.memory_space<vmem>>, %arg11: memref<1x8x4xf32, #tpu.memory_space<vmem>>, %arg12: memref<1x4x4xf32, #tpu.memory_space<vmem>>, %arg13: memref<1x4x4xf32, #tpu.memory_space<vmem>>, %arg14: memref<1x1x1xf32, #tpu.memory_space<vmem>>, %arg15: memref<8x4xf32, #tpu.memory_space<vmem>>, %arg16: memref<8x4xf32, #tpu.memory_space<vmem>>, %arg17: memref<4x4xf32, #tpu.memory_space<vmem>>, %arg18: memref<4x4xf32, #tpu.memory_space<vmem>>) attributes {dimension_semantics = [#tpu.dimension_semantics<parallel>, #tpu.dimension_semantics<arbitrary>], iteration_bounds = array<i64: 2, 3>, scalar_prefetch = 0 : i64, scratch_operands = 4 : i64, tpu.core_type = #tpu.core_type<tc>, window_params = [{transform_indices = @transform_0, window_bounds = array<i64: 1, 4, 8>}, {transform_indices = @transform_1, window_bounds = array<i64: 1, 4, 8>}, {transform_indices = @transform_2, window_bounds = array<i64: 1, 8, 4>}, {transform_indices = @transform_3, window_bounds = array<i64: 1, 8, 4>}, {transform_indices = @transform_4, window_bounds = array<i64: 1, 4, 4>}, {transform_indices = @transform_5, window_bounds = array<i64: 1, 4, 4>}, {transform_indices = @transform_6, window_bounds = array<i64: 1, 1, 1>}, {transform_indices = @transform_7, window_bounds = array<i64: 1, 1, 1>}, {transform_indices = @transform_8, window_bounds = array<i64: 1, 8, 4>}, {transform_indices = @transform_9, window_bounds = array<i64: 1, 8, 4>}, {transform_indices = @transform_10, window_bounds = array<i64: 1, 4, 4>}, {transform_indices = @transform_11, window_bounds = array<i64: 1, 4, 4>}, {transform_indices = @transform_12, window_bounds = array<i64: 1, 1, 1>}]} {
    %c0 = arith.constant 0 : index
    %c0_0 = arith.constant 0 : index
    %c0_1 = arith.constant 0 : index
    %0 = vector.load %arg2[%c0, %c0_0, %c0_1] : memref<1x4x8xf32, #tpu.memory_space<vmem>>, vector<1x4x8xf32>
    %1 = vector.shape_cast %0 : vector<1x4x8xf32> to vector<4x8xf32>
    %cst = arith.constant 5.000000e-01 : f32
    %2 = vector.broadcast %cst : f32 to vector<4x8xf32>
    %3 = arith.mulf %1, %2 : vector<4x8xf32>
    %c0_2 = arith.constant 0 : index
    %c0_3 = arith.constant 0 : index
    %c0_4 = arith.constant 0 : index
    %4 = vector.load %arg3[%c0_2, %c0_3, %c0_4] : memref<1x4x8xf32, #tpu.memory_space<vmem>>, vector<1x4x8xf32>
    %5 = vector.shape_cast %4 : vector<1x4x8xf32> to vector<4x8xf32>
    %cst_5 = arith.constant 5.000000e-01 : f32
    %6 = vector.broadcast %cst_5 : f32 to vector<4x8xf32>
    %7 = arith.mulf %5, %6 : vector<4x8xf32>
    %8 = tpu.transpose %3, [1, 0] : vector<4x8xf32> -> vector<8x4xf32>
    %9 = tpu.transpose %7, [1, 0] : vector<4x8xf32> -> vector<8x4xf32>
    %10 = tpu.iota {dimensions = array<i32: 0>} : vector<4x4xi32>
    %11 = tpu.iota {dimensions = array<i32: 1>} : vector<4x4xi32>
    %12 = arith.cmpi eq, %10, %11 : vector<4x4xi32>
    %13 = arith.extui %12 : vector<4x4xi1> to vector<4x4xi32>
    %14 = arith.sitofp %13 : vector<4x4xi32> to vector<4x4xf32>
    %c0_i32 = arith.constant 0 : i32
    %15 = arith.cmpi eq, %arg1, %c0_i32 : i32
    %16 = arith.extui %15 : i1 to i32
    %c0_i32_6 = arith.constant 0 : i32
    %17 = arith.cmpi ne, %16, %c0_i32_6 : i32
    scf.if %17 {
      %c0_118 = arith.constant 0 : index
      %c0_119 = arith.constant 0 : index
      %c0_120 = arith.constant 0 : index
      %957 = vector.load %arg4[%c0_118, %c0_119, %c0_120] : memref<1x8x4xf32, #tpu.memory_space<vmem>>, vector<1x8x4xf32>
      %958 = vector.shape_cast %957 : vector<1x8x4xf32> to vector<8x4xf32>
      %c0_121 = arith.constant 0 : index
      %c0_122 = arith.constant 0 : index
      %c0_123 = arith.constant 0 : index
      %959 = vector.load %arg5[%c0_121, %c0_122, %c0_123] : memref<1x8x4xf32, #tpu.memory_space<vmem>>, vector<1x8x4xf32>
      %960 = vector.shape_cast %959 : vector<1x8x4xf32> to vector<8x4xf32>
      %cst_124 = arith.constant 9.99999996E-13 : f32
      %961 = vector.broadcast %cst_124 : f32 to vector<8x4xf32>
      %962 = arith.addf %958, %961 : vector<8x4xf32>
      %963 = arith.mulf %962, %962 : vector<8x4xf32>
      %964 = arith.mulf %960, %960 : vector<8x4xf32>
      %965 = arith.addf %963, %964 : vector<8x4xf32>
      %966 = math.rsqrt %965 : vector<8x4xf32>
      %967 = arith.mulf %958, %966 : vector<8x4xf32>
      %968 = arith.mulf %960, %966 : vector<8x4xf32>
      %c0_125 = arith.constant 0 : index
      %c0_126 = arith.constant 0 : index
      %969 = vector.load %arg15[%c0_125, %c0_126] : memref<8x4xf32, #tpu.memory_space<vmem>>, vector<8x4xf32>
      tpu.vector_store %arg15[%c0_125, %c0_126], %967 {strides = array<i32>} : memref<8x4xf32, #tpu.memory_space<vmem>>, vector<8x4xf32>,
      %c0_127 = arith.constant 0 : index
      %c0_128 = arith.constant 0 : index
      %970 = vector.load %arg16[%c0_127, %c0_128] : memref<8x4xf32, #tpu.memory_space<vmem>>, vector<8x4xf32>
      tpu.vector_store %arg16[%c0_127, %c0_128], %968 {strides = array<i32>} : memref<8x4xf32, #tpu.memory_space<vmem>>, vector<8x4xf32>,
      %c0_129 = arith.constant 0 : index
      %c0_130 = arith.constant 0 : index
      %c0_131 = arith.constant 0 : index
      %971 = vector.load %arg6[%c0_129, %c0_130, %c0_131] : memref<1x4x4xf32, #tpu.memory_space<vmem>>, vector<1x4x4xf32>
      %972 = vector.shape_cast %971 : vector<1x4x4xf32> to vector<4x4xf32>
      %c0_132 = arith.constant 0 : index
      %c0_133 = arith.constant 0 : index
      %c0_134 = arith.constant 0 : index
      %973 = vector.load %arg7[%c0_132, %c0_133, %c0_134] : memref<1x4x4xf32, #tpu.memory_space<vmem>>, vector<1x4x4xf32>
      %974 = vector.shape_cast %973 : vector<1x4x4xf32> to vector<4x4xf32>
      %cst_135 = arith.constant dense<0.000000e+00> : vector<8x4xf32>
      %975 = tpu.matmul %967, %972, %cst_135 {dimension_numbers = #tpu.dot_dimension_numbers<[1], [0], [0], [1], [0, 0, 1, 1], [], []>} : vector<8x4xf32>, vector<4x4xf32>, vector<8x4xf32> -> vector<8x4xf32>
      %cst_136 = arith.constant dense<0.000000e+00> : vector<8x4xf32>
      %976 = tpu.matmul %968, %974, %cst_136 {dimension_numbers = #tpu.dot_dimension_numbers<[1], [0], [0], [1], [0, 0, 1, 1], [], []>} : vector<8x4xf32>, vector<4x4xf32>, vector<8x4xf32> -> vector<8x4xf32>
      %977 = arith.addf %967, %968 : vector<8x4xf32>
      %978 = arith.addf %972, %974 : vector<4x4xf32>
      %cst_137 = arith.constant dense<0.000000e+00> : vector<8x4xf32>
      %979 = tpu.matmul %977, %978, %cst_137 {dimension_numbers = #tpu.dot_dimension_numbers<[1], [0], [0], [1], [0, 0, 1, 1], [], []>} : vector<8x4xf32>, vector<4x4xf32>, vector<8x4xf32> -> vector<8x4xf32>
      %980 = arith.subf %975, %976 : vector<8x4xf32>
      %981 = arith.subf %979, %975 : vector<8x4xf32>
      %982 = arith.subf %981, %976 : vector<8x4xf32>
      %983 = arith.mulf %980, %980 : vector<8x4xf32>
      %984 = arith.mulf %982, %982 : vector<8x4xf32>
      %985 = arith.addf %983, %984 : vector<8x4xf32>
      %986 = vector.shape_cast %985 : vector<8x4xf32> to vector<1x8x4xf32>
      %cst_138 = arith.constant dense<0.000000e+00> : vector<1xf32>
      %987 = vector.multi_reduction <add>, %986, %cst_138 [1, 2] : vector<1x8x4xf32> to vector<1xf32>
      %988 = vector.shape_cast %987 : vector<1xf32> to vector<1x1x1xf32>
      %989 = vector.extract %988[0, 0, 0] : f32 from vector<1x1x1xf32>
      %990 = math.rsqrt %989 : f32
      %cst_139 = arith.constant 2.000000e+00 : f32
      %991 = arith.mulf %cst_139, %990 : f32
      %992 = vector.broadcast %991 : f32 to vector<4x4xf32>
      %993 = arith.mulf %992, %972 : vector<4x4xf32>
      %c0_140 = arith.constant 0 : index
      %c0_141 = arith.constant 0 : index
      %994 = vector.load %arg17[%c0_140, %c0_141] : memref<4x4xf32, #tpu.memory_space<vmem>>, vector<4x4xf32>
      tpu.vector_store %arg17[%c0_140, %c0_141], %993 {strides = array<i32>} : memref<4x4xf32, #tpu.memory_space<vmem>>, vector<4x4xf32>,
      %995 = vector.broadcast %991 : f32 to vector<4x4xf32>
      %996 = arith.mulf %995, %974 : vector<4x4xf32>
      %c0_142 = arith.constant 0 : index
      %c0_143 = arith.constant 0 : index
      %997 = vector.load %arg18[%c0_142, %c0_143] : memref<4x4xf32, #tpu.memory_space<vmem>>, vector<4x4xf32>
      tpu.vector_store %arg18[%c0_142, %c0_143], %996 {strides = array<i32>} : memref<4x4xf32, #tpu.memory_space<vmem>>, vector<4x4xf32>,
    } else {
    }
    %c0_7 = arith.constant 0 : index
    %c0_8 = arith.constant 0 : index
    %18 = vector.load %arg15[%c0_7, %c0_8] : memref<8x4xf32, #tpu.memory_space<vmem>>, vector<8x4xf32>
    %c0_9 = arith.constant 0 : index
    %c0_10 = arith.constant 0 : index
    %19 = vector.load %arg16[%c0_9, %c0_10] : memref<8x4xf32, #tpu.memory_space<vmem>>, vector<8x4xf32>
    %c0_11 = arith.constant 0 : index
    %c0_12 = arith.constant 0 : index
    %20 = vector.load %arg17[%c0_11, %c0_12] : memref<4x4xf32, #tpu.memory_space<vmem>>, vector<4x4xf32>
    %c0_13 = arith.constant 0 : index
    %c0_14 = arith.constant 0 : index
    %21 = vector.load %arg18[%c0_13, %c0_14] : memref<4x4xf32, #tpu.memory_space<vmem>>, vector<4x4xf32>
    %c0_15 = arith.constant 0 : index
    %c0_16 = arith.constant 0 : index
    %c0_17 = arith.constant 0 : index
    %22 = vector.load %arg8[%c0_15, %c0_16, %c0_17] : memref<1x1x1xf32, #tpu.memory_space<vmem>>, vector<1x1x1xf32>
    %23 = vector.extract %22[0, 0, 0] : f32 from vector<1x1x1xf32>
    %c0_18 = arith.constant 0 : index
    %c0_19 = arith.constant 0 : index
    %c0_20 = arith.constant 0 : index
    %24 = vector.load %arg9[%c0_18, %c0_19, %c0_20] : memref<1x1x1xf32, #tpu.memory_space<vmem>>, vector<1x1x1xf32>
    %25 = vector.extract %24[0, 0, 0] : f32 from vector<1x1x1xf32>
    %cst_21 = arith.constant dense<0.000000e+00> : vector<4x4xf32>
    %26 = tpu.matmul %3, %18, %cst_21 {dimension_numbers = #tpu.dot_dimension_numbers<[1], [0], [0], [1], [0, 0, 1, 1], [], []>} : vector<4x8xf32>, vector<8x4xf32>, vector<4x4xf32> -> vector<4x4xf32>
    %cst_22 = arith.constant dense<0.000000e+00> : vector<4x4xf32>
    %27 = tpu.matmul %7, %19, %cst_22 {dimension_numbers = #tpu.dot_dimension_numbers<[1], [0], [0], [1], [0, 0, 1, 1], [], []>} : vector<4x8xf32>, vector<8x4xf32>, vector<4x4xf32> -> vector<4x4xf32>
    %28 = arith.addf %3, %7 : vector<4x8xf32>
    %29 = arith.addf %18, %19 : vector<8x4xf32>
    %cst_23 = arith.constant dense<0.000000e+00> : vector<4x4xf32>
    %30 = tpu.matmul %28, %29, %cst_23 {dimension_numbers = #tpu.dot_dimension_numbers<[1], [0], [0], [1], [0, 0, 1, 1], [], []>} : vector<4x8xf32>, vector<8x4xf32>, vector<4x4xf32> -> vector<4x4xf32>
    %31 = arith.subf %26, %27 : vector<4x4xf32>
    %32 = arith.subf %30, %26 : vector<4x4xf32>
    %33 = arith.subf %32, %27 : vector<4x4xf32>
    %cst_24 = arith.constant dense<0.000000e+00> : vector<4x4xf32>
    %34 = tpu.matmul %31, %20, %cst_24 {dimension_numbers = #tpu.dot_dimension_numbers<[1], [0], [0], [1], [0, 0, 1, 1], [], []>} : vector<4x4xf32>, vector<4x4xf32>, vector<4x4xf32> -> vector<4x4xf32>
    %cst_25 = arith.constant dense<0.000000e+00> : vector<4x4xf32>
    %35 = tpu.matmul %33, %21, %cst_25 {dimension_numbers = #tpu.dot_dimension_numbers<[1], [0], [0], [1], [0, 0, 1, 1], [], []>} : vector<4x4xf32>, vector<4x4xf32>, vector<4x4xf32> -> vector<4x4xf32>
    %36 = arith.addf %31, %33 : vector<4x4xf32>
    %37 = arith.addf %20, %21 : vector<4x4xf32>
    %cst_26 = arith.constant dense<0.000000e+00> : vector<4x4xf32>
    %38 = tpu.matmul %36, %37, %cst_26 {dimension_numbers = #tpu.dot_dimension_numbers<[1], [0], [0], [1], [0, 0, 1, 1], [], []>} : vector<4x4xf32>, vector<4x4xf32>, vector<4x4xf32> -> vector<4x4xf32>
    %39 = arith.subf %34, %35 : vector<4x4xf32>
    %40 = arith.subf %38, %34 : vector<4x4xf32>
    %41 = arith.subf %40, %35 : vector<4x4xf32>
    %42 = tpu.transpose %39, [1, 0] : vector<4x4xf32> -> vector<4x4xf32>
    %43 = tpu.transpose %41, [1, 0] : vector<4x4xf32> -> vector<4x4xf32>
    %cst_27 = arith.constant 0.000000e+00 : f32
    %44 = vector.broadcast %cst_27 : f32 to vector<4x4xf32>
    %45 = arith.subf %44, %43 : vector<4x4xf32>
    %cst_28 = arith.constant dense<0.000000e+00> : vector<4x4xf32>
    %46 = tpu.matmul %39, %42, %cst_28 {dimension_numbers = #tpu.dot_dimension_numbers<[1], [0], [0], [1], [0, 0, 1, 1], [], []>} : vector<4x4xf32>, vector<4x4xf32>, vector<4x4xf32> -> vector<4x4xf32>
    %cst_29 = arith.constant dense<0.000000e+00> : vector<4x4xf32>
    %47 = tpu.matmul %41, %45, %cst_29 {dimension_numbers = #tpu.dot_dimension_numbers<[1], [0], [0], [1], [0, 0, 1, 1], [], []>} : vector<4x4xf32>, vector<4x4xf32>, vector<4x4xf32> -> vector<4x4xf32>
    %48 = arith.addf %39, %41 : vector<4x4xf32>
    %49 = arith.addf %42, %45 : vector<4x4xf32>
    %cst_30 = arith.constant dense<0.000000e+00> : vector<4x4xf32>
    %50 = tpu.matmul %48, %49, %cst_30 {dimension_numbers = #tpu.dot_dimension_numbers<[1], [0], [0], [1], [0, 0, 1, 1], [], []>} : vector<4x4xf32>, vector<4x4xf32>, vector<4x4xf32> -> vector<4x4xf32>
    %51 = arith.subf %46, %47 : vector<4x4xf32>
    %52 = arith.subf %50, %46 : vector<4x4xf32>
    %53 = arith.subf %52, %47 : vector<4x4xf32>
    %54 = arith.addf %51, %14 : vector<4x4xf32>
    %cst_31 = arith.constant 0.000000e+00 : f32
    %55 = vector.broadcast %cst_31 : f32 to vector<4x4xf32>
    %56 = vector.extract_strided_slice %54 {offsets = [0, 0], sizes = [1, 1], strides = [1, 1]} : vector<4x4xf32> to vector<1x1xf32>
    %57 = vector.extract_strided_slice %53 {offsets = [0, 0], sizes = [1, 1], strides = [1, 1]} : vector<4x4xf32> to vector<1x1xf32>
    %58 = arith.mulf %56, %56 : vector<1x1xf32>
    %59 = arith.mulf %57, %57 : vector<1x1xf32>
    %60 = arith.addf %58, %59 : vector<1x1xf32>
    %cst_32 = arith.constant 1.000000e+00 : f32
    %61 = vector.broadcast %cst_32 : f32 to vector<1x1xf32>
    %62 = arith.divf %61, %60 : vector<1x1xf32>
    %63 = vector.extract_strided_slice %54 {offsets = [0, 0], sizes = [1, 4], strides = [1, 1]} : vector<4x4xf32> to vector<1x4xf32>
    %64 = vector.broadcast %56 : vector<1x1xf32> to vector<1x4xf32>
    %65 = arith.mulf %63, %64 : vector<1x4xf32>
    %66 = vector.extract_strided_slice %53 {offsets = [0, 0], sizes = [1, 4], strides = [1, 1]} : vector<4x4xf32> to vector<1x4xf32>
    %67 = vector.broadcast %57 : vector<1x1xf32> to vector<1x4xf32>
    %68 = arith.mulf %66, %67 : vector<1x4xf32>
    %69 = arith.addf %65, %68 : vector<1x4xf32>
    %70 = vector.broadcast %62 : vector<1x1xf32> to vector<1x4xf32>
    %71 = arith.mulf %69, %70 : vector<1x4xf32>
    %72 = vector.extract_strided_slice %53 {offsets = [0, 0], sizes = [1, 4], strides = [1, 1]} : vector<4x4xf32> to vector<1x4xf32>
    %73 = vector.broadcast %56 : vector<1x1xf32> to vector<1x4xf32>
    %74 = arith.mulf %72, %73 : vector<1x4xf32>
    %75 = vector.extract_strided_slice %54 {offsets = [0, 0], sizes = [1, 4], strides = [1, 1]} : vector<4x4xf32> to vector<1x4xf32>
    %76 = vector.broadcast %57 : vector<1x1xf32> to vector<1x4xf32>
    %77 = arith.mulf %75, %76 : vector<1x4xf32>
    %78 = arith.subf %74, %77 : vector<1x4xf32>
    %79 = vector.broadcast %62 : vector<1x1xf32> to vector<1x4xf32>
    %80 = arith.mulf %78, %79 : vector<1x4xf32>
    %81 = vector.extract_strided_slice %14 {offsets = [0, 0], sizes = [1, 4], strides = [1, 1]} : vector<4x4xf32> to vector<1x4xf32>
    %82 = vector.broadcast %56 : vector<1x1xf32> to vector<1x4xf32>
    %83 = arith.mulf %81, %82 : vector<1x4xf32>
    %84 = vector.extract_strided_slice %55 {offsets = [0, 0], sizes = [1, 4], strides = [1, 1]} : vector<4x4xf32> to vector<1x4xf32>
    %85 = vector.broadcast %57 : vector<1x1xf32> to vector<1x4xf32>
    %86 = arith.mulf %84, %85 : vector<1x4xf32>
    %87 = arith.addf %83, %86 : vector<1x4xf32>
    %88 = vector.broadcast %62 : vector<1x1xf32> to vector<1x4xf32>
    %89 = arith.mulf %87, %88 : vector<1x4xf32>
    %90 = vector.extract_strided_slice %55 {offsets = [0, 0], sizes = [1, 4], strides = [1, 1]} : vector<4x4xf32> to vector<1x4xf32>
    %91 = vector.broadcast %56 : vector<1x1xf32> to vector<1x4xf32>
    %92 = arith.mulf %90, %91 : vector<1x4xf32>
    %93 = vector.extract_strided_slice %14 {offsets = [0, 0], sizes = [1, 4], strides = [1, 1]} : vector<4x4xf32> to vector<1x4xf32>
    %94 = vector.broadcast %57 : vector<1x1xf32> to vector<1x4xf32>
    %95 = arith.mulf %93, %94 : vector<1x4xf32>
    %96 = arith.subf %92, %95 : vector<1x4xf32>
    %97 = vector.broadcast %62 : vector<1x1xf32> to vector<1x4xf32>
    %98 = arith.mulf %96, %97 : vector<1x4xf32>
    %99 = vector.extract_strided_slice %14 {offsets = [0, 0], sizes = [4, 1], strides = [1, 1]} : vector<4x4xf32> to vector<4x1xf32>
    %100 = vector.extract_strided_slice %54 {offsets = [0, 0], sizes = [4, 1], strides = [1, 1]} : vector<4x4xf32> to vector<4x1xf32>
    %101 = arith.subf %100, %99 : vector<4x1xf32>
    %102 = vector.extract_strided_slice %53 {offsets = [0, 0], sizes = [4, 1], strides = [1, 1]} : vector<4x4xf32> to vector<4x1xf32>
    %103 = vector.broadcast %101 : vector<4x1xf32> to vector<4x4xf32>
    %104 = vector.broadcast %71 : vector<1x4xf32> to vector<4x4xf32>
    %105 = arith.mulf %103, %104 : vector<4x4xf32>
    %106 = vector.broadcast %102 : vector<4x1xf32> to vector<4x4xf32>
    %107 = vector.broadcast %80 : vector<1x4xf32> to vector<4x4xf32>
    %108 = arith.mulf %106, %107 : vector<4x4xf32>
    %109 = arith.subf %105, %108 : vector<4x4xf32>
    %110 = arith.subf %54, %109 : vector<4x4xf32>
    %111 = vector.broadcast %101 : vector<4x1xf32> to vector<4x4xf32>
    %112 = vector.broadcast %80 : vector<1x4xf32> to vector<4x4xf32>
    %113 = arith.mulf %111, %112 : vector<4x4xf32>
    %114 = vector.broadcast %102 : vector<4x1xf32> to vector<4x4xf32>
    %115 = vector.broadcast %71 : vector<1x4xf32> to vector<4x4xf32>
    %116 = arith.mulf %114, %115 : vector<4x4xf32>
    %117 = arith.addf %113, %116 : vector<4x4xf32>
    %118 = arith.subf %53, %117 : vector<4x4xf32>
    %119 = vector.broadcast %101 : vector<4x1xf32> to vector<4x4xf32>
    %120 = vector.broadcast %89 : vector<1x4xf32> to vector<4x4xf32>
    %121 = arith.mulf %119, %120 : vector<4x4xf32>
    %122 = vector.broadcast %102 : vector<4x1xf32> to vector<4x4xf32>
    %123 = vector.broadcast %98 : vector<1x4xf32> to vector<4x4xf32>
    %124 = arith.mulf %122, %123 : vector<4x4xf32>
    %125 = arith.subf %121, %124 : vector<4x4xf32>
    %126 = arith.subf %14, %125 : vector<4x4xf32>
    %127 = vector.broadcast %101 : vector<4x1xf32> to vector<4x4xf32>
    %128 = vector.broadcast %98 : vector<1x4xf32> to vector<4x4xf32>
    %129 = arith.mulf %127, %128 : vector<4x4xf32>
    %130 = vector.broadcast %102 : vector<4x1xf32> to vector<4x4xf32>
    %131 = vector.broadcast %89 : vector<1x4xf32> to vector<4x4xf32>
    %132 = arith.mulf %130, %131 : vector<4x4xf32>
    %133 = arith.addf %129, %132 : vector<4x4xf32>
    %134 = arith.subf %55, %133 : vector<4x4xf32>
    %135 = vector.extract_strided_slice %110 {offsets = [1, 1], sizes = [1, 1], strides = [1, 1]} : vector<4x4xf32> to vector<1x1xf32>
    %136 = vector.extract_strided_slice %118 {offsets = [1, 1], sizes = [1, 1], strides = [1, 1]} : vector<4x4xf32> to vector<1x1xf32>
    %137 = arith.mulf %135, %135 : vector<1x1xf32>
    %138 = arith.mulf %136, %136 : vector<1x1xf32>
    %139 = arith.addf %137, %138 : vector<1x1xf32>
    %cst_33 = arith.constant 1.000000e+00 : f32
    %140 = vector.broadcast %cst_33 : f32 to vector<1x1xf32>
    %141 = arith.divf %140, %139 : vector<1x1xf32>
    %142 = vector.extract_strided_slice %110 {offsets = [1, 0], sizes = [1, 4], strides = [1, 1]} : vector<4x4xf32> to vector<1x4xf32>
    %143 = vector.broadcast %135 : vector<1x1xf32> to vector<1x4xf32>
    %144 = arith.mulf %142, %143 : vector<1x4xf32>
    %145 = vector.extract_strided_slice %118 {offsets = [1, 0], sizes = [1, 4], strides = [1, 1]} : vector<4x4xf32> to vector<1x4xf32>
    %146 = vector.broadcast %136 : vector<1x1xf32> to vector<1x4xf32>
    %147 = arith.mulf %145, %146 : vector<1x4xf32>
    %148 = arith.addf %144, %147 : vector<1x4xf32>
    %149 = vector.broadcast %141 : vector<1x1xf32> to vector<1x4xf32>
    %150 = arith.mulf %148, %149 : vector<1x4xf32>
    %151 = vector.extract_strided_slice %118 {offsets = [1, 0], sizes = [1, 4], strides = [1, 1]} : vector<4x4xf32> to vector<1x4xf32>
    %152 = vector.broadcast %135 : vector<1x1xf32> to vector<1x4xf32>
    %153 = arith.mulf %151, %152 : vector<1x4xf32>
    %154 = vector.extract_strided_slice %110 {offsets = [1, 0], sizes = [1, 4], strides = [1, 1]} : vector<4x4xf32> to vector<1x4xf32>
    %155 = vector.broadcast %136 : vector<1x1xf32> to vector<1x4xf32>
    %156 = arith.mulf %154, %155 : vector<1x4xf32>
    %157 = arith.subf %153, %156 : vector<1x4xf32>
    %158 = vector.broadcast %141 : vector<1x1xf32> to vector<1x4xf32>
    %159 = arith.mulf %157, %158 : vector<1x4xf32>
    %160 = vector.extract_strided_slice %126 {offsets = [1, 0], sizes = [1, 4], strides = [1, 1]} : vector<4x4xf32> to vector<1x4xf32>
    %161 = vector.broadcast %135 : vector<1x1xf32> to vector<1x4xf32>
    %162 = arith.mulf %160, %161 : vector<1x4xf32>
    %163 = vector.extract_strided_slice %134 {offsets = [1, 0], sizes = [1, 4], strides = [1, 1]} : vector<4x4xf32> to vector<1x4xf32>
    %164 = vector.broadcast %136 : vector<1x1xf32> to vector<1x4xf32>
    %165 = arith.mulf %163, %164 : vector<1x4xf32>
    %166 = arith.addf %162, %165 : vector<1x4xf32>
    %167 = vector.broadcast %141 : vector<1x1xf32> to vector<1x4xf32>
    %168 = arith.mulf %166, %167 : vector<1x4xf32>
    %169 = vector.extract_strided_slice %134 {offsets = [1, 0], sizes = [1, 4], strides = [1, 1]} : vector<4x4xf32> to vector<1x4xf32>
    %170 = vector.broadcast %135 : vector<1x1xf32> to vector<1x4xf32>
    %171 = arith.mulf %169, %170 : vector<1x4xf32>
    %172 = vector.extract_strided_slice %126 {offsets = [1, 0], sizes = [1, 4], strides = [1, 1]} : vector<4x4xf32> to vector<1x4xf32>
    %173 = vector.broadcast %136 : vector<1x1xf32> to vector<1x4xf32>
    %174 = arith.mulf %172, %173 : vector<1x4xf32>
    %175 = arith.subf %171, %174 : vector<1x4xf32>
    %176 = vector.broadcast %141 : vector<1x1xf32> to vector<1x4xf32>
    %177 = arith.mulf %175, %176 : vector<1x4xf32>
    %178 = vector.extract_strided_slice %14 {offsets = [0, 1], sizes = [4, 1], strides = [1, 1]} : vector<4x4xf32> to vector<4x1xf32>
    %179 = vector.extract_strided_slice %110 {offsets = [0, 1], sizes = [4, 1], strides = [1, 1]} : vector<4x4xf32> to vector<4x1xf32>
    %180 = arith.subf %179, %178 : vector<4x1xf32>
    %181 = vector.extract_strided_slice %118 {offsets = [0, 1], sizes = [4, 1], strides = [1, 1]} : vector<4x4xf32> to vector<4x1xf32>
    %182 = vector.broadcast %180 : vector<4x1xf32> to vector<4x4xf32>
    %183 = vector.broadcast %150 : vector<1x4xf32> to vector<4x4xf32>
    %184 = arith.mulf %182, %183 : vector<4x4xf32>
    %185 = vector.broadcast %181 : vector<4x1xf32> to vector<4x4xf32>
    %186 = vector.broadcast %159 : vector<1x4xf32> to vector<4x4xf32>
    %187 = arith.mulf %185, %186 : vector<4x4xf32>
    %188 = arith.subf %184, %187 : vector<4x4xf32>
    %189 = arith.subf %110, %188 : vector<4x4xf32>
    %190 = vector.broadcast %180 : vector<4x1xf32> to vector<4x4xf32>
    %191 = vector.broadcast %159 : vector<1x4xf32> to vector<4x4xf32>
    %192 = arith.mulf %190, %191 : vector<4x4xf32>
    %193 = vector.broadcast %181 : vector<4x1xf32> to vector<4x4xf32>
    %194 = vector.broadcast %150 : vector<1x4xf32> to vector<4x4xf32>
    %195 = arith.mulf %193, %194 : vector<4x4xf32>
    %196 = arith.addf %192, %195 : vector<4x4xf32>
    %197 = arith.subf %118, %196 : vector<4x4xf32>
    %198 = vector.broadcast %180 : vector<4x1xf32> to vector<4x4xf32>
    %199 = vector.broadcast %168 : vector<1x4xf32> to vector<4x4xf32>
    %200 = arith.mulf %198, %199 : vector<4x4xf32>
    %201 = vector.broadcast %181 : vector<4x1xf32> to vector<4x4xf32>
    %202 = vector.broadcast %177 : vector<1x4xf32> to vector<4x4xf32>
    %203 = arith.mulf %201, %202 : vector<4x4xf32>
    %204 = arith.subf %200, %203 : vector<4x4xf32>
    %205 = arith.subf %126, %204 : vector<4x4xf32>
    %206 = vector.broadcast %180 : vector<4x1xf32> to vector<4x4xf32>
    %207 = vector.broadcast %177 : vector<1x4xf32> to vector<4x4xf32>
    %208 = arith.mulf %206, %207 : vector<4x4xf32>
    %209 = vector.broadcast %181 : vector<4x1xf32> to vector<4x4xf32>
    %210 = vector.broadcast %168 : vector<1x4xf32> to vector<4x4xf32>
    %211 = arith.mulf %209, %210 : vector<4x4xf32>
    %212 = arith.addf %208, %211 : vector<4x4xf32>
    %213 = arith.subf %134, %212 : vector<4x4xf32>
    %214 = vector.extract_strided_slice %189 {offsets = [2, 2], sizes = [1, 1], strides = [1, 1]} : vector<4x4xf32> to vector<1x1xf32>
    %215 = vector.extract_strided_slice %197 {offsets = [2, 2], sizes = [1, 1], strides = [1, 1]} : vector<4x4xf32> to vector<1x1xf32>
    %216 = arith.mulf %214, %214 : vector<1x1xf32>
    %217 = arith.mulf %215, %215 : vector<1x1xf32>
    %218 = arith.addf %216, %217 : vector<1x1xf32>
    %cst_34 = arith.constant 1.000000e+00 : f32
    %219 = vector.broadcast %cst_34 : f32 to vector<1x1xf32>
    %220 = arith.divf %219, %218 : vector<1x1xf32>
    %221 = vector.extract_strided_slice %189 {offsets = [2, 0], sizes = [1, 4], strides = [1, 1]} : vector<4x4xf32> to vector<1x4xf32>
    %222 = vector.broadcast %214 : vector<1x1xf32> to vector<1x4xf32>
    %223 = arith.mulf %221, %222 : vector<1x4xf32>
    %224 = vector.extract_strided_slice %197 {offsets = [2, 0], sizes = [1, 4], strides = [1, 1]} : vector<4x4xf32> to vector<1x4xf32>
    %225 = vector.broadcast %215 : vector<1x1xf32> to vector<1x4xf32>
    %226 = arith.mulf %224, %225 : vector<1x4xf32>
    %227 = arith.addf %223, %226 : vector<1x4xf32>
    %228 = vector.broadcast %220 : vector<1x1xf32> to vector<1x4xf32>
    %229 = arith.mulf %227, %228 : vector<1x4xf32>
    %230 = vector.extract_strided_slice %197 {offsets = [2, 0], sizes = [1, 4], strides = [1, 1]} : vector<4x4xf32> to vector<1x4xf32>
    %231 = vector.broadcast %214 : vector<1x1xf32> to vector<1x4xf32>
    %232 = arith.mulf %230, %231 : vector<1x4xf32>
    %233 = vector.extract_strided_slice %189 {offsets = [2, 0], sizes = [1, 4], strides = [1, 1]} : vector<4x4xf32> to vector<1x4xf32>
    %234 = vector.broadcast %215 : vector<1x1xf32> to vector<1x4xf32>
    %235 = arith.mulf %233, %234 : vector<1x4xf32>
    %236 = arith.subf %232, %235 : vector<1x4xf32>
    %237 = vector.broadcast %220 : vector<1x1xf32> to vector<1x4xf32>
    %238 = arith.mulf %236, %237 : vector<1x4xf32>
    %239 = vector.extract_strided_slice %205 {offsets = [2, 0], sizes = [1, 4], strides = [1, 1]} : vector<4x4xf32> to vector<1x4xf32>
    %240 = vector.broadcast %214 : vector<1x1xf32> to vector<1x4xf32>
    %241 = arith.mulf %239, %240 : vector<1x4xf32>
    %242 = vector.extract_strided_slice %213 {offsets = [2, 0], sizes = [1, 4], strides = [1, 1]} : vector<4x4xf32> to vector<1x4xf32>
    %243 = vector.broadcast %215 : vector<1x1xf32> to vector<1x4xf32>
    %244 = arith.mulf %242, %243 : vector<1x4xf32>
    %245 = arith.addf %241, %244 : vector<1x4xf32>
    %246 = vector.broadcast %220 : vector<1x1xf32> to vector<1x4xf32>
    %247 = arith.mulf %245, %246 : vector<1x4xf32>
    %248 = vector.extract_strided_slice %213 {offsets = [2, 0], sizes = [1, 4], strides = [1, 1]} : vector<4x4xf32> to vector<1x4xf32>
    %249 = vector.broadcast %214 : vector<1x1xf32> to vector<1x4xf32>
    %250 = arith.mulf %248, %249 : vector<1x4xf32>
    %251 = vector.extract_strided_slice %205 {offsets = [2, 0], sizes = [1, 4], strides = [1, 1]} : vector<4x4xf32> to vector<1x4xf32>
    %252 = vector.broadcast %215 : vector<1x1xf32> to vector<1x4xf32>
    %253 = arith.mulf %251, %252 : vector<1x4xf32>
    %254 = arith.subf %250, %253 : vector<1x4xf32>
    %255 = vector.broadcast %220 : vector<1x1xf32> to vector<1x4xf32>
    %256 = arith.mulf %254, %255 : vector<1x4xf32>
    %257 = vector.extract_strided_slice %14 {offsets = [0, 2], sizes = [4, 1], strides = [1, 1]} : vector<4x4xf32> to vector<4x1xf32>
    %258 = vector.extract_strided_slice %189 {offsets = [0, 2], sizes = [4, 1], strides = [1, 1]} : vector<4x4xf32> to vector<4x1xf32>
    %259 = arith.subf %258, %257 : vector<4x1xf32>
    %260 = vector.extract_strided_slice %197 {offsets = [0, 2], sizes = [4, 1], strides = [1, 1]} : vector<4x4xf32> to vector<4x1xf32>
    %261 = vector.broadcast %259 : vector<4x1xf32> to vector<4x4xf32>
    %262 = vector.broadcast %229 : vector<1x4xf32> to vector<4x4xf32>
    %263 = arith.mulf %261, %262 : vector<4x4xf32>
    %264 = vector.broadcast %260 : vector<4x1xf32> to vector<4x4xf32>
    %265 = vector.broadcast %238 : vector<1x4xf32> to vector<4x4xf32>
    %266 = arith.mulf %264, %265 : vector<4x4xf32>
    %267 = arith.subf %263, %266 : vector<4x4xf32>
    %268 = arith.subf %189, %267 : vector<4x4xf32>
    %269 = vector.broadcast %259 : vector<4x1xf32> to vector<4x4xf32>
    %270 = vector.broadcast %238 : vector<1x4xf32> to vector<4x4xf32>
    %271 = arith.mulf %269, %270 : vector<4x4xf32>
    %272 = vector.broadcast %260 : vector<4x1xf32> to vector<4x4xf32>
    %273 = vector.broadcast %229 : vector<1x4xf32> to vector<4x4xf32>
    %274 = arith.mulf %272, %273 : vector<4x4xf32>
    %275 = arith.addf %271, %274 : vector<4x4xf32>
    %276 = arith.subf %197, %275 : vector<4x4xf32>
    %277 = vector.broadcast %259 : vector<4x1xf32> to vector<4x4xf32>
    %278 = vector.broadcast %247 : vector<1x4xf32> to vector<4x4xf32>
    %279 = arith.mulf %277, %278 : vector<4x4xf32>
    %280 = vector.broadcast %260 : vector<4x1xf32> to vector<4x4xf32>
    %281 = vector.broadcast %256 : vector<1x4xf32> to vector<4x4xf32>
    %282 = arith.mulf %280, %281 : vector<4x4xf32>
    %283 = arith.subf %279, %282 : vector<4x4xf32>
    %284 = arith.subf %205, %283 : vector<4x4xf32>
    %285 = vector.broadcast %259 : vector<4x1xf32> to vector<4x4xf32>
    %286 = vector.broadcast %256 : vector<1x4xf32> to vector<4x4xf32>
    %287 = arith.mulf %285, %286 : vector<4x4xf32>
    %288 = vector.broadcast %260 : vector<4x1xf32> to vector<4x4xf32>
    %289 = vector.broadcast %247 : vector<1x4xf32> to vector<4x4xf32>
    %290 = arith.mulf %288, %289 : vector<4x4xf32>
    %291 = arith.addf %287, %290 : vector<4x4xf32>
    %292 = arith.subf %213, %291 : vector<4x4xf32>
    %293 = vector.extract_strided_slice %268 {offsets = [3, 3], sizes = [1, 1], strides = [1, 1]} : vector<4x4xf32> to vector<1x1xf32>
    %294 = vector.extract_strided_slice %276 {offsets = [3, 3], sizes = [1, 1], strides = [1, 1]} : vector<4x4xf32> to vector<1x1xf32>
    %295 = arith.mulf %293, %293 : vector<1x1xf32>
    %296 = arith.mulf %294, %294 : vector<1x1xf32>
    %297 = arith.addf %295, %296 : vector<1x1xf32>
    %cst_35 = arith.constant 1.000000e+00 : f32
    %298 = vector.broadcast %cst_35 : f32 to vector<1x1xf32>
    %299 = arith.divf %298, %297 : vector<1x1xf32>
    %300 = vector.extract_strided_slice %284 {offsets = [3, 0], sizes = [1, 4], strides = [1, 1]} : vector<4x4xf32> to vector<1x4xf32>
    %301 = vector.broadcast %293 : vector<1x1xf32> to vector<1x4xf32>
    %302 = arith.mulf %300, %301 : vector<1x4xf32>
    %303 = vector.extract_strided_slice %292 {offsets = [3, 0], sizes = [1, 4], strides = [1, 1]} : vector<4x4xf32> to vector<1x4xf32>
    %304 = vector.broadcast %294 : vector<1x1xf32> to vector<1x4xf32>
    %305 = arith.mulf %303, %304 : vector<1x4xf32>
    %306 = arith.addf %302, %305 : vector<1x4xf32>
    %307 = vector.broadcast %299 : vector<1x1xf32> to vector<1x4xf32>
    %308 = arith.mulf %306, %307 : vector<1x4xf32>
    %309 = vector.extract_strided_slice %292 {offsets = [3, 0], sizes = [1, 4], strides = [1, 1]} : vector<4x4xf32> to vector<1x4xf32>
    %310 = vector.broadcast %293 : vector<1x1xf32> to vector<1x4xf32>
    %311 = arith.mulf %309, %310 : vector<1x4xf32>
    %312 = vector.extract_strided_slice %284 {offsets = [3, 0], sizes = [1, 4], strides = [1, 1]} : vector<4x4xf32> to vector<1x4xf32>
    %313 = vector.broadcast %294 : vector<1x1xf32> to vector<1x4xf32>
    %314 = arith.mulf %312, %313 : vector<1x4xf32>
    %315 = arith.subf %311, %314 : vector<1x4xf32>
    %316 = vector.broadcast %299 : vector<1x1xf32> to vector<1x4xf32>
    %317 = arith.mulf %315, %316 : vector<1x4xf32>
    %318 = vector.extract_strided_slice %14 {offsets = [0, 3], sizes = [4, 1], strides = [1, 1]} : vector<4x4xf32> to vector<4x1xf32>
    %319 = vector.extract_strided_slice %268 {offsets = [0, 3], sizes = [4, 1], strides = [1, 1]} : vector<4x4xf32> to vector<4x1xf32>
    %320 = arith.subf %319, %318 : vector<4x1xf32>
    %321 = vector.extract_strided_slice %276 {offsets = [0, 3], sizes = [4, 1], strides = [1, 1]} : vector<4x4xf32> to vector<4x1xf32>
    %322 = vector.broadcast %320 : vector<4x1xf32> to vector<4x4xf32>
    %323 = vector.broadcast %308 : vector<1x4xf32> to vector<4x4xf32>
    %324 = arith.mulf %322, %323 : vector<4x4xf32>
    %325 = vector.broadcast %321 : vector<4x1xf32> to vector<4x4xf32>
    %326 = vector.broadcast %317 : vector<1x4xf32> to vector<4x4xf32>
    %327 = arith.mulf %325, %326 : vector<4x4xf32>
    %328 = arith.subf %324, %327 : vector<4x4xf32>
    %329 = arith.subf %284, %328 : vector<4x4xf32>
    %330 = vector.broadcast %320 : vector<4x1xf32> to vector<4x4xf32>
    %331 = vector.broadcast %317 : vector<1x4xf32> to vector<4x4xf32>
    %332 = arith.mulf %330, %331 : vector<4x4xf32>
    %333 = vector.broadcast %321 : vector<4x1xf32> to vector<4x4xf32>
    %334 = vector.broadcast %308 : vector<1x4xf32> to vector<4x4xf32>
    %335 = arith.mulf %333, %334 : vector<4x4xf32>
    %336 = arith.addf %332, %335 : vector<4x4xf32>
    %337 = arith.subf %292, %336 : vector<4x4xf32>
    %338 = tpu.transpose %329, [1, 0] : vector<4x4xf32> -> vector<4x4xf32>
    %339 = tpu.transpose %337, [1, 0] : vector<4x4xf32> -> vector<4x4xf32>
    %cst_36 = arith.constant dense<0.000000e+00> : vector<8x4xf32>
    %340 = tpu.matmul %8, %338, %cst_36 {dimension_numbers = #tpu.dot_dimension_numbers<[1], [0], [0], [1], [0, 0, 1, 1], [], []>} : vector<8x4xf32>, vector<4x4xf32>, vector<8x4xf32> -> vector<8x4xf32>
    %cst_37 = arith.constant dense<0.000000e+00> : vector<8x4xf32>
    %341 = tpu.matmul %9, %339, %cst_37 {dimension_numbers = #tpu.dot_dimension_numbers<[1], [0], [0], [1], [0, 0, 1, 1], [], []>} : vector<8x4xf32>, vector<4x4xf32>, vector<8x4xf32> -> vector<8x4xf32>
    %342 = arith.addf %8, %9 : vector<8x4xf32>
    %343 = arith.addf %338, %339 : vector<4x4xf32>
    %cst_38 = arith.constant dense<0.000000e+00> : vector<8x4xf32>
    %344 = tpu.matmul %342, %343, %cst_38 {dimension_numbers = #tpu.dot_dimension_numbers<[1], [0], [0], [1], [0, 0, 1, 1], [], []>} : vector<8x4xf32>, vector<4x4xf32>, vector<8x4xf32> -> vector<8x4xf32>
    %345 = arith.subf %340, %341 : vector<8x4xf32>
    %346 = arith.subf %344, %340 : vector<8x4xf32>
    %347 = arith.subf %346, %341 : vector<8x4xf32>
    %cst_39 = arith.constant 0.000000e+00 : f32
    %348 = vector.broadcast %cst_39 : f32 to vector<4x4xf32>
    %349 = arith.subf %348, %41 : vector<4x4xf32>
    %cst_40 = arith.constant dense<0.000000e+00> : vector<8x4xf32>
    %350 = tpu.matmul %345, %39, %cst_40 {dimension_numbers = #tpu.dot_dimension_numbers<[1], [0], [0], [1], [0, 0, 1, 1], [], []>} : vector<8x4xf32>, vector<4x4xf32>, vector<8x4xf32> -> vector<8x4xf32>
    %cst_41 = arith.constant dense<0.000000e+00> : vector<8x4xf32>
    %351 = tpu.matmul %347, %349, %cst_41 {dimension_numbers = #tpu.dot_dimension_numbers<[1], [0], [0], [1], [0, 0, 1, 1], [], []>} : vector<8x4xf32>, vector<4x4xf32>, vector<8x4xf32> -> vector<8x4xf32>
    %352 = arith.addf %345, %347 : vector<8x4xf32>
    %353 = arith.addf %39, %349 : vector<4x4xf32>
    %cst_42 = arith.constant dense<0.000000e+00> : vector<8x4xf32>
    %354 = tpu.matmul %352, %353, %cst_42 {dimension_numbers = #tpu.dot_dimension_numbers<[1], [0], [0], [1], [0, 0, 1, 1], [], []>} : vector<8x4xf32>, vector<4x4xf32>, vector<8x4xf32> -> vector<8x4xf32>
    %355 = arith.subf %350, %351 : vector<8x4xf32>
    %356 = arith.subf %354, %350 : vector<8x4xf32>
    %357 = arith.subf %356, %351 : vector<8x4xf32>
    %358 = tpu.transpose %20, [1, 0] : vector<4x4xf32> -> vector<4x4xf32>
    %359 = tpu.transpose %21, [1, 0] : vector<4x4xf32> -> vector<4x4xf32>
    %cst_43 = arith.constant dense<0.000000e+00> : vector<8x4xf32>
    %360 = tpu.matmul %355, %358, %cst_43 {dimension_numbers = #tpu.dot_dimension_numbers<[1], [0], [0], [1], [0, 0, 1, 1], [], []>} : vector<8x4xf32>, vector<4x4xf32>, vector<8x4xf32> -> vector<8x4xf32>
    %cst_44 = arith.constant dense<0.000000e+00> : vector<8x4xf32>
    %361 = tpu.matmul %357, %359, %cst_44 {dimension_numbers = #tpu.dot_dimension_numbers<[1], [0], [0], [1], [0, 0, 1, 1], [], []>} : vector<8x4xf32>, vector<4x4xf32>, vector<8x4xf32> -> vector<8x4xf32>
    %362 = arith.addf %355, %357 : vector<8x4xf32>
    %363 = arith.addf %358, %359 : vector<4x4xf32>
    %cst_45 = arith.constant dense<0.000000e+00> : vector<8x4xf32>
    %364 = tpu.matmul %362, %363, %cst_45 {dimension_numbers = #tpu.dot_dimension_numbers<[1], [0], [0], [1], [0, 0, 1, 1], [], []>} : vector<8x4xf32>, vector<4x4xf32>, vector<8x4xf32> -> vector<8x4xf32>
    %365 = arith.subf %360, %361 : vector<8x4xf32>
    %366 = arith.subf %364, %360 : vector<8x4xf32>
    %367 = arith.subf %366, %361 : vector<8x4xf32>
    %368 = vector.broadcast %23 : f32 to vector<8x4xf32>
    %369 = arith.mulf %368, %365 : vector<8x4xf32>
    %370 = arith.addf %18, %369 : vector<8x4xf32>
    %371 = vector.broadcast %23 : f32 to vector<8x4xf32>
    %372 = arith.mulf %371, %367 : vector<8x4xf32>
    %373 = arith.addf %19, %372 : vector<8x4xf32>
    %cst_46 = arith.constant 9.99999996E-13 : f32
    %374 = vector.broadcast %cst_46 : f32 to vector<8x4xf32>
    %375 = arith.addf %370, %374 : vector<8x4xf32>
    %376 = arith.mulf %375, %375 : vector<8x4xf32>
    %377 = arith.mulf %373, %373 : vector<8x4xf32>
    %378 = arith.addf %376, %377 : vector<8x4xf32>
    %379 = math.rsqrt %378 : vector<8x4xf32>
    %380 = arith.mulf %370, %379 : vector<8x4xf32>
    %381 = arith.mulf %373, %379 : vector<8x4xf32>
    %cst_47 = arith.constant dense<0.000000e+00> : vector<4x4xf32>
    %382 = tpu.matmul %3, %380, %cst_47 {dimension_numbers = #tpu.dot_dimension_numbers<[1], [0], [0], [1], [0, 0, 1, 1], [], []>} : vector<4x8xf32>, vector<8x4xf32>, vector<4x4xf32> -> vector<4x4xf32>
    %cst_48 = arith.constant dense<0.000000e+00> : vector<4x4xf32>
    %383 = tpu.matmul %7, %381, %cst_48 {dimension_numbers = #tpu.dot_dimension_numbers<[1], [0], [0], [1], [0, 0, 1, 1], [], []>} : vector<4x8xf32>, vector<8x4xf32>, vector<4x4xf32> -> vector<4x4xf32>
    %384 = arith.addf %3, %7 : vector<4x8xf32>
    %385 = arith.addf %380, %381 : vector<8x4xf32>
    %cst_49 = arith.constant dense<0.000000e+00> : vector<4x4xf32>
    %386 = tpu.matmul %384, %385, %cst_49 {dimension_numbers = #tpu.dot_dimension_numbers<[1], [0], [0], [1], [0, 0, 1, 1], [], []>} : vector<4x8xf32>, vector<8x4xf32>, vector<4x4xf32> -> vector<4x4xf32>
    %387 = arith.subf %382, %383 : vector<4x4xf32>
    %388 = arith.subf %386, %382 : vector<4x4xf32>
    %389 = arith.subf %388, %383 : vector<4x4xf32>
    %cst_50 = arith.constant dense<0.000000e+00> : vector<4x4xf32>
    %390 = tpu.matmul %387, %20, %cst_50 {dimension_numbers = #tpu.dot_dimension_numbers<[1], [0], [0], [1], [0, 0, 1, 1], [], []>} : vector<4x4xf32>, vector<4x4xf32>, vector<4x4xf32> -> vector<4x4xf32>
    %cst_51 = arith.constant dense<0.000000e+00> : vector<4x4xf32>
    %391 = tpu.matmul %389, %21, %cst_51 {dimension_numbers = #tpu.dot_dimension_numbers<[1], [0], [0], [1], [0, 0, 1, 1], [], []>} : vector<4x4xf32>, vector<4x4xf32>, vector<4x4xf32> -> vector<4x4xf32>
    %392 = arith.addf %387, %389 : vector<4x4xf32>
    %393 = arith.addf %20, %21 : vector<4x4xf32>
    %cst_52 = arith.constant dense<0.000000e+00> : vector<4x4xf32>
    %394 = tpu.matmul %392, %393, %cst_52 {dimension_numbers = #tpu.dot_dimension_numbers<[1], [0], [0], [1], [0, 0, 1, 1], [], []>} : vector<4x4xf32>, vector<4x4xf32>, vector<4x4xf32> -> vector<4x4xf32>
    %395 = arith.subf %390, %391 : vector<4x4xf32>
    %396 = arith.subf %394, %390 : vector<4x4xf32>
    %397 = arith.subf %396, %391 : vector<4x4xf32>
    %398 = tpu.transpose %395, [1, 0] : vector<4x4xf32> -> vector<4x4xf32>
    %399 = tpu.transpose %397, [1, 0] : vector<4x4xf32> -> vector<4x4xf32>
    %cst_53 = arith.constant 0.000000e+00 : f32
    %400 = vector.broadcast %cst_53 : f32 to vector<4x4xf32>
    %401 = arith.subf %400, %399 : vector<4x4xf32>
    %cst_54 = arith.constant dense<0.000000e+00> : vector<4x4xf32>
    %402 = tpu.matmul %395, %398, %cst_54 {dimension_numbers = #tpu.dot_dimension_numbers<[1], [0], [0], [1], [0, 0, 1, 1], [], []>} : vector<4x4xf32>, vector<4x4xf32>, vector<4x4xf32> -> vector<4x4xf32>
    %cst_55 = arith.constant dense<0.000000e+00> : vector<4x4xf32>
    %403 = tpu.matmul %397, %401, %cst_55 {dimension_numbers = #tpu.dot_dimension_numbers<[1], [0], [0], [1], [0, 0, 1, 1], [], []>} : vector<4x4xf32>, vector<4x4xf32>, vector<4x4xf32> -> vector<4x4xf32>
    %404 = arith.addf %395, %397 : vector<4x4xf32>
    %405 = arith.addf %398, %401 : vector<4x4xf32>
    %cst_56 = arith.constant dense<0.000000e+00> : vector<4x4xf32>
    %406 = tpu.matmul %404, %405, %cst_56 {dimension_numbers = #tpu.dot_dimension_numbers<[1], [0], [0], [1], [0, 0, 1, 1], [], []>} : vector<4x4xf32>, vector<4x4xf32>, vector<4x4xf32> -> vector<4x4xf32>
    %407 = arith.subf %402, %403 : vector<4x4xf32>
    %408 = arith.subf %406, %402 : vector<4x4xf32>
    %409 = arith.subf %408, %403 : vector<4x4xf32>
    %410 = arith.addf %407, %14 : vector<4x4xf32>
    %cst_57 = arith.constant 0.000000e+00 : f32
    %411 = vector.broadcast %cst_57 : f32 to vector<4x4xf32>
    %412 = vector.extract_strided_slice %410 {offsets = [0, 0], sizes = [1, 1], strides = [1, 1]} : vector<4x4xf32> to vector<1x1xf32>
    %413 = vector.extract_strided_slice %409 {offsets = [0, 0], sizes = [1, 1], strides = [1, 1]} : vector<4x4xf32> to vector<1x1xf32>
    %414 = arith.mulf %412, %412 : vector<1x1xf32>
    %415 = arith.mulf %413, %413 : vector<1x1xf32>
    %416 = arith.addf %414, %415 : vector<1x1xf32>
    %cst_58 = arith.constant 1.000000e+00 : f32
    %417 = vector.broadcast %cst_58 : f32 to vector<1x1xf32>
    %418 = arith.divf %417, %416 : vector<1x1xf32>
    %419 = vector.extract_strided_slice %410 {offsets = [0, 0], sizes = [1, 4], strides = [1, 1]} : vector<4x4xf32> to vector<1x4xf32>
    %420 = vector.broadcast %412 : vector<1x1xf32> to vector<1x4xf32>
    %421 = arith.mulf %419, %420 : vector<1x4xf32>
    %422 = vector.extract_strided_slice %409 {offsets = [0, 0], sizes = [1, 4], strides = [1, 1]} : vector<4x4xf32> to vector<1x4xf32>
    %423 = vector.broadcast %413 : vector<1x1xf32> to vector<1x4xf32>
    %424 = arith.mulf %422, %423 : vector<1x4xf32>
    %425 = arith.addf %421, %424 : vector<1x4xf32>
    %426 = vector.broadcast %418 : vector<1x1xf32> to vector<1x4xf32>
    %427 = arith.mulf %425, %426 : vector<1x4xf32>
    %428 = vector.extract_strided_slice %409 {offsets = [0, 0], sizes = [1, 4], strides = [1, 1]} : vector<4x4xf32> to vector<1x4xf32>
    %429 = vector.broadcast %412 : vector<1x1xf32> to vector<1x4xf32>
    %430 = arith.mulf %428, %429 : vector<1x4xf32>
    %431 = vector.extract_strided_slice %410 {offsets = [0, 0], sizes = [1, 4], strides = [1, 1]} : vector<4x4xf32> to vector<1x4xf32>
    %432 = vector.broadcast %413 : vector<1x1xf32> to vector<1x4xf32>
    %433 = arith.mulf %431, %432 : vector<1x4xf32>
    %434 = arith.subf %430, %433 : vector<1x4xf32>
    %435 = vector.broadcast %418 : vector<1x1xf32> to vector<1x4xf32>
    %436 = arith.mulf %434, %435 : vector<1x4xf32>
    %437 = vector.extract_strided_slice %14 {offsets = [0, 0], sizes = [1, 4], strides = [1, 1]} : vector<4x4xf32> to vector<1x4xf32>
    %438 = vector.broadcast %412 : vector<1x1xf32> to vector<1x4xf32>
    %439 = arith.mulf %437, %438 : vector<1x4xf32>
    %440 = vector.extract_strided_slice %411 {offsets = [0, 0], sizes = [1, 4], strides = [1, 1]} : vector<4x4xf32> to vector<1x4xf32>
    %441 = vector.broadcast %413 : vector<1x1xf32> to vector<1x4xf32>
    %442 = arith.mulf %440, %441 : vector<1x4xf32>
    %443 = arith.addf %439, %442 : vector<1x4xf32>
    %444 = vector.broadcast %418 : vector<1x1xf32> to vector<1x4xf32>
    %445 = arith.mulf %443, %444 : vector<1x4xf32>
    %446 = vector.extract_strided_slice %411 {offsets = [0, 0], sizes = [1, 4], strides = [1, 1]} : vector<4x4xf32> to vector<1x4xf32>
    %447 = vector.broadcast %412 : vector<1x1xf32> to vector<1x4xf32>
    %448 = arith.mulf %446, %447 : vector<1x4xf32>
    %449 = vector.extract_strided_slice %14 {offsets = [0, 0], sizes = [1, 4], strides = [1, 1]} : vector<4x4xf32> to vector<1x4xf32>
    %450 = vector.broadcast %413 : vector<1x1xf32> to vector<1x4xf32>
    %451 = arith.mulf %449, %450 : vector<1x4xf32>
    %452 = arith.subf %448, %451 : vector<1x4xf32>
    %453 = vector.broadcast %418 : vector<1x1xf32> to vector<1x4xf32>
    %454 = arith.mulf %452, %453 : vector<1x4xf32>
    %455 = vector.extract_strided_slice %14 {offsets = [0, 0], sizes = [4, 1], strides = [1, 1]} : vector<4x4xf32> to vector<4x1xf32>
    %456 = vector.extract_strided_slice %410 {offsets = [0, 0], sizes = [4, 1], strides = [1, 1]} : vector<4x4xf32> to vector<4x1xf32>
    %457 = arith.subf %456, %455 : vector<4x1xf32>
    %458 = vector.extract_strided_slice %409 {offsets = [0, 0], sizes = [4, 1], strides = [1, 1]} : vector<4x4xf32> to vector<4x1xf32>
    %459 = vector.broadcast %457 : vector<4x1xf32> to vector<4x4xf32>
    %460 = vector.broadcast %427 : vector<1x4xf32> to vector<4x4xf32>
    %461 = arith.mulf %459, %460 : vector<4x4xf32>
    %462 = vector.broadcast %458 : vector<4x1xf32> to vector<4x4xf32>
    %463 = vector.broadcast %436 : vector<1x4xf32> to vector<4x4xf32>
    %464 = arith.mulf %462, %463 : vector<4x4xf32>
    %465 = arith.subf %461, %464 : vector<4x4xf32>
    %466 = arith.subf %410, %465 : vector<4x4xf32>
    %467 = vector.broadcast %457 : vector<4x1xf32> to vector<4x4xf32>
    %468 = vector.broadcast %436 : vector<1x4xf32> to vector<4x4xf32>
    %469 = arith.mulf %467, %468 : vector<4x4xf32>
    %470 = vector.broadcast %458 : vector<4x1xf32> to vector<4x4xf32>
    %471 = vector.broadcast %427 : vector<1x4xf32> to vector<4x4xf32>
    %472 = arith.mulf %470, %471 : vector<4x4xf32>
    %473 = arith.addf %469, %472 : vector<4x4xf32>
    %474 = arith.subf %409, %473 : vector<4x4xf32>
    %475 = vector.broadcast %457 : vector<4x1xf32> to vector<4x4xf32>
    %476 = vector.broadcast %445 : vector<1x4xf32> to vector<4x4xf32>
    %477 = arith.mulf %475, %476 : vector<4x4xf32>
    %478 = vector.broadcast %458 : vector<4x1xf32> to vector<4x4xf32>
    %479 = vector.broadcast %454 : vector<1x4xf32> to vector<4x4xf32>
    %480 = arith.mulf %478, %479 : vector<4x4xf32>
    %481 = arith.subf %477, %480 : vector<4x4xf32>
    %482 = arith.subf %14, %481 : vector<4x4xf32>
    %483 = vector.broadcast %457 : vector<4x1xf32> to vector<4x4xf32>
    %484 = vector.broadcast %454 : vector<1x4xf32> to vector<4x4xf32>
    %485 = arith.mulf %483, %484 : vector<4x4xf32>
    %486 = vector.broadcast %458 : vector<4x1xf32> to vector<4x4xf32>
    %487 = vector.broadcast %445 : vector<1x4xf32> to vector<4x4xf32>
    %488 = arith.mulf %486, %487 : vector<4x4xf32>
    %489 = arith.addf %485, %488 : vector<4x4xf32>
    %490 = arith.subf %411, %489 : vector<4x4xf32>
    %491 = vector.extract_strided_slice %466 {offsets = [1, 1], sizes = [1, 1], strides = [1, 1]} : vector<4x4xf32> to vector<1x1xf32>
    %492 = vector.extract_strided_slice %474 {offsets = [1, 1], sizes = [1, 1], strides = [1, 1]} : vector<4x4xf32> to vector<1x1xf32>
    %493 = arith.mulf %491, %491 : vector<1x1xf32>
    %494 = arith.mulf %492, %492 : vector<1x1xf32>
    %495 = arith.addf %493, %494 : vector<1x1xf32>
    %cst_59 = arith.constant 1.000000e+00 : f32
    %496 = vector.broadcast %cst_59 : f32 to vector<1x1xf32>
    %497 = arith.divf %496, %495 : vector<1x1xf32>
    %498 = vector.extract_strided_slice %466 {offsets = [1, 0], sizes = [1, 4], strides = [1, 1]} : vector<4x4xf32> to vector<1x4xf32>
    %499 = vector.broadcast %491 : vector<1x1xf32> to vector<1x4xf32>
    %500 = arith.mulf %498, %499 : vector<1x4xf32>
    %501 = vector.extract_strided_slice %474 {offsets = [1, 0], sizes = [1, 4], strides = [1, 1]} : vector<4x4xf32> to vector<1x4xf32>
    %502 = vector.broadcast %492 : vector<1x1xf32> to vector<1x4xf32>
    %503 = arith.mulf %501, %502 : vector<1x4xf32>
    %504 = arith.addf %500, %503 : vector<1x4xf32>
    %505 = vector.broadcast %497 : vector<1x1xf32> to vector<1x4xf32>
    %506 = arith.mulf %504, %505 : vector<1x4xf32>
    %507 = vector.extract_strided_slice %474 {offsets = [1, 0], sizes = [1, 4], strides = [1, 1]} : vector<4x4xf32> to vector<1x4xf32>
    %508 = vector.broadcast %491 : vector<1x1xf32> to vector<1x4xf32>
    %509 = arith.mulf %507, %508 : vector<1x4xf32>
    %510 = vector.extract_strided_slice %466 {offsets = [1, 0], sizes = [1, 4], strides = [1, 1]} : vector<4x4xf32> to vector<1x4xf32>
    %511 = vector.broadcast %492 : vector<1x1xf32> to vector<1x4xf32>
    %512 = arith.mulf %510, %511 : vector<1x4xf32>
    %513 = arith.subf %509, %512 : vector<1x4xf32>
    %514 = vector.broadcast %497 : vector<1x1xf32> to vector<1x4xf32>
    %515 = arith.mulf %513, %514 : vector<1x4xf32>
    %516 = vector.extract_strided_slice %482 {offsets = [1, 0], sizes = [1, 4], strides = [1, 1]} : vector<4x4xf32> to vector<1x4xf32>
    %517 = vector.broadcast %491 : vector<1x1xf32> to vector<1x4xf32>
    %518 = arith.mulf %516, %517 : vector<1x4xf32>
    %519 = vector.extract_strided_slice %490 {offsets = [1, 0], sizes = [1, 4], strides = [1, 1]} : vector<4x4xf32> to vector<1x4xf32>
    %520 = vector.broadcast %492 : vector<1x1xf32> to vector<1x4xf32>
    %521 = arith.mulf %519, %520 : vector<1x4xf32>
    %522 = arith.addf %518, %521 : vector<1x4xf32>
    %523 = vector.broadcast %497 : vector<1x1xf32> to vector<1x4xf32>
    %524 = arith.mulf %522, %523 : vector<1x4xf32>
    %525 = vector.extract_strided_slice %490 {offsets = [1, 0], sizes = [1, 4], strides = [1, 1]} : vector<4x4xf32> to vector<1x4xf32>
    %526 = vector.broadcast %491 : vector<1x1xf32> to vector<1x4xf32>
    %527 = arith.mulf %525, %526 : vector<1x4xf32>
    %528 = vector.extract_strided_slice %482 {offsets = [1, 0], sizes = [1, 4], strides = [1, 1]} : vector<4x4xf32> to vector<1x4xf32>
    %529 = vector.broadcast %492 : vector<1x1xf32> to vector<1x4xf32>
    %530 = arith.mulf %528, %529 : vector<1x4xf32>
    %531 = arith.subf %527, %530 : vector<1x4xf32>
    %532 = vector.broadcast %497 : vector<1x1xf32> to vector<1x4xf32>
    %533 = arith.mulf %531, %532 : vector<1x4xf32>
    %534 = vector.extract_strided_slice %14 {offsets = [0, 1], sizes = [4, 1], strides = [1, 1]} : vector<4x4xf32> to vector<4x1xf32>
    %535 = vector.extract_strided_slice %466 {offsets = [0, 1], sizes = [4, 1], strides = [1, 1]} : vector<4x4xf32> to vector<4x1xf32>
    %536 = arith.subf %535, %534 : vector<4x1xf32>
    %537 = vector.extract_strided_slice %474 {offsets = [0, 1], sizes = [4, 1], strides = [1, 1]} : vector<4x4xf32> to vector<4x1xf32>
    %538 = vector.broadcast %536 : vector<4x1xf32> to vector<4x4xf32>
    %539 = vector.broadcast %506 : vector<1x4xf32> to vector<4x4xf32>
    %540 = arith.mulf %538, %539 : vector<4x4xf32>
    %541 = vector.broadcast %537 : vector<4x1xf32> to vector<4x4xf32>
    %542 = vector.broadcast %515 : vector<1x4xf32> to vector<4x4xf32>
    %543 = arith.mulf %541, %542 : vector<4x4xf32>
    %544 = arith.subf %540, %543 : vector<4x4xf32>
    %545 = arith.subf %466, %544 : vector<4x4xf32>
    %546 = vector.broadcast %536 : vector<4x1xf32> to vector<4x4xf32>
    %547 = vector.broadcast %515 : vector<1x4xf32> to vector<4x4xf32>
    %548 = arith.mulf %546, %547 : vector<4x4xf32>
    %549 = vector.broadcast %537 : vector<4x1xf32> to vector<4x4xf32>
    %550 = vector.broadcast %506 : vector<1x4xf32> to vector<4x4xf32>
    %551 = arith.mulf %549, %550 : vector<4x4xf32>
    %552 = arith.addf %548, %551 : vector<4x4xf32>
    %553 = arith.subf %474, %552 : vector<4x4xf32>
    %554 = vector.broadcast %536 : vector<4x1xf32> to vector<4x4xf32>
    %555 = vector.broadcast %524 : vector<1x4xf32> to vector<4x4xf32>
    %556 = arith.mulf %554, %555 : vector<4x4xf32>
    %557 = vector.broadcast %537 : vector<4x1xf32> to vector<4x4xf32>
    %558 = vector.broadcast %533 : vector<1x4xf32> to vector<4x4xf32>
    %559 = arith.mulf %557, %558 : vector<4x4xf32>
    %560 = arith.subf %556, %559 : vector<4x4xf32>
    %561 = arith.subf %482, %560 : vector<4x4xf32>
    %562 = vector.broadcast %536 : vector<4x1xf32> to vector<4x4xf32>
    %563 = vector.broadcast %533 : vector<1x4xf32> to vector<4x4xf32>
    %564 = arith.mulf %562, %563 : vector<4x4xf32>
    %565 = vector.broadcast %537 : vector<4x1xf32> to vector<4x4xf32>
    %566 = vector.broadcast %524 : vector<1x4xf32> to vector<4x4xf32>
    %567 = arith.mulf %565, %566 : vector<4x4xf32>
    %568 = arith.addf %564, %567 : vector<4x4xf32>
    %569 = arith.subf %490, %568 : vector<4x4xf32>
    %570 = vector.extract_strided_slice %545 {offsets = [2, 2], sizes = [1, 1], strides = [1, 1]} : vector<4x4xf32> to vector<1x1xf32>
    %571 = vector.extract_strided_slice %553 {offsets = [2, 2], sizes = [1, 1], strides = [1, 1]} : vector<4x4xf32> to vector<1x1xf32>
    %572 = arith.mulf %570, %570 : vector<1x1xf32>
    %573 = arith.mulf %571, %571 : vector<1x1xf32>
    %574 = arith.addf %572, %573 : vector<1x1xf32>
    %cst_60 = arith.constant 1.000000e+00 : f32
    %575 = vector.broadcast %cst_60 : f32 to vector<1x1xf32>
    %576 = arith.divf %575, %574 : vector<1x1xf32>
    %577 = vector.extract_strided_slice %545 {offsets = [2, 0], sizes = [1, 4], strides = [1, 1]} : vector<4x4xf32> to vector<1x4xf32>
    %578 = vector.broadcast %570 : vector<1x1xf32> to vector<1x4xf32>
    %579 = arith.mulf %577, %578 : vector<1x4xf32>
    %580 = vector.extract_strided_slice %553 {offsets = [2, 0], sizes = [1, 4], strides = [1, 1]} : vector<4x4xf32> to vector<1x4xf32>
    %581 = vector.broadcast %571 : vector<1x1xf32> to vector<1x4xf32>
    %582 = arith.mulf %580, %581 : vector<1x4xf32>
    %583 = arith.addf %579, %582 : vector<1x4xf32>
    %584 = vector.broadcast %576 : vector<1x1xf32> to vector<1x4xf32>
    %585 = arith.mulf %583, %584 : vector<1x4xf32>
    %586 = vector.extract_strided_slice %553 {offsets = [2, 0], sizes = [1, 4], strides = [1, 1]} : vector<4x4xf32> to vector<1x4xf32>
    %587 = vector.broadcast %570 : vector<1x1xf32> to vector<1x4xf32>
    %588 = arith.mulf %586, %587 : vector<1x4xf32>
    %589 = vector.extract_strided_slice %545 {offsets = [2, 0], sizes = [1, 4], strides = [1, 1]} : vector<4x4xf32> to vector<1x4xf32>
    %590 = vector.broadcast %571 : vector<1x1xf32> to vector<1x4xf32>
    %591 = arith.mulf %589, %590 : vector<1x4xf32>
    %592 = arith.subf %588, %591 : vector<1x4xf32>
    %593 = vector.broadcast %576 : vector<1x1xf32> to vector<1x4xf32>
    %594 = arith.mulf %592, %593 : vector<1x4xf32>
    %595 = vector.extract_strided_slice %561 {offsets = [2, 0], sizes = [1, 4], strides = [1, 1]} : vector<4x4xf32> to vector<1x4xf32>
    %596 = vector.broadcast %570 : vector<1x1xf32> to vector<1x4xf32>
    %597 = arith.mulf %595, %596 : vector<1x4xf32>
    %598 = vector.extract_strided_slice %569 {offsets = [2, 0], sizes = [1, 4], strides = [1, 1]} : vector<4x4xf32> to vector<1x4xf32>
    %599 = vector.broadcast %571 : vector<1x1xf32> to vector<1x4xf32>
    %600 = arith.mulf %598, %599 : vector<1x4xf32>
    %601 = arith.addf %597, %600 : vector<1x4xf32>
    %602 = vector.broadcast %576 : vector<1x1xf32> to vector<1x4xf32>
    %603 = arith.mulf %601, %602 : vector<1x4xf32>
    %604 = vector.extract_strided_slice %569 {offsets = [2, 0], sizes = [1, 4], strides = [1, 1]} : vector<4x4xf32> to vector<1x4xf32>
    %605 = vector.broadcast %570 : vector<1x1xf32> to vector<1x4xf32>
    %606 = arith.mulf %604, %605 : vector<1x4xf32>
    %607 = vector.extract_strided_slice %561 {offsets = [2, 0], sizes = [1, 4], strides = [1, 1]} : vector<4x4xf32> to vector<1x4xf32>
    %608 = vector.broadcast %571 : vector<1x1xf32> to vector<1x4xf32>
    %609 = arith.mulf %607, %608 : vector<1x4xf32>
    %610 = arith.subf %606, %609 : vector<1x4xf32>
    %611 = vector.broadcast %576 : vector<1x1xf32> to vector<1x4xf32>
    %612 = arith.mulf %610, %611 : vector<1x4xf32>
    %613 = vector.extract_strided_slice %14 {offsets = [0, 2], sizes = [4, 1], strides = [1, 1]} : vector<4x4xf32> to vector<4x1xf32>
    %614 = vector.extract_strided_slice %545 {offsets = [0, 2], sizes = [4, 1], strides = [1, 1]} : vector<4x4xf32> to vector<4x1xf32>
    %615 = arith.subf %614, %613 : vector<4x1xf32>
    %616 = vector.extract_strided_slice %553 {offsets = [0, 2], sizes = [4, 1], strides = [1, 1]} : vector<4x4xf32> to vector<4x1xf32>
    %617 = vector.broadcast %615 : vector<4x1xf32> to vector<4x4xf32>
    %618 = vector.broadcast %585 : vector<1x4xf32> to vector<4x4xf32>
    %619 = arith.mulf %617, %618 : vector<4x4xf32>
    %620 = vector.broadcast %616 : vector<4x1xf32> to vector<4x4xf32>
    %621 = vector.broadcast %594 : vector<1x4xf32> to vector<4x4xf32>
    %622 = arith.mulf %620, %621 : vector<4x4xf32>
    %623 = arith.subf %619, %622 : vector<4x4xf32>
    %624 = arith.subf %545, %623 : vector<4x4xf32>
    %625 = vector.broadcast %615 : vector<4x1xf32> to vector<4x4xf32>
    %626 = vector.broadcast %594 : vector<1x4xf32> to vector<4x4xf32>
    %627 = arith.mulf %625, %626 : vector<4x4xf32>
    %628 = vector.broadcast %616 : vector<4x1xf32> to vector<4x4xf32>
    %629 = vector.broadcast %585 : vector<1x4xf32> to vector<4x4xf32>
    %630 = arith.mulf %628, %629 : vector<4x4xf32>
    %631 = arith.addf %627, %630 : vector<4x4xf32>
    %632 = arith.subf %553, %631 : vector<4x4xf32>
    %633 = vector.broadcast %615 : vector<4x1xf32> to vector<4x4xf32>
    %634 = vector.broadcast %603 : vector<1x4xf32> to vector<4x4xf32>
    %635 = arith.mulf %633, %634 : vector<4x4xf32>
    %636 = vector.broadcast %616 : vector<4x1xf32> to vector<4x4xf32>
    %637 = vector.broadcast %612 : vector<1x4xf32> to vector<4x4xf32>
    %638 = arith.mulf %636, %637 : vector<4x4xf32>
    %639 = arith.subf %635, %638 : vector<4x4xf32>
    %640 = arith.subf %561, %639 : vector<4x4xf32>
    %641 = vector.broadcast %615 : vector<4x1xf32> to vector<4x4xf32>
    %642 = vector.broadcast %612 : vector<1x4xf32> to vector<4x4xf32>
    %643 = arith.mulf %641, %642 : vector<4x4xf32>
    %644 = vector.broadcast %616 : vector<4x1xf32> to vector<4x4xf32>
    %645 = vector.broadcast %603 : vector<1x4xf32> to vector<4x4xf32>
    %646 = arith.mulf %644, %645 : vector<4x4xf32>
    %647 = arith.addf %643, %646 : vector<4x4xf32>
    %648 = arith.subf %569, %647 : vector<4x4xf32>
    %649 = vector.extract_strided_slice %624 {offsets = [3, 3], sizes = [1, 1], strides = [1, 1]} : vector<4x4xf32> to vector<1x1xf32>
    %650 = vector.extract_strided_slice %632 {offsets = [3, 3], sizes = [1, 1], strides = [1, 1]} : vector<4x4xf32> to vector<1x1xf32>
    %651 = arith.mulf %649, %649 : vector<1x1xf32>
    %652 = arith.mulf %650, %650 : vector<1x1xf32>
    %653 = arith.addf %651, %652 : vector<1x1xf32>
    %cst_61 = arith.constant 1.000000e+00 : f32
    %654 = vector.broadcast %cst_61 : f32 to vector<1x1xf32>
    %655 = arith.divf %654, %653 : vector<1x1xf32>
    %656 = vector.extract_strided_slice %640 {offsets = [3, 0], sizes = [1, 4], strides = [1, 1]} : vector<4x4xf32> to vector<1x4xf32>
    %657 = vector.broadcast %649 : vector<1x1xf32> to vector<1x4xf32>
    %658 = arith.mulf %656, %657 : vector<1x4xf32>
    %659 = vector.extract_strided_slice %648 {offsets = [3, 0], sizes = [1, 4], strides = [1, 1]} : vector<4x4xf32> to vector<1x4xf32>
    %660 = vector.broadcast %650 : vector<1x1xf32> to vector<1x4xf32>
    %661 = arith.mulf %659, %660 : vector<1x4xf32>
    %662 = arith.addf %658, %661 : vector<1x4xf32>
    %663 = vector.broadcast %655 : vector<1x1xf32> to vector<1x4xf32>
    %664 = arith.mulf %662, %663 : vector<1x4xf32>
    %665 = vector.extract_strided_slice %648 {offsets = [3, 0], sizes = [1, 4], strides = [1, 1]} : vector<4x4xf32> to vector<1x4xf32>
    %666 = vector.broadcast %649 : vector<1x1xf32> to vector<1x4xf32>
    %667 = arith.mulf %665, %666 : vector<1x4xf32>
    %668 = vector.extract_strided_slice %640 {offsets = [3, 0], sizes = [1, 4], strides = [1, 1]} : vector<4x4xf32> to vector<1x4xf32>
    %669 = vector.broadcast %650 : vector<1x1xf32> to vector<1x4xf32>
    %670 = arith.mulf %668, %669 : vector<1x4xf32>
    %671 = arith.subf %667, %670 : vector<1x4xf32>
    %672 = vector.broadcast %655 : vector<1x1xf32> to vector<1x4xf32>
    %673 = arith.mulf %671, %672 : vector<1x4xf32>
    %674 = vector.extract_strided_slice %14 {offsets = [0, 3], sizes = [4, 1], strides = [1, 1]} : vector<4x4xf32> to vector<4x1xf32>
    %675 = vector.extract_strided_slice %624 {offsets = [0, 3], sizes = [4, 1], strides = [1, 1]} : vector<4x4xf32> to vector<4x1xf32>
    %676 = arith.subf %675, %674 : vector<4x1xf32>
    %677 = vector.extract_strided_slice %632 {offsets = [0, 3], sizes = [4, 1], strides = [1, 1]} : vector<4x4xf32> to vector<4x1xf32>
    %678 = vector.broadcast %676 : vector<4x1xf32> to vector<4x4xf32>
    %679 = vector.broadcast %664 : vector<1x4xf32> to vector<4x4xf32>
    %680 = arith.mulf %678, %679 : vector<4x4xf32>
    %681 = vector.broadcast %677 : vector<4x1xf32> to vector<4x4xf32>
    %682 = vector.broadcast %673 : vector<1x4xf32> to vector<4x4xf32>
    %683 = arith.mulf %681, %682 : vector<4x4xf32>
    %684 = arith.subf %680, %683 : vector<4x4xf32>
    %685 = arith.subf %640, %684 : vector<4x4xf32>
    %686 = vector.broadcast %676 : vector<4x1xf32> to vector<4x4xf32>
    %687 = vector.broadcast %673 : vector<1x4xf32> to vector<4x4xf32>
    %688 = arith.mulf %686, %687 : vector<4x4xf32>
    %689 = vector.broadcast %677 : vector<4x1xf32> to vector<4x4xf32>
    %690 = vector.broadcast %664 : vector<1x4xf32> to vector<4x4xf32>
    %691 = arith.mulf %689, %690 : vector<4x4xf32>
    %692 = arith.addf %688, %691 : vector<4x4xf32>
    %693 = arith.subf %648, %692 : vector<4x4xf32>
    %694 = tpu.transpose %380, [1, 0] : vector<8x4xf32> -> vector<4x8xf32>
    %695 = tpu.transpose %381, [1, 0] : vector<8x4xf32> -> vector<4x8xf32>
    %cst_62 = arith.constant dense<0.000000e+00> : vector<4x4xf32>
    %696 = tpu.matmul %694, %8, %cst_62 {dimension_numbers = #tpu.dot_dimension_numbers<[1], [0], [0], [1], [0, 0, 1, 1], [], []>} : vector<4x8xf32>, vector<8x4xf32>, vector<4x4xf32> -> vector<4x4xf32>
    %cst_63 = arith.constant dense<0.000000e+00> : vector<4x4xf32>
    %697 = tpu.matmul %695, %9, %cst_63 {dimension_numbers = #tpu.dot_dimension_numbers<[1], [0], [0], [1], [0, 0, 1, 1], [], []>} : vector<4x8xf32>, vector<8x4xf32>, vector<4x4xf32> -> vector<4x4xf32>
    %698 = arith.addf %694, %695 : vector<4x8xf32>
    %699 = arith.addf %8, %9 : vector<8x4xf32>
    %cst_64 = arith.constant dense<0.000000e+00> : vector<4x4xf32>
    %700 = tpu.matmul %698, %699, %cst_64 {dimension_numbers = #tpu.dot_dimension_numbers<[1], [0], [0], [1], [0, 0, 1, 1], [], []>} : vector<4x8xf32>, vector<8x4xf32>, vector<4x4xf32> -> vector<4x4xf32>
    %701 = arith.subf %696, %697 : vector<4x4xf32>
    %702 = arith.subf %700, %696 : vector<4x4xf32>
    %703 = arith.subf %702, %697 : vector<4x4xf32>
    %704 = tpu.transpose %685, [1, 0] : vector<4x4xf32> -> vector<4x4xf32>
    %705 = tpu.transpose %693, [1, 0] : vector<4x4xf32> -> vector<4x4xf32>
    %cst_65 = arith.constant dense<0.000000e+00> : vector<4x4xf32>
    %706 = tpu.matmul %701, %704, %cst_65 {dimension_numbers = #tpu.dot_dimension_numbers<[1], [0], [0], [1], [0, 0, 1, 1], [], []>} : vector<4x4xf32>, vector<4x4xf32>, vector<4x4xf32> -> vector<4x4xf32>
    %cst_66 = arith.constant dense<0.000000e+00> : vector<4x4xf32>
    %707 = tpu.matmul %703, %705, %cst_66 {dimension_numbers = #tpu.dot_dimension_numbers<[1], [0], [0], [1], [0, 0, 1, 1], [], []>} : vector<4x4xf32>, vector<4x4xf32>, vector<4x4xf32> -> vector<4x4xf32>
    %708 = arith.addf %701, %703 : vector<4x4xf32>
    %709 = arith.addf %704, %705 : vector<4x4xf32>
    %cst_67 = arith.constant dense<0.000000e+00> : vector<4x4xf32>
    %710 = tpu.matmul %708, %709, %cst_67 {dimension_numbers = #tpu.dot_dimension_numbers<[1], [0], [0], [1], [0, 0, 1, 1], [], []>} : vector<4x4xf32>, vector<4x4xf32>, vector<4x4xf32> -> vector<4x4xf32>
    %711 = arith.subf %706, %707 : vector<4x4xf32>
    %712 = arith.subf %710, %706 : vector<4x4xf32>
    %713 = arith.subf %712, %707 : vector<4x4xf32>
    %cst_68 = arith.constant 0.000000e+00 : f32
    %714 = vector.broadcast %cst_68 : f32 to vector<4x4xf32>
    %715 = arith.subf %714, %397 : vector<4x4xf32>
    %cst_69 = arith.constant dense<0.000000e+00> : vector<4x4xf32>
    %716 = tpu.matmul %711, %395, %cst_69 {dimension_numbers = #tpu.dot_dimension_numbers<[1], [0], [0], [1], [0, 0, 1, 1], [], []>} : vector<4x4xf32>, vector<4x4xf32>, vector<4x4xf32> -> vector<4x4xf32>
    %cst_70 = arith.constant dense<0.000000e+00> : vector<4x4xf32>
    %717 = tpu.matmul %713, %715, %cst_70 {dimension_numbers = #tpu.dot_dimension_numbers<[1], [0], [0], [1], [0, 0, 1, 1], [], []>} : vector<4x4xf32>, vector<4x4xf32>, vector<4x4xf32> -> vector<4x4xf32>
    %718 = arith.addf %711, %713 : vector<4x4xf32>
    %719 = arith.addf %395, %715 : vector<4x4xf32>
    %cst_71 = arith.constant dense<0.000000e+00> : vector<4x4xf32>
    %720 = tpu.matmul %718, %719, %cst_71 {dimension_numbers = #tpu.dot_dimension_numbers<[1], [0], [0], [1], [0, 0, 1, 1], [], []>} : vector<4x4xf32>, vector<4x4xf32>, vector<4x4xf32> -> vector<4x4xf32>
    %721 = arith.subf %716, %717 : vector<4x4xf32>
    %722 = arith.subf %720, %716 : vector<4x4xf32>
    %723 = arith.subf %722, %717 : vector<4x4xf32>
    %724 = vector.broadcast %25 : f32 to vector<4x4xf32>
    %725 = arith.mulf %724, %721 : vector<4x4xf32>
    %726 = arith.addf %20, %725 : vector<4x4xf32>
    %727 = vector.broadcast %25 : f32 to vector<4x4xf32>
    %728 = arith.mulf %727, %723 : vector<4x4xf32>
    %729 = arith.addf %21, %728 : vector<4x4xf32>
    %cst_72 = arith.constant dense<0.000000e+00> : vector<8x4xf32>
    %730 = tpu.matmul %380, %726, %cst_72 {dimension_numbers = #tpu.dot_dimension_numbers<[1], [0], [0], [1], [0, 0, 1, 1], [], []>} : vector<8x4xf32>, vector<4x4xf32>, vector<8x4xf32> -> vector<8x4xf32>
    %cst_73 = arith.constant dense<0.000000e+00> : vector<8x4xf32>
    %731 = tpu.matmul %381, %729, %cst_73 {dimension_numbers = #tpu.dot_dimension_numbers<[1], [0], [0], [1], [0, 0, 1, 1], [], []>} : vector<8x4xf32>, vector<4x4xf32>, vector<8x4xf32> -> vector<8x4xf32>
    %732 = arith.addf %380, %381 : vector<8x4xf32>
    %733 = arith.addf %726, %729 : vector<4x4xf32>
    %cst_74 = arith.constant dense<0.000000e+00> : vector<8x4xf32>
    %734 = tpu.matmul %732, %733, %cst_74 {dimension_numbers = #tpu.dot_dimension_numbers<[1], [0], [0], [1], [0, 0, 1, 1], [], []>} : vector<8x4xf32>, vector<4x4xf32>, vector<8x4xf32> -> vector<8x4xf32>
    %735 = arith.subf %730, %731 : vector<8x4xf32>
    %736 = arith.subf %734, %730 : vector<8x4xf32>
    %737 = arith.subf %736, %731 : vector<8x4xf32>
    %738 = arith.mulf %735, %735 : vector<8x4xf32>
    %739 = arith.mulf %737, %737 : vector<8x4xf32>
    %740 = arith.addf %738, %739 : vector<8x4xf32>
    %741 = vector.shape_cast %740 : vector<8x4xf32> to vector<1x8x4xf32>
    %cst_75 = arith.constant dense<0.000000e+00> : vector<1xf32>
    %742 = vector.multi_reduction <add>, %741, %cst_75 [1, 2] : vector<1x8x4xf32> to vector<1xf32>
    %743 = vector.shape_cast %742 : vector<1xf32> to vector<1x1x1xf32>
    %744 = vector.extract %743[0, 0, 0] : f32 from vector<1x1x1xf32>
    %745 = math.rsqrt %744 : f32
    %cst_76 = arith.constant 2.000000e+00 : f32
    %746 = arith.mulf %cst_76, %745 : f32
    %747 = vector.broadcast %746 : f32 to vector<4x4xf32>
    %748 = arith.mulf %747, %726 : vector<4x4xf32>
    %749 = vector.broadcast %746 : f32 to vector<4x4xf32>
    %750 = arith.mulf %749, %729 : vector<4x4xf32>
    %cst_77 = arith.constant dense<0.000000e+00> : vector<4x4xf32>
    %751 = tpu.matmul %3, %380, %cst_77 {dimension_numbers = #tpu.dot_dimension_numbers<[1], [0], [0], [1], [0, 0, 1, 1], [], []>} : vector<4x8xf32>, vector<8x4xf32>, vector<4x4xf32> -> vector<4x4xf32>
    %cst_78 = arith.constant dense<0.000000e+00> : vector<4x4xf32>
    %752 = tpu.matmul %7, %381, %cst_78 {dimension_numbers = #tpu.dot_dimension_numbers<[1], [0], [0], [1], [0, 0, 1, 1], [], []>} : vector<4x8xf32>, vector<8x4xf32>, vector<4x4xf32> -> vector<4x4xf32>
    %753 = arith.addf %3, %7 : vector<4x8xf32>
    %754 = arith.addf %380, %381 : vector<8x4xf32>
    %cst_79 = arith.constant dense<0.000000e+00> : vector<4x4xf32>
    %755 = tpu.matmul %753, %754, %cst_79 {dimension_numbers = #tpu.dot_dimension_numbers<[1], [0], [0], [1], [0, 0, 1, 1], [], []>} : vector<4x8xf32>, vector<8x4xf32>, vector<4x4xf32> -> vector<4x4xf32>
    %756 = arith.subf %751, %752 : vector<4x4xf32>
    %757 = arith.subf %755, %751 : vector<4x4xf32>
    %758 = arith.subf %757, %752 : vector<4x4xf32>
    %cst_80 = arith.constant dense<0.000000e+00> : vector<4x4xf32>
    %759 = tpu.matmul %756, %748, %cst_80 {dimension_numbers = #tpu.dot_dimension_numbers<[1], [0], [0], [1], [0, 0, 1, 1], [], []>} : vector<4x4xf32>, vector<4x4xf32>, vector<4x4xf32> -> vector<4x4xf32>
    %cst_81 = arith.constant dense<0.000000e+00> : vector<4x4xf32>
    %760 = tpu.matmul %758, %750, %cst_81 {dimension_numbers = #tpu.dot_dimension_numbers<[1], [0], [0], [1], [0, 0, 1, 1], [], []>} : vector<4x4xf32>, vector<4x4xf32>, vector<4x4xf32> -> vector<4x4xf32>
    %761 = arith.addf %756, %758 : vector<4x4xf32>
    %762 = arith.addf %748, %750 : vector<4x4xf32>
    %cst_82 = arith.constant dense<0.000000e+00> : vector<4x4xf32>
    %763 = tpu.matmul %761, %762, %cst_82 {dimension_numbers = #tpu.dot_dimension_numbers<[1], [0], [0], [1], [0, 0, 1, 1], [], []>} : vector<4x4xf32>, vector<4x4xf32>, vector<4x4xf32> -> vector<4x4xf32>
    %764 = arith.subf %759, %760 : vector<4x4xf32>
    %765 = arith.subf %763, %759 : vector<4x4xf32>
    %766 = arith.subf %765, %760 : vector<4x4xf32>
    %767 = tpu.transpose %764, [1, 0] : vector<4x4xf32> -> vector<4x4xf32>
    %768 = tpu.transpose %766, [1, 0] : vector<4x4xf32> -> vector<4x4xf32>
    %cst_83 = arith.constant 0.000000e+00 : f32
    %769 = vector.broadcast %cst_83 : f32 to vector<4x4xf32>
    %770 = arith.subf %769, %768 : vector<4x4xf32>
    %cst_84 = arith.constant dense<0.000000e+00> : vector<4x4xf32>
    %771 = tpu.matmul %764, %767, %cst_84 {dimension_numbers = #tpu.dot_dimension_numbers<[1], [0], [0], [1], [0, 0, 1, 1], [], []>} : vector<4x4xf32>, vector<4x4xf32>, vector<4x4xf32> -> vector<4x4xf32>
    %cst_85 = arith.constant dense<0.000000e+00> : vector<4x4xf32>
    %772 = tpu.matmul %766, %770, %cst_85 {dimension_numbers = #tpu.dot_dimension_numbers<[1], [0], [0], [1], [0, 0, 1, 1], [], []>} : vector<4x4xf32>, vector<4x4xf32>, vector<4x4xf32> -> vector<4x4xf32>
    %773 = arith.addf %764, %766 : vector<4x4xf32>
    %774 = arith.addf %767, %770 : vector<4x4xf32>
    %cst_86 = arith.constant dense<0.000000e+00> : vector<4x4xf32>
    %775 = tpu.matmul %773, %774, %cst_86 {dimension_numbers = #tpu.dot_dimension_numbers<[1], [0], [0], [1], [0, 0, 1, 1], [], []>} : vector<4x4xf32>, vector<4x4xf32>, vector<4x4xf32> -> vector<4x4xf32>
    %776 = arith.subf %771, %772 : vector<4x4xf32>
    %777 = arith.subf %775, %771 : vector<4x4xf32>
    %778 = arith.subf %777, %772 : vector<4x4xf32>
    %779 = arith.addf %776, %14 : vector<4x4xf32>
    %cst_87 = arith.constant 0.000000e+00 : f32
    %780 = vector.broadcast %cst_87 : f32 to vector<1x1xf32>
    %781 = vector.extract_strided_slice %779 {offsets = [0, 0], sizes = [1, 1], strides = [1, 1]} : vector<4x4xf32> to vector<1x1xf32>
    %782 = vector.extract_strided_slice %778 {offsets = [0, 0], sizes = [1, 1], strides = [1, 1]} : vector<4x4xf32> to vector<1x1xf32>
    %783 = arith.mulf %781, %781 : vector<1x1xf32>
    %784 = arith.mulf %782, %782 : vector<1x1xf32>
    %785 = arith.addf %783, %784 : vector<1x1xf32>
    %cst_88 = arith.constant 1.000000e+00 : f32
    %786 = vector.broadcast %cst_88 : f32 to vector<1x1xf32>
    %787 = arith.divf %786, %785 : vector<1x1xf32>
    %788 = math.log %785 : vector<1x1xf32>
    %cst_89 = arith.constant 5.000000e-01 : f32
    %789 = vector.broadcast %cst_89 : f32 to vector<1x1xf32>
    %790 = arith.mulf %789, %788 : vector<1x1xf32>
    %791 = arith.addf %780, %790 : vector<1x1xf32>
    %792 = vector.extract_strided_slice %779 {offsets = [0, 0], sizes = [1, 4], strides = [1, 1]} : vector<4x4xf32> to vector<1x4xf32>
    %793 = vector.broadcast %781 : vector<1x1xf32> to vector<1x4xf32>
    %794 = arith.mulf %792, %793 : vector<1x4xf32>
    %795 = vector.extract_strided_slice %778 {offsets = [0, 0], sizes = [1, 4], strides = [1, 1]} : vector<4x4xf32> to vector<1x4xf32>
    %796 = vector.broadcast %782 : vector<1x1xf32> to vector<1x4xf32>
    %797 = arith.mulf %795, %796 : vector<1x4xf32>
    %798 = arith.addf %794, %797 : vector<1x4xf32>
    %799 = vector.broadcast %787 : vector<1x1xf32> to vector<1x4xf32>
    %800 = arith.mulf %798, %799 : vector<1x4xf32>
    %801 = vector.extract_strided_slice %778 {offsets = [0, 0], sizes = [1, 4], strides = [1, 1]} : vector<4x4xf32> to vector<1x4xf32>
    %802 = vector.broadcast %781 : vector<1x1xf32> to vector<1x4xf32>
    %803 = arith.mulf %801, %802 : vector<1x4xf32>
    %804 = vector.extract_strided_slice %779 {offsets = [0, 0], sizes = [1, 4], strides = [1, 1]} : vector<4x4xf32> to vector<1x4xf32>
    %805 = vector.broadcast %782 : vector<1x1xf32> to vector<1x4xf32>
    %806 = arith.mulf %804, %805 : vector<1x4xf32>
    %807 = arith.subf %803, %806 : vector<1x4xf32>
    %808 = vector.broadcast %787 : vector<1x1xf32> to vector<1x4xf32>
    %809 = arith.mulf %807, %808 : vector<1x4xf32>
    %810 = vector.extract_strided_slice %14 {offsets = [0, 0], sizes = [4, 1], strides = [1, 1]} : vector<4x4xf32> to vector<4x1xf32>
    %811 = vector.extract_strided_slice %779 {offsets = [0, 0], sizes = [4, 1], strides = [1, 1]} : vector<4x4xf32> to vector<4x1xf32>
    %812 = arith.subf %811, %810 : vector<4x1xf32>
    %813 = vector.extract_strided_slice %778 {offsets = [0, 0], sizes = [4, 1], strides = [1, 1]} : vector<4x4xf32> to vector<4x1xf32>
    %814 = vector.broadcast %812 : vector<4x1xf32> to vector<4x4xf32>
    %815 = vector.broadcast %800 : vector<1x4xf32> to vector<4x4xf32>
    %816 = arith.mulf %814, %815 : vector<4x4xf32>
    %817 = vector.broadcast %813 : vector<4x1xf32> to vector<4x4xf32>
    %818 = vector.broadcast %809 : vector<1x4xf32> to vector<4x4xf32>
    %819 = arith.mulf %817, %818 : vector<4x4xf32>
    %820 = arith.subf %816, %819 : vector<4x4xf32>
    %821 = arith.subf %779, %820 : vector<4x4xf32>
    %822 = vector.broadcast %812 : vector<4x1xf32> to vector<4x4xf32>
    %823 = vector.broadcast %809 : vector<1x4xf32> to vector<4x4xf32>
    %824 = arith.mulf %822, %823 : vector<4x4xf32>
    %825 = vector.broadcast %813 : vector<4x1xf32> to vector<4x4xf32>
    %826 = vector.broadcast %800 : vector<1x4xf32> to vector<4x4xf32>
    %827 = arith.mulf %825, %826 : vector<4x4xf32>
    %828 = arith.addf %824, %827 : vector<4x4xf32>
    %829 = arith.subf %778, %828 : vector<4x4xf32>
    %830 = vector.extract_strided_slice %821 {offsets = [1, 1], sizes = [1, 1], strides = [1, 1]} : vector<4x4xf32> to vector<1x1xf32>
    %831 = vector.extract_strided_slice %829 {offsets = [1, 1], sizes = [1, 1], strides = [1, 1]} : vector<4x4xf32> to vector<1x1xf32>
    %832 = arith.mulf %830, %830 : vector<1x1xf32>
    %833 = arith.mulf %831, %831 : vector<1x1xf32>
    %834 = arith.addf %832, %833 : vector<1x1xf32>
    %cst_90 = arith.constant 1.000000e+00 : f32
    %835 = vector.broadcast %cst_90 : f32 to vector<1x1xf32>
    %836 = arith.divf %835, %834 : vector<1x1xf32>
    %837 = math.log %834 : vector<1x1xf32>
    %cst_91 = arith.constant 5.000000e-01 : f32
    %838 = vector.broadcast %cst_91 : f32 to vector<1x1xf32>
    %839 = arith.mulf %838, %837 : vector<1x1xf32>
    %840 = arith.addf %791, %839 : vector<1x1xf32>
    %841 = vector.extract_strided_slice %821 {offsets = [1, 0], sizes = [1, 4], strides = [1, 1]} : vector<4x4xf32> to vector<1x4xf32>
    %842 = vector.broadcast %830 : vector<1x1xf32> to vector<1x4xf32>
    %843 = arith.mulf %841, %842 : vector<1x4xf32>
    %844 = vector.extract_strided_slice %829 {offsets = [1, 0], sizes = [1, 4], strides = [1, 1]} : vector<4x4xf32> to vector<1x4xf32>
    %845 = vector.broadcast %831 : vector<1x1xf32> to vector<1x4xf32>
    %846 = arith.mulf %844, %845 : vector<1x4xf32>
    %847 = arith.addf %843, %846 : vector<1x4xf32>
    %848 = vector.broadcast %836 : vector<1x1xf32> to vector<1x4xf32>
    %849 = arith.mulf %847, %848 : vector<1x4xf32>
    %850 = vector.extract_strided_slice %829 {offsets = [1, 0], sizes = [1, 4], strides = [1, 1]} : vector<4x4xf32> to vector<1x4xf32>
    %851 = vector.broadcast %830 : vector<1x1xf32> to vector<1x4xf32>
    %852 = arith.mulf %850, %851 : vector<1x4xf32>
    %853 = vector.extract_strided_slice %821 {offsets = [1, 0], sizes = [1, 4], strides = [1, 1]} : vector<4x4xf32> to vector<1x4xf32>
    %854 = vector.broadcast %831 : vector<1x1xf32> to vector<1x4xf32>
    %855 = arith.mulf %853, %854 : vector<1x4xf32>
    %856 = arith.subf %852, %855 : vector<1x4xf32>
    %857 = vector.broadcast %836 : vector<1x1xf32> to vector<1x4xf32>
    %858 = arith.mulf %856, %857 : vector<1x4xf32>
    %859 = vector.extract_strided_slice %14 {offsets = [0, 1], sizes = [4, 1], strides = [1, 1]} : vector<4x4xf32> to vector<4x1xf32>
    %860 = vector.extract_strided_slice %821 {offsets = [0, 1], sizes = [4, 1], strides = [1, 1]} : vector<4x4xf32> to vector<4x1xf32>
    %861 = arith.subf %860, %859 : vector<4x1xf32>
    %862 = vector.extract_strided_slice %829 {offsets = [0, 1], sizes = [4, 1], strides = [1, 1]} : vector<4x4xf32> to vector<4x1xf32>
    %863 = vector.broadcast %861 : vector<4x1xf32> to vector<4x4xf32>
    %864 = vector.broadcast %849 : vector<1x4xf32> to vector<4x4xf32>
    %865 = arith.mulf %863, %864 : vector<4x4xf32>
    %866 = vector.broadcast %862 : vector<4x1xf32> to vector<4x4xf32>
    %867 = vector.broadcast %858 : vector<1x4xf32> to vector<4x4xf32>
    %868 = arith.mulf %866, %867 : vector<4x4xf32>
    %869 = arith.subf %865, %868 : vector<4x4xf32>
    %870 = arith.subf %821, %869 : vector<4x4xf32>
    %871 = vector.broadcast %861 : vector<4x1xf32> to vector<4x4xf32>
    %872 = vector.broadcast %858 : vector<1x4xf32> to vector<4x4xf32>
    %873 = arith.mulf %871, %872 : vector<4x4xf32>
    %874 = vector.broadcast %862 : vector<4x1xf32> to vector<4x4xf32>
    %875 = vector.broadcast %849 : vector<1x4xf32> to vector<4x4xf32>
    %876 = arith.mulf %874, %875 : vector<4x4xf32>
    %877 = arith.addf %873, %876 : vector<4x4xf32>
    %878 = arith.subf %829, %877 : vector<4x4xf32>
    %879 = vector.extract_strided_slice %870 {offsets = [2, 2], sizes = [1, 1], strides = [1, 1]} : vector<4x4xf32> to vector<1x1xf32>
    %880 = vector.extract_strided_slice %878 {offsets = [2, 2], sizes = [1, 1], strides = [1, 1]} : vector<4x4xf32> to vector<1x1xf32>
    %881 = arith.mulf %879, %879 : vector<1x1xf32>
    %882 = arith.mulf %880, %880 : vector<1x1xf32>
    %883 = arith.addf %881, %882 : vector<1x1xf32>
    %cst_92 = arith.constant 1.000000e+00 : f32
    %884 = vector.broadcast %cst_92 : f32 to vector<1x1xf32>
    %885 = arith.divf %884, %883 : vector<1x1xf32>
    %886 = math.log %883 : vector<1x1xf32>
    %cst_93 = arith.constant 5.000000e-01 : f32
    %887 = vector.broadcast %cst_93 : f32 to vector<1x1xf32>
    %888 = arith.mulf %887, %886 : vector<1x1xf32>
    %889 = arith.addf %840, %888 : vector<1x1xf32>
    %890 = vector.extract_strided_slice %870 {offsets = [2, 0], sizes = [1, 4], strides = [1, 1]} : vector<4x4xf32> to vector<1x4xf32>
    %891 = vector.broadcast %879 : vector<1x1xf32> to vector<1x4xf32>
    %892 = arith.mulf %890, %891 : vector<1x4xf32>
    %893 = vector.extract_strided_slice %878 {offsets = [2, 0], sizes = [1, 4], strides = [1, 1]} : vector<4x4xf32> to vector<1x4xf32>
    %894 = vector.broadcast %880 : vector<1x1xf32> to vector<1x4xf32>
    %895 = arith.mulf %893, %894 : vector<1x4xf32>
    %896 = arith.addf %892, %895 : vector<1x4xf32>
    %897 = vector.broadcast %885 : vector<1x1xf32> to vector<1x4xf32>
    %898 = arith.mulf %896, %897 : vector<1x4xf32>
    %899 = vector.extract_strided_slice %878 {offsets = [2, 0], sizes = [1, 4], strides = [1, 1]} : vector<4x4xf32> to vector<1x4xf32>
    %900 = vector.broadcast %879 : vector<1x1xf32> to vector<1x4xf32>
    %901 = arith.mulf %899, %900 : vector<1x4xf32>
    %902 = vector.extract_strided_slice %870 {offsets = [2, 0], sizes = [1, 4], strides = [1, 1]} : vector<4x4xf32> to vector<1x4xf32>
    %903 = vector.broadcast %880 : vector<1x1xf32> to vector<1x4xf32>
    %904 = arith.mulf %902, %903 : vector<1x4xf32>
    %905 = arith.subf %901, %904 : vector<1x4xf32>
    %906 = vector.broadcast %885 : vector<1x1xf32> to vector<1x4xf32>
    %907 = arith.mulf %905, %906 : vector<1x4xf32>
    %908 = vector.extract_strided_slice %14 {offsets = [0, 2], sizes = [4, 1], strides = [1, 1]} : vector<4x4xf32> to vector<4x1xf32>
    %909 = vector.extract_strided_slice %870 {offsets = [0, 2], sizes = [4, 1], strides = [1, 1]} : vector<4x4xf32> to vector<4x1xf32>
    %910 = arith.subf %909, %908 : vector<4x1xf32>
    %911 = vector.extract_strided_slice %878 {offsets = [0, 2], sizes = [4, 1], strides = [1, 1]} : vector<4x4xf32> to vector<4x1xf32>
    %912 = vector.broadcast %910 : vector<4x1xf32> to vector<4x4xf32>
    %913 = vector.broadcast %898 : vector<1x4xf32> to vector<4x4xf32>
    %914 = arith.mulf %912, %913 : vector<4x4xf32>
    %915 = vector.broadcast %911 : vector<4x1xf32> to vector<4x4xf32>
    %916 = vector.broadcast %907 : vector<1x4xf32> to vector<4x4xf32>
    %917 = arith.mulf %915, %916 : vector<4x4xf32>
    %918 = arith.subf %914, %917 : vector<4x4xf32>
    %919 = arith.subf %870, %918 : vector<4x4xf32>
    %920 = vector.broadcast %910 : vector<4x1xf32> to vector<4x4xf32>
    %921 = vector.broadcast %907 : vector<1x4xf32> to vector<4x4xf32>
    %922 = arith.mulf %920, %921 : vector<4x4xf32>
    %923 = vector.broadcast %911 : vector<4x1xf32> to vector<4x4xf32>
    %924 = vector.broadcast %898 : vector<1x4xf32> to vector<4x4xf32>
    %925 = arith.mulf %923, %924 : vector<4x4xf32>
    %926 = arith.addf %922, %925 : vector<4x4xf32>
    %927 = arith.subf %878, %926 : vector<4x4xf32>
    %928 = vector.extract_strided_slice %919 {offsets = [3, 3], sizes = [1, 1], strides = [1, 1]} : vector<4x4xf32> to vector<1x1xf32>
    %929 = vector.extract_strided_slice %927 {offsets = [3, 3], sizes = [1, 1], strides = [1, 1]} : vector<4x4xf32> to vector<1x1xf32>
    %930 = arith.mulf %928, %928 : vector<1x1xf32>
    %931 = arith.mulf %929, %929 : vector<1x1xf32>
    %932 = arith.addf %930, %931 : vector<1x1xf32>
    %933 = math.log %932 : vector<1x1xf32>
    %cst_94 = arith.constant 5.000000e-01 : f32
    %934 = vector.broadcast %cst_94 : f32 to vector<1x1xf32>
    %935 = arith.mulf %934, %933 : vector<1x1xf32>
    %936 = arith.addf %889, %935 : vector<1x1xf32>
    %c0_95 = arith.constant 0 : index
    %c0_96 = arith.constant 0 : index
    %937 = vector.load %arg15[%c0_95, %c0_96] : memref<8x4xf32, #tpu.memory_space<vmem>>, vector<8x4xf32>
    tpu.vector_store %arg15[%c0_95, %c0_96], %380 {strides = array<i32>} : memref<8x4xf32, #tpu.memory_space<vmem>>, vector<8x4xf32>,
    %c0_97 = arith.constant 0 : index
    %c0_98 = arith.constant 0 : index
    %938 = vector.load %arg16[%c0_97, %c0_98] : memref<8x4xf32, #tpu.memory_space<vmem>>, vector<8x4xf32>
    tpu.vector_store %arg16[%c0_97, %c0_98], %381 {strides = array<i32>} : memref<8x4xf32, #tpu.memory_space<vmem>>, vector<8x4xf32>,
    %c0_99 = arith.constant 0 : index
    %c0_100 = arith.constant 0 : index
    %939 = vector.load %arg17[%c0_99, %c0_100] : memref<4x4xf32, #tpu.memory_space<vmem>>, vector<4x4xf32>
    tpu.vector_store %arg17[%c0_99, %c0_100], %748 {strides = array<i32>} : memref<4x4xf32, #tpu.memory_space<vmem>>, vector<4x4xf32>,
    %c0_101 = arith.constant 0 : index
    %c0_102 = arith.constant 0 : index
    %940 = vector.load %arg18[%c0_101, %c0_102] : memref<4x4xf32, #tpu.memory_space<vmem>>, vector<4x4xf32>
    tpu.vector_store %arg18[%c0_101, %c0_102], %750 {strides = array<i32>} : memref<4x4xf32, #tpu.memory_space<vmem>>, vector<4x4xf32>,
    %c0_103 = arith.constant 0 : index
    %c0_104 = arith.constant 0 : index
    %c0_105 = arith.constant 0 : index
    %941 = vector.load %arg10[%c0_103, %c0_104, %c0_105] : memref<1x8x4xf32, #tpu.memory_space<vmem>>, vector<1x8x4xf32>
    %942 = vector.shape_cast %941 : vector<1x8x4xf32> to vector<8x4xf32>
    %943 = vector.shape_cast %380 : vector<8x4xf32> to vector<1x8x4xf32>
    tpu.vector_store %arg10[%c0_103, %c0_104, %c0_105], %943 {strides = array<i32>} : memref<1x8x4xf32, #tpu.memory_space<vmem>>, vector<1x8x4xf32>,
    %c0_106 = arith.constant 0 : index
    %c0_107 = arith.constant 0 : index
    %c0_108 = arith.constant 0 : index
    %944 = vector.load %arg11[%c0_106, %c0_107, %c0_108] : memref<1x8x4xf32, #tpu.memory_space<vmem>>, vector<1x8x4xf32>
    %945 = vector.shape_cast %944 : vector<1x8x4xf32> to vector<8x4xf32>
    %946 = vector.shape_cast %381 : vector<8x4xf32> to vector<1x8x4xf32>
    tpu.vector_store %arg11[%c0_106, %c0_107, %c0_108], %946 {strides = array<i32>} : memref<1x8x4xf32, #tpu.memory_space<vmem>>, vector<1x8x4xf32>,
    %c0_109 = arith.constant 0 : index
    %c0_110 = arith.constant 0 : index
    %c0_111 = arith.constant 0 : index
    %947 = vector.load %arg12[%c0_109, %c0_110, %c0_111] : memref<1x4x4xf32, #tpu.memory_space<vmem>>, vector<1x4x4xf32>
    %948 = vector.shape_cast %947 : vector<1x4x4xf32> to vector<4x4xf32>
    %949 = vector.shape_cast %748 : vector<4x4xf32> to vector<1x4x4xf32>
    tpu.vector_store %arg12[%c0_109, %c0_110, %c0_111], %949 {strides = array<i32>} : memref<1x4x4xf32, #tpu.memory_space<vmem>>, vector<1x4x4xf32>,
    %c0_112 = arith.constant 0 : index
    %c0_113 = arith.constant 0 : index
    %c0_114 = arith.constant 0 : index
    %950 = vector.load %arg13[%c0_112, %c0_113, %c0_114] : memref<1x4x4xf32, #tpu.memory_space<vmem>>, vector<1x4x4xf32>
    %951 = vector.shape_cast %950 : vector<1x4x4xf32> to vector<4x4xf32>
    %952 = vector.shape_cast %750 : vector<4x4xf32> to vector<1x4x4xf32>
    tpu.vector_store %arg13[%c0_112, %c0_113, %c0_114], %952 {strides = array<i32>} : memref<1x4x4xf32, #tpu.memory_space<vmem>>, vector<1x4x4xf32>,
    %953 = math.absf %936 : vector<1x1xf32>
    %c0_115 = arith.constant 0 : index
    %c0_116 = arith.constant 0 : index
    %c0_117 = arith.constant 0 : index
    %954 = vector.load %arg14[%c0_115, %c0_116, %c0_117] : memref<1x1x1xf32, #tpu.memory_space<vmem>>, vector<1x1x1xf32>
    %955 = vector.shape_cast %954 : vector<1x1x1xf32> to vector<1x1xf32>
    %956 = vector.shape_cast %953 : vector<1x1xf32> to vector<1x1x1xf32>
    tpu.vector_store %arg14[%c0_115, %c0_116, %c0_117], %956 {strides = array<i32>} : memref<1x1x1xf32, #tpu.memory_space<vmem>>, vector<1x1x1xf32>,
    return
  }
  func.func @transform_0(%arg0: i32, %arg1: i32) -> (i32, i32, i32) {
    %c0_i32 = arith.constant 0 : i32
    %c0_i32_0 = arith.constant 0 : i32
    %c0_i32_1 = arith.constant 0 : i32
    return %arg0, %c0_i32, %c0_i32_0 : i32, i32, i32
  }
  func.func @transform_1(%arg0: i32, %arg1: i32) -> (i32, i32, i32) {
    %c0_i32 = arith.constant 0 : i32
    %c0_i32_0 = arith.constant 0 : i32
    %c0_i32_1 = arith.constant 0 : i32
    return %arg0, %c0_i32, %c0_i32_0 : i32, i32, i32
  }
  func.func @transform_2(%arg0: i32, %arg1: i32) -> (i32, i32, i32) {
    %c0_i32 = arith.constant 0 : i32
    %c0_i32_0 = arith.constant 0 : i32
    %c0_i32_1 = arith.constant 0 : i32
    return %arg0, %c0_i32, %c0_i32_0 : i32, i32, i32
  }
  func.func @transform_3(%arg0: i32, %arg1: i32) -> (i32, i32, i32) {
    %c0_i32 = arith.constant 0 : i32
    %c0_i32_0 = arith.constant 0 : i32
    %c0_i32_1 = arith.constant 0 : i32
    return %arg0, %c0_i32, %c0_i32_0 : i32, i32, i32
  }
  func.func @transform_4(%arg0: i32, %arg1: i32) -> (i32, i32, i32) {
    %c0_i32 = arith.constant 0 : i32
    %c0_i32_0 = arith.constant 0 : i32
    %c0_i32_1 = arith.constant 0 : i32
    return %arg0, %c0_i32, %c0_i32_0 : i32, i32, i32
  }
  func.func @transform_5(%arg0: i32, %arg1: i32) -> (i32, i32, i32) {
    %c0_i32 = arith.constant 0 : i32
    %c0_i32_0 = arith.constant 0 : i32
    %c0_i32_1 = arith.constant 0 : i32
    return %arg0, %c0_i32, %c0_i32_0 : i32, i32, i32
  }
  func.func @transform_6(%arg0: i32, %arg1: i32) -> (i32, i32, i32) {
    %c0_i32 = arith.constant 0 : i32
    %c0_i32_0 = arith.constant 0 : i32
    %c0_i32_1 = arith.constant 0 : i32
    return %arg1, %c0_i32, %c0_i32_0 : i32, i32, i32
  }
  func.func @transform_7(%arg0: i32, %arg1: i32) -> (i32, i32, i32) {
    %c0_i32 = arith.constant 0 : i32
    %c0_i32_0 = arith.constant 0 : i32
    %c0_i32_1 = arith.constant 0 : i32
    return %arg1, %c0_i32, %c0_i32_0 : i32, i32, i32
  }
  func.func @transform_8(%arg0: i32, %arg1: i32) -> (i32, i32, i32) {
    %c2_i32 = arith.constant 2 : i32
    %0 = arith.muli %arg1, %c2_i32 : i32
    %1 = arith.addi %0, %arg0 : i32
    %c0_i32 = arith.constant 0 : i32
    %c0_i32_0 = arith.constant 0 : i32
    %c0_i32_1 = arith.constant 0 : i32
    return %1, %c0_i32, %c0_i32_0 : i32, i32, i32
  }
  func.func @transform_9(%arg0: i32, %arg1: i32) -> (i32, i32, i32) {
    %c2_i32 = arith.constant 2 : i32
    %0 = arith.muli %arg1, %c2_i32 : i32
    %1 = arith.addi %0, %arg0 : i32
    %c0_i32 = arith.constant 0 : i32
    %c0_i32_0 = arith.constant 0 : i32
    %c0_i32_1 = arith.constant 0 : i32
    return %1, %c0_i32, %c0_i32_0 : i32, i32, i32
  }
  func.func @transform_10(%arg0: i32, %arg1: i32) -> (i32, i32, i32) {
    %c2_i32 = arith.constant 2 : i32
    %0 = arith.muli %arg1, %c2_i32 : i32
    %1 = arith.addi %0, %arg0 : i32
    %c0_i32 = arith.constant 0 : i32
    %c0_i32_0 = arith.constant 0 : i32
    %c0_i32_1 = arith.constant 0 : i32
    return %1, %c0_i32, %c0_i32_0 : i32, i32, i32
  }
  func.func @transform_11(%arg0: i32, %arg1: i32) -> (i32, i32, i32) {
    %c2_i32 = arith.constant 2 : i32
    %0 = arith.muli %arg1, %c2_i32 : i32
    %1 = arith.addi %0, %arg0 : i32
    %c0_i32 = arith.constant 0 : i32
    %c0_i32_0 = arith.constant 0 : i32
    %c0_i32_1 = arith.constant 0 : i32
    return %1, %c0_i32, %c0_i32_0 : i32, i32, i32
  }
  func.func @transform_12(%arg0: i32, %arg1: i32) -> (i32, i32, i32) {
    %c2_i32 = arith.constant 2 : i32
    %0 = arith.muli %arg1, %c2_i32 : i32
    %1 = arith.addi %0, %arg0 : i32
    %c0_i32 = arith.constant 0 : i32
    %c0_i32_0 = arith.constant 0 : i32
    %c0_i32_1 = arith.constant 0 : i32
    return %1, %c0_i32, %c0_i32_0 : i32, i32, i32
  }
}

</mosaic_0001>

<bundles_post_ra>
// kernel: tpu_custom_call.1
= control target key start
LH: loop header
LB: loop body
LE: loop exit
PB: predicated region body
PF: predicated region fallthrough
CT: control target
= control target key end

     0   :  { %s6637_s21 = smov 0   ;;  %s6639_s22 = smov 0   ;;  %s7256_s0 = inlined_call_operand.vmem [shape: f32[2,4,8], index: 0, kind: input, shape index: {}]   ;;  %s7257_s1 = inlined_call_operand.vmem [shape: f32[2,4,8], index: 1, kind: input, shape index: {}]   ;;  %s7258_s2 = inlined_call_operand.vmem [shape: f32[2,8,4], index: 2, kind: input, shape index: {}]   ;;  %s7259_s3 = inlined_call_operand.vmem [shape: f32[2,8,4], index: 3, kind: input, shape index: {}]   ;;  %s7260_s4 = inlined_call_operand.vmem [shape: f32[2,4,4], index: 4, kind: input, shape index: {}]   ;;  %s7261_s5 = inlined_call_operand.vmem [shape: f32[2,4,4], index: 5, kind: input, shape index: {}]   ;;  %s7262_s6 = inlined_call_operand.vmem [shape: f32[3,1,1], index: 6, kind: input, shape index: {}]   ;;  %s7263_s7 = inlined_call_operand.vmem [shape: f32[3,1,1], index: 7, kind: input, shape index: {}]   ;;  %s7264_s8 = inlined_call_operand.vmem [shape: f32[6,8,4], index: 8, kind: output, shape index: {0}]   ;;  %s7265_s9 = inlined_call_operand.vmem [shape: f32[6,8,4], index: 9, kind: output, shape index: {1}]   ;;  %s7266_s10 = inlined_call_operand.vmem [shape: f32[6,4,4], index: 10, kind: output, shape index: {2}]   ;;  %s7267_s11 = inlined_call_operand.vmem [shape: f32[6,4,4], index: 11, kind: output, shape index: {3}]   ;;  %s7268_s12 = inlined_call_operand.vmem [shape: f32[6,1,1], index: 12, kind: output, shape index: {4}]  }
   0x1   :  { %7272 = sst [smem:[#allocation11_spill]] %s7256_s0  ;;  %s6641_s23 = smov 0  }
   0x2   :  { %7273 = sst [smem:[#allocation12_spill]] %s7257_s1  ;;  %s6643_s24 = smov 0  }
   0x3   :  { %7274 = sst [smem:[#allocation13_spill]] %s7258_s2  ;;  %s6645_s25 = smov 0  }
   0x4   :  { %7275 = sst [smem:[#allocation14_spill]] %s7259_s3 }
   0x5 LB: > { %7276 = sst [smem:[#allocation6_spill]] %s6551_s23  ;;  %s32_s26 = sadd.s32 1, %s6551_s23  ;;  %s6559_s25 = sphi %s6645_s25, %s23_s25   ;;  %s6555_s24 = sphi %s6643_s24, %s7293_s24   ;;  %s6551_s23 = sphi %s6641_s23, %s7292_s23   ;;  %s6547_s22 = sphi %s6639_s22, %s7291_s22   ;;  %s6543_s21 = sphi %s6637_s21, %s7290_s21  }
   0x6   : > { %7277 = sst [smem:[#allocation7_spill]] %s6555_s24  ;;  %s35_s27 = sadd.s32 1, %s6555_s24 }
   0x7   : > { %7278 = sst [smem:[#allocation8_spill]] %s6559_s25  ;;  %p33_p0 = scmp.ge.s32.totalorder %s32_s26, 3 }
   0x8   : > { %p5956_p1 = scmp.ge.s32.totalorder %s6559_s25, 1  ;;  %p463_p2 = scmp.lt.s32.totalorder %s6559_s25, 7 }
   0x9   : > { %s7295_s26 = smov (%p33_p0, %s32_s26), 0  ;;  %s7297_s27 = smov (!%p33_p0, %s35_s27), %s6555_s24 }
   0xa   : > { %7279 = sst [smem:[#allocation9_spill]] %s7295_s26  ;;  %p464_p3 = pnand %p5956_p1, %p463_p2 }
   0xb   : > { %p37_p4 = scmp.ge.s32.totalorder %s7297_s27, 2  ;;  %p554_p5 = scmp.lt.s32.totalorder (!%p464_p3), %s6547_s22, 1  ;;  %v691_v3 = vlaneseq (!%p464_p3)  ;;  %v6561_v7 = vmov (!%p464_p3), 0.0  }
   0xc   : > { %467 = sbr.rel (%p464_p3) target bundleno = 6396 (0x18fc), region = 52  ;;  %s7281_s0 = sld [smem:[#allocation11_spill]] (!%p464_p3) }
   0xd   : > { %s7299_s27 = smov (%p37_p4, %s7297_s27), 0  ;;  %s7282_s2 = sld [smem:[#allocation13_spill]] (!%p464_p3)  ;;  %v6709_v5 = vshrl.u32 (!%p464_p3), %v691_v3, 7  ;;  %v694_v6 = vand.u32 (!%p464_p3), 127, %v691_v3 }
   0xe   : > { %7280 = sst [smem:[#allocation10_spill]] %s7299_s27  ;;  %s7283_s3 = sld [smem:[#allocation14_spill]] (!%p464_p3) }
   0xf   : > { %s7284_s1 = sld [smem:[#allocation12_spill]] (!%p464_p3)  ;;  %s5963_s19 = sshll.u32 (!%p464_p3), %s6543_s21, 1  ;;  %vm695_vm0 = vcmp.eq.s32.totalorder (!%p464_p3), %v6709_v5, %v694_v6 }
  0x10   : > { %p578_p6 = scmp.lt.s32.totalorder (!%p464_p3), %s6543_s21, 2  ;;  %s585_s24 = sadd.s32 (!%p464_p3), %s6547_s22, %s5963_s19  ;;  %v6727_v8 = vsel (!%p464_p3), %vm695_vm0, 1.0, %v6561_v7 }
  0x11   : > { %p586_p7 = scmp.lt.s32.totalorder (!%p464_p3), %s585_s24, 5  ;;  %p5973_p8 = scmp.ne.s32.totalorder (!%p464_p3), %s6543_s21, 0 }
  0x13   : > { %s555_s28 = scalar_select %p554_p5, %s6547_s22, 1 }
  0x14   : > { %s6712_s25 = scalar_select %p578_p6, %s6543_s21, 2 }
  0x15   : > { %s6673_s29 = sshll.u32 %s555_s28, 2  ;;  %s5959_s30 = sshll.u32 %s555_s28, 3  ;;  %vm719_vm1 = vcmask (!%p5973_p8), 1043456   ;;  %v6562_v13 = vmov (!%p5973_p8), 0.0   ;;  %vm6563_vm2 = vmmov (!%p5973_p8), 0   ;;  %vm711_vm3 = vcmask (!%p5973_p8), 31744  }
  0x16   : > { %s557_s15 = scalar_lea.vmem %s7281_s0, %s6673_s29  ;;  %s6682_s18 = scalar_lea.vmem %s7282_s2, %s5959_s30  ;;  %6159 = vmatprep.subr.mxu0 (!%p5973_p8), %v6562_v13  ;;  %6164 = vmatprep.subr.mxu1 (!%p5973_p8), %v6562_v13  ;;  %vm969_vm4 = vcmask (!%p5973_p8), 27648  }
  0x17   : > { %s6687_s27 = scalar_lea.vmem %s7283_s3, %s5959_s30  ;;  %v623_v0 = vld [vmem:[%s557_s15] sm:$0xf]  ;;  %s561_s17 = scalar_lea.vmem %s7284_s1, %s6673_s29  ;;  %6161 = vmatprep.mubr.msk.f32.mxu0 (!%p5973_p8), %vm6563_vm2, %v6562_v13  ;;  %6166 = vmatprep.mubr.msk.f32.mxu1 (!%p5973_p8), %vm6563_vm2, %v6562_v13 }
  0x18   : > { %v6697_v1 = vmul.f32 0.5, %v623_v0  ;;  %v625_v2 = vld [vmem:[%s561_s17] sm:$0xf]  ;;  %s7301_s24 = smov (!%p586_p7, %s585_s24), 5  ;;  %s7285_s22 = scalar_lea.vmem (!%p5973_p8), %s7260_s4, %s6673_s29 }
  0x19   : > { %v6705_v4 = vmul.f32 0.5, %v625_v2  ;;  %s5964_s14 = sshll.u32 %s7301_s24, 3  ;;  %s5968_s16 = sshll.u32 %s7301_s24, 2  ;;  %v6765_v11 = vld [vmem:[%s7285_s22] sm:$0xf] (!%p5973_p8) }
  0x1a   : > { %627 = vxpose.xlu0.b32.start.end [1/1] (short) (narrow) %v6697_v1, 8  ;;  %s6734_s13 = scalar_lea.vmem %s7264_s8, %s5964_s14  ;;  %s6739_s26 = scalar_lea.vmem %s7265_s9, %s5964_s14  ;;  %v702_v12 = vld [vmem:[%s6682_s18] sm:$0xff] (!%p5973_p8)  ;;  %6160 = vmatpush3.msk.msra.mxu0 (!%p5973_p8), %vm719_vm1, %v6765_v11 }
  0x1b   : > { %s6744_s15 = scalar_lea.vmem %s7266_s10, %s5968_s16  ;;  %s6749_s1 = scalar_lea.vmem %s7267_s11, %s5968_s16  ;;  %v703_v15 = vld [vmem:[%s6687_s27] sm:$0xff] (!%p5973_p8)  ;;  %v704_v16 = vadd.f32 (!%p5973_p8), 1e-12, %v702_v12  ;;  %6169 = vmatprep.subr.mxu0 (!%p5973_p8), %v6562_v13 }
  0x1c   : > { %s620_s17 = scalar_lea.vmem %s7268_s12, %s7301_s24  ;;  %s7286_s21 = scalar_lea.vmem (!%p5973_p8), %s7261_s5, %s6673_s29  ;;  %v706_v17 = vmul.f32 (!%p5973_p8), %v703_v15, %v703_v15 }
  0x1d   : > { %v715_v14 = vld [vmem:[%s7286_s21] sm:$0xf] (!%p5973_p8)  ;;  %v705_v18 = vmul.f32 (!%p5973_p8), %v704_v16, %v704_v16 }
  0x1e   : > { %659 = vxpose.xlu0.b32.start.end [1/1] (short) (narrow) %v6705_v4, 8  ;;  %6165 = vmatpush3.msk.msra.mxu1 (!%p5973_p8), %vm719_vm1, %v715_v14  ;;  %v870_v21 = vadd.f32 (!%p5973_p8), %v715_v14, %v6765_v11 }
  0x1f   : > { %v707_v19 = vadd.f32 (!%p5973_p8), %v706_v17, %v705_v18 }
  0x21   : > { %6462 = vrsqrt.f32 (!%p5973_p8), %v707_v19 }
  0x2b   : > { %v6463_v20 = vpop.eup (!%p5973_p8), %6462 }
  0x2c   : > { %v709_v22 = vmul.f32 (!%p5973_p8), %v6463_v20, %v702_v12  ;;  %v710_v23 = vmul.f32 (!%p5973_p8), %v6463_v20, %v703_v15 }
  0x2e   : > { %712 = vst.msk [vmem:[#allocation2] sm:$0xff] (!%p5973_p8), %vm711_vm3, %v709_v22  ;;  %6162 = vmatmul.mubr.msk.f32.vlgmr.msra.gmra.mrb[0].mxu0 (!%p5973_p8), %vm711_vm3, %v709_v22  ;;  %713 = vst.msk [vmem:[#allocation3] sm:$0xff] (!%p5973_p8), %vm711_vm3, %v710_v23  ;;  %6167 = vmatmul.mubr.msk.f32.vlgmr.msra.gmra.mrb[0].mxu1 (!%p5973_p8), %vm711_vm3, %v710_v23  ;;  %v869_v24 = vadd.f32 (!%p5973_p8), %v710_v23, %v709_v22 }
  0x2f   : > { %6170 = vmatpush3.msk.msra.mxu0 (!%p5973_p8), %vm719_vm1, %v870_v21  ;;  %6171 = vmatprep.mubr.msk.f32.mxu0 (!%p5973_p8), %vm6563_vm2, %v6562_v13 }
  0x32   : > { %6172 = vmatmul.mubr.msk.f32.vlgmr.msra.gmra.mrb[2].mxu0 (!%p5973_p8), %vm711_vm3, %v869_v24 }
  0x98   : > { %701 = sbr.rel (%p5973_p8) target bundleno = 543 (0x21f), region = 56 }
  0x9a   : > { %v6755_v9 = vpop.trf.xlu0 }
  0x9e   : > { %v6757_v10 = vpop.trf.xlu0 }
 0x101   : > { %v789_v25 = vpop.f32.mrb[0].mxu0  ;;  %v865_v26 = vpop.f32.mrb[0].mxu1 }
 0x102   : > { %v947_v27 = vsub.f32 %v789_v25, %v865_v26  ;;  %v6163_v28 = vpop.f32.mrb[1].mxu0  ;;  %v6168_v29 = vpop.f32.mrb[1].mxu1 }
 0x104   : > { %v950_v34 = vmul.f32 %v947_v27, %v947_v27 }
 0x105   : > { %v943_v30 = vpop.f32.mrb[2].mxu0 }
 0x106   : > { %v948_v31 = vsub.f32 %v943_v30, %v789_v25  ;;  %v6173_v32 = vpop.f32.mrb[3].mxu0 }
 0x108   : > { %v949_v33 = vsub.f32 %v948_v31, %v865_v26 }
 0x10a   : > { %v951_v35 = vmul.f32 %v949_v33, %v949_v33 }
 0x10c   : > { %v952_v36 = vadd.f32 %v951_v35, %v950_v34 }
 0x10e   : > { %v953_v37 = vsel %vm711_vm3, %v952_v36, 0.0 }
 0x10f   : > { %954 = vadd.xlane.f32.xlu0 %v953_v37 }
 0x19c   : > { %v955_v38 = vpop.xlane.xlu0 %954 }
 0x19d   : > { %v956_v39 = vrot.slane %v955_v38, 4 }
 0x19f   : > { %v957_v40 = vadd.f32 %v956_v39, %v955_v38 }
 0x1a1   : > { %v958_v41 = vrot.slane %v957_v40, 2 }
 0x1a3   : > { %v959_v42 = vadd.f32 %v958_v41, %v957_v40 }
 0x1a5   : > { %v960_v43 = vrot.slane %v959_v42, 1 }
 0x1a7   : > { %v961_v44 = vadd.f32 %v960_v43, %v959_v42 }
 0x1a9   : > { %6399 = vpush %v961_v44 }
 0x1da   : > { %s6400_s27 = spop %6399 }
 0x1db   : > { %v963_v45 = vstv %s6400_s27 }
 0x1dc   : > { %6464 = vrsqrt.f32 %v963_v45 }
 0x1e6   : > { %v6465_v46 = vpop.eup %6464 }
 0x1e7   : > { %6401 = vpush %v6465_v46 }
 0x218   : > { %s6402_s29 = spop %6401 }
 0x219   : > { %s966_s18 = smul.f32 2.0, %s6402_s29 }
 0x21b   : > { %v967_v47 = vstv %s966_s18 }
 0x21c   : > { %v968_v48 = vmul.f32 %v967_v47, %v6765_v11  ;;  %v971_v49 = vmul.f32 %v967_v47, %v715_v14 }
 0x21e   : > { %970 = vst.msk [vmem:[#allocation4] sm:$0xf] %vm969_vm4, %v968_v48  ;;  %972 = vst.msk [vmem:[#allocation5] sm:$0xf] %vm969_vm4, %v971_v49 }
 0x21f PF: > { %6174 = vmatprep.subr.mxu0 %v6561_v7  ;;  %6179 = vmatprep.subr.mxu1 %v6561_v7  ;;  %v6791_v50 = vld [vmem:[#allocation2] sm:$0xff]  ;;  %v6793_v51 = vld [vmem:[#allocation3] sm:$0xff]  ;;  %vm981_vm5 = vcmask 64512   ;;  %vm6564_vm6 = vmmov 0   ;;  %v6809_v53 = vadd.f32 %v6705_v4, %v6697_v1  ;;  %vm1210_vm7 = vcmask 1043456   ;;  %s7287_s16 = scalar_lea.vmem %s7262_s6, %s6712_s25  ;;  %s7288_s30 = scalar_lea.vmem %s7263_s7, %s6712_s25 }
 0x220   : > { %6175 = vmatpush3.msra.mxu0 %v6791_v50  ;;  %6176 = vmatprep.mubr.msk.f32.mxu0 %vm6564_vm6, %v6561_v7  ;;  %v1129_v52 = vadd.f32 %v6793_v51, %v6791_v50  ;;  %vm1206_vm8 = vcmask 31744   ;;  %v6565_v24 = vmov 0   ;;  %v6566_v40 = vmov 1   ;;  %s6571_s22 = smov 125  }
 0x221   : > { %6180 = vmatpush3.msra.mxu1 %v6793_v51  ;;  %6181 = vmatprep.mubr.msk.f32.mxu1 %vm6564_vm6, %v6561_v7  ;;  %vm5641_vm9 = vcmask 27648   ;;  %vm5649_vm10 = vcmask 0  }
 0x222   : > { %6177 = vmatmul.mubr.msk.f32.vlgmr.msra.gmra.mrb[0].mxu0 %vm981_vm5, %v6697_v1  ;;  %6182 = vmatmul.mubr.msk.f32.vlgmr.msra.gmra.mrb[0].mxu1 %vm981_vm5, %v6705_v4 }
 0x223   : > { %6184 = vmatprep.subr.mxu0 %v6561_v7  ;;  %6186 = vmatprep.mubr.msk.f32.mxu0 %vm6564_vm6, %v6561_v7 }
 0x224   : > { %6185 = vmatpush3.msra.mxu0 %v1129_v52  ;;  %6189 = vmatprep.subr.mxu1 %v6561_v7 }
 0x225   : > { %6191 = vmatprep.mubr.msk.f32.mxu1 %vm6564_vm6, %v6561_v7  ;;  %6194 = vmatprep.subr.mxu0 %v6561_v7  ;;  %v6822_v54 = vld [vmem:[#allocation4] sm:$0xf]  ;;  %v6827_v55 = vld [vmem:[#allocation5] sm:$0xf] }
 0x226   : > { %6187 = vmatmul.mubr.msk.f32.vlgmr.msra.gmra.mrb[2].mxu0 %vm981_vm5, %v6809_v53  ;;  %6190 = vmatpush3.msk.msra.mxu1 %vm1210_vm7, %v6822_v54  ;;  %v6834_v58 = vadd.f32 %v6827_v55, %v6822_v54 }
 0x227   : > { %6196 = vmatprep.mubr.msk.f32.mxu0 %vm6564_vm6, %v6561_v7  ;;  %6199 = vmatprep.subr.mxu1 %v6561_v7 }
 0x228   : > { %6195 = vmatpush3.msk.msra.mxu0 %vm1210_vm7, %v6827_v55  ;;  %6466 = vset.pattern.permute.xlu1 %v6565_v24 }
 0x229   : > { %6204 = vmatprep.subr.mxu0 %v6561_v7 }
 0x2f5   : > { %v1051_v56 = vpop.f32.mrb[0].mxu0  ;;  %v1124_v57 = vpop.f32.mrb[0].mxu1 }
 0x2f6   : > { %v1203_v59 = vsub.f32 %v1051_v56, %v1124_v57  ;;  %v6178_v60 = vpop.f32.mrb[1].mxu0  ;;  %v6183_v61 = vpop.f32.mrb[1].mxu1 }
 0x2f7   : > { %v6881_v61 = vsub.s32 0, %v6709_v5 }
 0x2f8   : > { %6192 = vmatmul.mubr.msk.f32.vlgmr.msra.gmra.mrb[2].mxu1 %vm1206_vm8, %v1203_v59 }
 0x2f9   : > { %v1199_v62 = vpop.f32.mrb[2].mxu0  ;;  %6200 = vmatpush3.msk.msra.mxu1 %vm1210_vm7, %v6834_v58  ;;  %6201 = vmatprep.mubr.msk.f32.mxu1 %vm6564_vm6, %v6561_v7 }
 0x2fa   : > { %v1204_v63 = vsub.f32 %v1199_v62, %v1051_v56  ;;  %v6188_v0 = vpop.f32.mrb[3].mxu0  ;;  %6209 = vmatprep.subr.mxu1 %v6561_v7 }
 0x2fc   : > { %v1205_v2 = vsub.f32 %v1204_v63, %v1124_v57 }
 0x2fe   : > { %v1360_v3 = vadd.f32 %v1205_v2, %v1203_v59  ;;  %6197 = vmatmul.mubr.msk.f32.vlgmr.msra.gmra.mrb[4].mxu0 %vm1206_vm8, %v1205_v2 }
 0x2ff   : > { %6206 = vmatprep.mubr.msk.f32.mxu0 %vm6564_vm6, %v6561_v7 }
 0x300   : > { %6202 = vmatmul.mubr.msk.f32.vlgmr.msra.gmra.mrb[4].mxu1 %vm1206_vm8, %v1360_v3 }
 0x301   : > { %6211 = vmatprep.mubr.msk.f32.mxu1 %vm6564_vm6, %v6561_v7 }
 0x3cb   : > { %v1280_v6 = vpop.f32.mrb[2].mxu1 }
 0x3cc   : > { %v6193_v11 = vpop.f32.mrb[3].mxu1 }
 0x3d1   : > { %v1356_v12 = vpop.f32.mrb[4].mxu0 }
 0x3d2   : > { %v6848_v13 = vsub.f32 %v1280_v6, %v1356_v12  ;;  %v6198_v14 = vpop.f32.mrb[5].mxu0 }
 0x3d3   : > { %v1434_v15 = vpop.f32.mrb[4].mxu1 }
 0x3d4   : > { %v1439_v16 = vsub.f32 %v1434_v15, %v1280_v6  ;;  %v6203_v17 = vpop.f32.mrb[5].mxu1  ;;  %1441 = vxpose.xlu0.b32.start.end [1/1] (short) (narrow) %v6848_v13, 8 }
 0x3d6   : > { %v6851_v18 = vsub.f32 %v1439_v16, %v1356_v12 }
 0x3d8   : > { %1473 = vxpose.xlu0.b32.start.end [1/1] (short) (narrow) %v6851_v18, 8  ;;  %v1658_v23 = vadd.f32 %v6851_v18, %v6848_v13 }
 0x401   : > { %6467 = vset.pattern.permute.xlu0 %v6565_v24 }
 0x454   : > { %v1457_v19 = vpop.trf.xlu0 }
 0x455   : > { %6205 = vmatpush3.msk.msra.mxu0 %vm1210_vm7, %v1457_v19 }
 0x456   : > { %6207 = vmatmul.mubr.msk.f32.vlgmr.msra.gmra.mrb[6].mxu0 %vm1206_vm8, %v6848_v13  ;;  %6214 = vmatprep.subr.mxu0 %v6561_v7 }
 0x457   : > { %6216 = vmatprep.mubr.msk.f32.mxu0 %vm6564_vm6, %v6561_v7 }
 0x458   : > { %v1489_v20 = vpop.trf.xlu0 }
 0x459   : > { %v1505_v21 = vsub.f32 0.0, %v1489_v20 }
 0x45b   : > { %v1659_v22 = vadd.f32 %v1505_v21, %v1457_v19  ;;  %6210 = vmatpush3.msk.msra.mxu1 %vm1210_vm7, %v1505_v21 }
 0x45c   : > { %6212 = vmatmul.mubr.msk.f32.vlgmr.msra.gmra.mrb[6].mxu1 %vm1206_vm8, %v6851_v18  ;;  %6219 = vmatprep.subr.mxu1 %v6561_v7 }
 0x45d   : > { %6215 = vmatpush3.msk.msra.mxu0 %vm1210_vm7, %v1659_v22  ;;  %6221 = vmatprep.mubr.msk.f32.mxu1 %vm6564_vm6, %v6561_v7 }
 0x45e   : > { %6217 = vmatmul.mubr.msk.f32.vlgmr.msra.gmra.mrb[8].mxu0 %vm1206_vm8, %v1658_v23  ;;  %6224 = vmatprep.subr.mxu0 %v6561_v7 }
 0x45f   : > { %6226 = vmatprep.mubr.msk.f32.mxu0 %vm6564_vm6, %v6561_v7 }
 0x529   : > { %v1578_v25 = vpop.f32.mrb[6].mxu0 }
 0x52a   : > { %v6208_v26 = vpop.f32.mrb[7].mxu0 }
 0x52f   : > { %v1654_v27 = vpop.f32.mrb[6].mxu1 }
 0x530   : > { %v1736_v28 = vsub.f32 %v1578_v25, %v1654_v27  ;;  %v6213_v29 = vpop.f32.mrb[7].mxu1 }
 0x531   : > { %v1732_v30 = vpop.f32.mrb[8].mxu0 }
 0x532   : > { %v1739_v31 = vadd.f32 %v6727_v8, %v1736_v28  ;;  %v1737_v32 = vsub.f32 %v1732_v30, %v1578_v25  ;;  %v6218_v33 = vpop.f32.mrb[9].mxu0 }
 0x534   : > { %v1738_v34 = vsub.f32 %v1737_v32, %v1654_v27  ;;  %1747 = vperm.xlu1 %6466, %v1739_v31   ;;  %v1740_v35 = vmul.f32 %v1739_v31, %v1739_v31  ;;  %v1776_v38 = vsub.f32 %v1739_v31, %v6727_v8 }
 0x536   : > { %v1741_v36 = vmul.f32 %v1738_v34, %v1738_v34 }
 0x538   : > { %v1742_v37 = vadd.f32 %v1741_v36, %v1740_v35  ;;  %1753 = vperm.xlu1 %6466, %v1738_v34  }
 0x53a   : > { %6485 = vrcp.f32 %v1742_v37 }
 0x53c   : > { %1779 = vperm.xlu1 %6466, %v1776_v38  }
 0x540   : > { %6468 = vset.pattern.permute.xlu1 %v6566_v40 }
 0x544   : > { %v6486_v39 = vpop.eup %6485 }
 0x545   : > { %1760 = vperm.xlu0 %6467, %v6486_v39   ;;  %v6567_v39 = vmov 2  }
 0x5b3   : > { %v1748_v41 = vpop.permute.xlu1 %1747 }
 0x5b4   : > { %v1768_v43 = vmul.f32 %v6727_v8, %v1748_v41  ;;  %v1772_v44 = vmul.f32 0.0, %v1748_v41  ;;  %v1750_v56 = vmul.f32 %v1748_v41, %v1739_v31  ;;  %v1764_v57 = vmul.f32 %v1748_v41, %v1738_v34 }
 0x5b7   : > { %v1754_v42 = vpop.permute.xlu1 %1753 }
 0x5b8   : > { %v1769_v45 = vmul.f32 0.0, %v1754_v42  ;;  %v1773_v46 = vmul.f32 %v6727_v8, %v1754_v42  ;;  %v1756_v49 = vmul.f32 %v1754_v42, %v1738_v34  ;;  %v1765_v52 = vmul.f32 %v1754_v42, %v1739_v31 }
 0x5ba   : > { %v1770_v47 = vadd.f32 %v1769_v45, %v1768_v43  ;;  %v1774_v48 = vsub.f32 %v1772_v44, %v1773_v46  ;;  %v1757_v59 = vadd.f32 %v1756_v49, %v1750_v56  ;;  %v1766_v60 = vsub.f32 %v1764_v57, %v1765_v52 }
 0x5bb   : > { %v1780_v15 = vpop.permute.xlu1 %1779 }
 0x5c4   : > { %v1761_v62 = vpop.permute.xlu0 %1760 }
 0x5c5   : > { %v1763_v63 = vmul.f32 %v1761_v62, %v1757_v59  ;;  %v1767_v0 = vmul.f32 %v1766_v60, %v1761_v62  ;;  %v1771_v2 = vmul.f32 %v1770_v47, %v1761_v62  ;;  %v1775_v3 = vmul.f32 %v1774_v48, %v1761_v62 }
 0x5c6   : > { %v6891_v62 = vsub.s32 1, %v6709_v5 }
 0x5c7   : > { %v1785_v6 = vrot.slane %v1763_v63, %v6881_v61  ;;  %v1790_v11 = vrot.slane %v1767_v0, %v6881_v61  ;;  %v1801_v12 = vrot.slane %v1771_v2, %v6881_v61  ;;  %v1806_v14 = vrot.slane %v1775_v3, %v6881_v61 }
 0x5c9   : > { %v1786_v16 = vmul.f32 %v1785_v6, %v1780_v15  ;;  %v1791_v17 = vmul.f32 %v1790_v11, %v1754_v42  ;;  %v1794_v19 = vmul.f32 %v1790_v11, %v1780_v15  ;;  %v1795_v20 = vmul.f32 %v1785_v6, %v1754_v42 }
 0x5ca   : > { %v1802_v21 = vmul.f32 %v1801_v12, %v1780_v15  ;;  %v1807_v22 = vmul.f32 %v1806_v14, %v1754_v42  ;;  %v1810_v23 = vmul.f32 %v1806_v14, %v1780_v15  ;;  %v1811_v25 = vmul.f32 %v1801_v12, %v1754_v42 }
 0x5cb   : > { %v1792_v26 = vsub.f32 %v1786_v16, %v1791_v17  ;;  %v1796_v27 = vadd.f32 %v1795_v20, %v1794_v19 }
 0x5cc   : > { %v1808_v28 = vsub.f32 %v1802_v21, %v1807_v22  ;;  %v1812_v29 = vadd.f32 %v1811_v25, %v1810_v23 }
 0x5cd   : > { %v1793_v30 = vsub.f32 %v1739_v31, %v1792_v26  ;;  %v1797_v32 = vsub.f32 %v1738_v34, %v1796_v27 }
 0x5ce   : > { %v1809_v41 = vsub.f32 %v6727_v8, %v1808_v28  ;;  %v1813_v42 = vsub.f32 0.0, %v1812_v29 }
 0x5cf   : > { %1821 = vperm.xlu1 %6468, %v1793_v30   ;;  %v1815_v33 = vmul.f32 %v1797_v32, %v1797_v32  ;;  %v1814_v35 = vmul.f32 %v1793_v30, %v1793_v30  ;;  %v1850_v38 = vsub.f32 %v1793_v30, %v6727_v8 }
 0x5d1   : > { %v1816_v36 = vadd.f32 %v1815_v33, %v1814_v35 }
 0x5d3   : > { %1827 = vperm.xlu1 %6468, %v1797_v32   ;;  %6487 = vrcp.f32 %v1816_v36 }
 0x5dd   : > { %v6488_v37 = vpop.eup %6487 }
 0x5de   : > { %1834 = vperm.xlu1 %6468, %v6488_v37  }
 0x5e2   : > { %1853 = vperm.xlu1 %6468, %v1850_v38  }
 0x5e6   : > { %6469 = vset.pattern.permute.xlu1 %v6567_v39 }
 0x64e   : > { %v1822_v43 = vpop.permute.xlu1 %1821 }
 0x64f   : > { %v1842_v31 = vmul.f32 %v1822_v43, %v1809_v41  ;;  %v1846_v34 = vmul.f32 %v1822_v43, %v1813_v42  ;;  %v1824_v56 = vmul.f32 %v1822_v43, %v1793_v30  ;;  %v1838_v57 = vmul.f32 %v1822_v43, %v1797_v32 }
 0x652   : > { %v1828_v44 = vpop.permute.xlu1 %1827 }
 0x653   : > { %v1843_v45 = vmul.f32 %v1828_v44, %v1813_v42  ;;  %v1847_v46 = vmul.f32 %v1828_v44, %v1809_v41  ;;  %v1830_v49 = vmul.f32 %v1828_v44, %v1797_v32  ;;  %v1839_v52 = vmul.f32 %v1828_v44, %v1793_v30 }
 0x655   : > { %v1844_v47 = vadd.f32 %v1843_v45, %v1842_v31  ;;  %v1848_v48 = vsub.f32 %v1846_v34, %v1847_v46  ;;  %v1831_v59 = vadd.f32 %v1830_v49, %v1824_v56  ;;  %v1840_v60 = vsub.f32 %v1838_v57, %v1839_v52 }
 0x656   : > { %v6568_v46 = vmov 3  }
 0x657   : > { %6471 = vset.pattern.permute.xlu0 %v6568_v46 }
 0x65d   : > { %v1835_v63 = vpop.permute.xlu1 %1834 }
 0x65e   : > { %v1837_v0 = vmul.f32 %v1835_v63, %v1831_v59  ;;  %v1841_v2 = vmul.f32 %v1840_v60, %v1835_v63  ;;  %v1845_v3 = vmul.f32 %v1844_v47, %v1835_v63  ;;  %v1849_v6 = vmul.f32 %v1848_v48, %v1835_v63 }
 0x660   : > { %v1859_v11 = vrot.slane %v1837_v0, %v6891_v62  ;;  %v1864_v12 = vrot.slane %v1841_v2, %v6891_v62  ;;  %v1875_v14 = vrot.slane %v1845_v3, %v6891_v62  ;;  %v1880_v15 = vrot.slane %v1849_v6, %v6891_v62 }
 0x661   : > { %v1854_v16 = vpop.permute.xlu1 %1853  ;;  %v6901_v2 = vsub.s32 2, %v6709_v5 }
 0x662   : > { %v1865_v17 = vmul.f32 %v1864_v12, %v1828_v44  ;;  %v1869_v19 = vmul.f32 %v1859_v11, %v1828_v44  ;;  %v1881_v20 = vmul.f32 %v1880_v15, %v1828_v44  ;;  %v1885_v21 = vmul.f32 %v1875_v14, %v1828_v44 }
 0x663   : > { %v1860_v22 = vmul.f32 %v1859_v11, %v1854_v16  ;;  %v1868_v23 = vmul.f32 %v1864_v12, %v1854_v16  ;;  %v1876_v25 = vmul.f32 %v1875_v14, %v1854_v16  ;;  %v1884_v26 = vmul.f32 %v1880_v15, %v1854_v16 }
 0x665   : > { %v1866_v27 = vsub.f32 %v1860_v22, %v1865_v17  ;;  %v1870_v28 = vadd.f32 %v1869_v19, %v1868_v23  ;;  %v1882_v29 = vsub.f32 %v1876_v25, %v1881_v20  ;;  %v1886_v33 = vadd.f32 %v1885_v21, %v1884_v26 }
 0x667   : > { %v1867_v35 = vsub.f32 %v1793_v30, %v1866_v27  ;;  %v1871_v36 = vsub.f32 %v1797_v32, %v1870_v28  ;;  %v1883_v37 = vsub.f32 %v1809_v41, %v1882_v29  ;;  %v1887_v38 = vsub.f32 %v1813_v42, %v1886_v33 }
 0x669   : > { %v1888_v43 = vmul.f32 %v1867_v35, %v1867_v35  ;;  %v1889_v31 = vmul.f32 %v1871_v36, %v1871_v36  ;;  %1895 = vperm.xlu1 %6469, %v1867_v35   ;;  %v1924_v44 = vsub.f32 %v1867_v35, %v6727_v8 }
 0x66b   : > { %v1890_v34 = vadd.f32 %v1889_v31, %v1888_v43 }
 0x66d   : > { %1901 = vperm.xlu1 %6469, %v1871_v36   ;;  %6489 = vrcp.f32 %v1890_v34 }
 0x677   : > { %v6490_v45 = vpop.eup %6489 }
 0x678   : > { %1908 = vperm.xlu1 %6469, %v6490_v45  }
 0x67c   : > { %1927 = vperm.xlu1 %6469, %v1924_v44  }
 0x680   : > { %6470 = vset.pattern.permute.xlu1 %v6568_v46 }
 0x6e8   : > { %v1896_v30 = vpop.permute.xlu1 %1895 }
 0x6e9   : > { %v1916_v32 = vmul.f32 %v1896_v30, %v1883_v37  ;;  %v1920_v41 = vmul.f32 %v1896_v30, %v1887_v38  ;;  %v1898_v59 = vmul.f32 %v1896_v30, %v1867_v35  ;;  %v1912_v60 = vmul.f32 %v1896_v30, %v1871_v36 }
 0x6ec   : > { %v1902_v42 = vpop.permute.xlu1 %1901 }
 0x6ed   : > { %v1917_v47 = vmul.f32 %v1902_v42, %v1887_v38  ;;  %v1921_v48 = vmul.f32 %v1902_v42, %v1883_v37  ;;  %v1904_v56 = vmul.f32 %v1902_v42, %v1871_v36  ;;  %v1913_v57 = vmul.f32 %v1902_v42, %v1867_v35 }
 0x6ef   : > { %v1918_v49 = vadd.f32 %v1917_v47, %v1916_v32  ;;  %v1922_v52 = vsub.f32 %v1920_v41, %v1921_v48  ;;  %v1905_v63 = vadd.f32 %v1904_v56, %v1898_v59  ;;  %v1914_v0 = vsub.f32 %v1912_v60, %v1913_v57 }
 0x6f7   : > { %v1909_v3 = vpop.permute.xlu1 %1908 }
 0x6f8   : > { %v1911_v6 = vmul.f32 %v1909_v3, %v1905_v63  ;;  %v1915_v11 = vmul.f32 %v1914_v0, %v1909_v3  ;;  %v1919_v12 = vmul.f32 %v1918_v49, %v1909_v3  ;;  %v1923_v14 = vmul.f32 %v1922_v52, %v1909_v3 }
 0x6fa   : > { %v1933_v15 = vrot.slane %v1911_v6, %v6901_v2  ;;  %v1938_v16 = vrot.slane %v1915_v11, %v6901_v2  ;;  %v1949_v17 = vrot.slane %v1919_v12, %v6901_v2  ;;  %v1954_v19 = vrot.slane %v1923_v14, %v6901_v2 }
 0x6fb   : > { %v1928_v20 = vpop.permute.xlu1 %1927 }
 0x6fc   : > { %v1955_v21 = vmul.f32 %v1954_v19, %v1902_v42  ;;  %v1959_v22 = vmul.f32 %v1949_v17, %v1902_v42  ;;  %v1934_v23 = vmul.f32 %v1933_v15, %v1928_v20  ;;  %v1942_v25 = vmul.f32 %v1938_v16, %v1928_v20 }
 0x6fd   : > { %v1950_v26 = vmul.f32 %v1949_v17, %v1928_v20  ;;  %v1958_v27 = vmul.f32 %v1954_v19, %v1928_v20  ;;  %v1939_v28 = vmul.f32 %v1938_v16, %v1902_v42  ;;  %v1943_v29 = vmul.f32 %v1933_v15, %v1902_v42 }
 0x6ff   : > { %v1956_v33 = vsub.f32 %v1950_v26, %v1955_v21  ;;  %v1960_v43 = vadd.f32 %v1959_v22, %v1958_v27  ;;  %v1940_v31 = vsub.f32 %v1934_v23, %v1939_v28  ;;  %v1944_v34 = vadd.f32 %v1943_v29, %v1942_v25 }
 0x700   : > { %v6923_v26 = vadd.f32 %v6757_v10, %v6755_v9  ;;  %v2309_v27 = vsub.f32 0.0, %v6851_v18 }
 0x701   : > { %v1941_v45 = vsub.f32 %v1867_v35, %v1940_v31  ;;  %v1945_v44 = vsub.f32 %v1871_v36, %v1944_v34  ;;  %v1957_v30 = vsub.f32 %v1883_v37, %v1956_v33  ;;  %v1961_v32 = vsub.f32 %v1887_v38, %v1960_v43 }
 0x702   : > { %v6909_v38 = vsub.s32 3, %v6709_v5  ;;  %v2462_v31 = vadd.f32 %v2309_v27, %v6848_v13 }
 0x703   : > { %1969 = vperm.xlu1 %6470, %v1941_v45   ;;  %v1962_v41 = vmul.f32 %v1941_v45, %v1941_v45  ;;  %v1963_v47 = vmul.f32 %v1945_v44, %v1945_v44  ;;  %v1990_v49 = vsub.f32 %v1941_v45, %v6727_v8 }
 0x705   : > { %v1964_v48 = vadd.f32 %v1963_v47, %v1962_v41  ;;  %v977_v47 = vld [vmem:[%s7287_s16] sm:$0x1] }
 0x706   : > { %6403 = vpush %v977_v47 }
 0x707   : > { %1975 = vperm.xlu1 %6470, %v1945_v44   ;;  %6491 = vrcp.f32 %v1964_v48 }
 0x70b   : > { %1993 = vperm.xlu1 %6470, %v1990_v49  }
 0x711   : > { %v6492_v52 = vpop.eup %6491 }
 0x712   : > { %1982 = vperm.xlu0 %6471, %v6492_v52  }
 0x737   : > { %s6404_s19 = spop %6403 }
 0x782   : > { %v1970_v42 = vpop.permute.xlu1 %1969 }
 0x783   : > { %v1972_v57 = vmul.f32 %v1970_v42, %v1957_v30  ;;  %v1986_v59 = vmul.f32 %v1970_v42, %v1961_v32 }
 0x786   : > { %v1976_v56 = vpop.permute.xlu1 %1975 }
 0x787   : > { %v1978_v60 = vmul.f32 %v1976_v56, %v1961_v32  ;;  %v1987_v35 = vmul.f32 %v1976_v56, %v1957_v30 }
 0x789   : > { %v1979_v36 = vadd.f32 %v1978_v60, %v1972_v57  ;;  %v1988_v37 = vsub.f32 %v1986_v59, %v1987_v35 }
 0x78a   : > { %v1994_v12 = vpop.permute.xlu1 %1993 }
 0x791   : > { %v1983_v63 = vpop.permute.xlu0 %1982 }
 0x792   : > { %v1985_v0 = vmul.f32 %v1983_v63, %v1979_v36  ;;  %v1989_v3 = vmul.f32 %v1988_v37, %v1983_v63 }
 0x794   : > { %v1999_v6 = vrot.slane %v1985_v0, %v6909_v38  ;;  %v2004_v11 = vrot.slane %v1989_v3, %v6909_v38 }
 0x796   : > { %v2000_v14 = vmul.f32 %v1999_v6, %v1994_v12  ;;  %v2005_v15 = vmul.f32 %v2004_v11, %v1976_v56  ;;  %v2008_v16 = vmul.f32 %v2004_v11, %v1994_v12  ;;  %v2009_v17 = vmul.f32 %v1999_v6, %v1976_v56 }
 0x797   : > { %v2839_v6 = vstv %s6404_s19 }
 0x798   : > { %v2010_v19 = vadd.f32 %v2009_v17, %v2008_v16  ;;  %v2006_v20 = vsub.f32 %v2000_v14, %v2005_v15 }
 0x79a   : > { %v2011_v21 = vsub.f32 %v1961_v32, %v2010_v19  ;;  %v2007_v22 = vsub.f32 %v1957_v30, %v2006_v20 }
 0x79c   : > { %2044 = vxpose.xlu0.b32.start.end [1/1] (short) (narrow) %v2011_v21, 8  ;;  %2012 = vxpose.xlu1.b32.start.end [1/1] (short) (narrow) %v2007_v22, 8 }
 0x7a0   : > { %2542 = vxpose.xlu0.b32.start.end [1/1] (short) (narrow) %v6822_v54, 8 }
 0x7a4   : > { %2574 = vxpose.xlu0.b32.start.end [1/1] (short) (narrow) %v6827_v55, 8 }
 0x81c   : > { %v2060_v5 = vpop.trf.xlu0  ;;  %v2028_v23 = vpop.trf.xlu1 }
 0x81d   : > { %v2229_v25 = vadd.f32 %v2060_v5, %v2028_v23  ;;  %6220 = vmatpush3.msk.msra.mxu1 %vm1210_vm7, %v2028_v23  ;;  %6225 = vmatpush3.msk.msra.mxu0 %vm1210_vm7, %v2060_v5 }
 0x81e   : > { %6222 = vmatmul.mubr.msk.f32.vlgmr.msra.gmra.mrb[8].mxu1 %vm1206_vm8, %v6755_v9  ;;  %6227 = vmatmul.mubr.msk.f32.vlgmr.msra.gmra.mrb[10].mxu0 %vm1206_vm8, %v6757_v10 }
 0x81f   : > { %6229 = vmatprep.subr.mxu1 %v6561_v7  ;;  %6234 = vmatprep.subr.mxu0 %v6561_v7 }
 0x820   : > { %6230 = vmatpush3.msk.msra.mxu1 %vm1210_vm7, %v2229_v25  ;;  %6235 = vmatpush3.msk.msra.mxu0 %vm1210_vm7, %v6848_v13  ;;  %v2558_v13 = vpop.trf.xlu0 }
 0x821   : > { %6231 = vmatprep.mubr.msk.f32.mxu1 %vm6564_vm6, %v6561_v7  ;;  %6239 = vmatprep.subr.mxu1 %v6561_v7 }
 0x822   : > { %6232 = vmatmul.mubr.msk.f32.vlgmr.msra.gmra.mrb[10].mxu1 %vm1206_vm8, %v6923_v26  ;;  %6236 = vmatprep.mubr.msk.f32.mxu0 %vm6564_vm6, %v6561_v7 }
 0x823   : > { %6240 = vmatpush3.msk.msra.mxu1 %vm1210_vm7, %v2309_v27  ;;  %6244 = vmatprep.subr.mxu0 %v6561_v7 }
 0x824   : > { %6241 = vmatprep.mubr.msk.f32.mxu1 %vm6564_vm6, %v6561_v7  ;;  %6249 = vmatprep.subr.mxu1 %v6561_v7  ;;  %v2590_v41 = vpop.trf.xlu0 }
 0x825   : > { %v2759_v42 = vadd.f32 %v2590_v41, %v2558_v13 }
 0x8f1   : > { %v2148_v18 = vpop.f32.mrb[8].mxu1  ;;  %v2224_v28 = vpop.f32.mrb[10].mxu0 }
 0x8f2   : > { %v2306_v29 = vsub.f32 %v2148_v18, %v2224_v28  ;;  %v6223_v33 = vpop.f32.mrb[9].mxu1  ;;  %v6228_v43 = vpop.f32.mrb[11].mxu0 }
 0x8f4   : > { %6237 = vmatmul.mubr.msk.f32.vlgmr.msra.gmra.mrb[12].mxu0 %vm1206_vm8, %v2306_v29 }
 0x8f5   : > { %6245 = vmatpush3.msk.msra.mxu0 %vm1210_vm7, %v2462_v31  ;;  %v2302_v34 = vpop.f32.mrb[10].mxu1  ;;  %6246 = vmatprep.mubr.msk.f32.mxu0 %vm6564_vm6, %v6561_v7 }
 0x8f6   : > { %v2307_v45 = vsub.f32 %v2302_v34, %v2148_v18  ;;  %v6233_v44 = vpop.f32.mrb[11].mxu1  ;;  %6254 = vmatprep.subr.mxu0 %v6561_v7 }
 0x8f8   : > { %v2308_v30 = vsub.f32 %v2307_v45, %v2224_v28 }
 0x8fa   : > { %v2461_v32 = vadd.f32 %v2308_v30, %v2306_v29  ;;  %6242 = vmatmul.mubr.msk.f32.vlgmr.msra.gmra.mrb[12].mxu1 %vm1206_vm8, %v2308_v30 }
 0x8fb   : > { %6251 = vmatprep.mubr.msk.f32.mxu1 %vm6564_vm6, %v6561_v7  ;;  %6250 = vmatpush3.msk.msra.mxu1 %vm1210_vm7, %v2558_v13 }
 0x8fc   : > { %6247 = vmatmul.mubr.msk.f32.vlgmr.msra.gmra.mrb[14].mxu0 %vm1206_vm8, %v2461_v32  ;;  %6259 = vmatprep.subr.mxu1 %v6561_v7 }
 0x8fd   : > { %6256 = vmatprep.mubr.msk.f32.mxu0 %vm6564_vm6, %v6561_v7  ;;  %6255 = vmatpush3.msk.msra.mxu0 %vm1210_vm7, %v2590_v41 }
 0x8fe   : > { %6264 = vmatprep.subr.mxu0 %v6561_v7 }
 0x9c7   : > { %v2381_v48 = vpop.f32.mrb[12].mxu0 }
 0x9c8   : > { %v6238_v49 = vpop.f32.mrb[13].mxu0 }
 0x9cd   : > { %v2457_v52 = vpop.f32.mrb[12].mxu1 }
 0x9ce   : > { %v2539_v56 = vsub.f32 %v2381_v48, %v2457_v52  ;;  %v6243_v57 = vpop.f32.mrb[13].mxu1 }
 0x9cf   : > { %v2535_v59 = vpop.f32.mrb[14].mxu0 }
 0x9d0   : > { %v2540_v60 = vsub.f32 %v2535_v59, %v2381_v48  ;;  %v6248_v35 = vpop.f32.mrb[15].mxu0  ;;  %6252 = vmatmul.mubr.msk.f32.vlgmr.msra.gmra.mrb[14].mxu1 %vm1206_vm8, %v2539_v56 }
 0x9d1   : > { %6260 = vmatpush3.msk.msra.mxu1 %vm1210_vm7, %v2759_v42  ;;  %6261 = vmatprep.mubr.msk.f32.mxu1 %vm6564_vm6, %v6561_v7 }
 0x9d2   : > { %v2541_v36 = vsub.f32 %v2540_v60, %v2457_v52  ;;  %6269 = vmatprep.subr.mxu1 %v6561_v7 }
 0x9d4   : > { %v2758_v37 = vadd.f32 %v2541_v36, %v2539_v56  ;;  %6257 = vmatmul.mubr.msk.f32.vlgmr.msra.gmra.mrb[16].mxu0 %vm1206_vm8, %v2541_v36 }
 0x9d5   : > { %6266 = vmatprep.mubr.msk.f32.mxu0 %vm6564_vm6, %v6561_v7 }
 0x9d6   : > { %6262 = vmatmul.mubr.msk.f32.vlgmr.msra.gmra.mrb[16].mxu1 %vm1206_vm8, %v2758_v37 }
 0x9d7   : > { %6271 = vmatprep.mubr.msk.f32.mxu1 %vm6564_vm6, %v6561_v7 }
 0xaa3   : > { %v2678_v63 = vpop.f32.mrb[14].mxu1 }
 0xaa4   : > { %v6253_v0 = vpop.f32.mrb[15].mxu1 }
 0xaa7   : > { %v2754_v3 = vpop.f32.mrb[16].mxu0 }
 0xaa8   : > { %v2836_v11 = vsub.f32 %v2678_v63, %v2754_v3  ;;  %v6258_v12 = vpop.f32.mrb[17].mxu0 }
 0xaa9   : > { %v2832_v14 = vpop.f32.mrb[16].mxu1 }
 0xaaa   : > { %v2840_v15 = vmul.f32 %v2839_v6, %v2836_v11  ;;  %v2837_v16 = vsub.f32 %v2832_v14, %v2678_v63  ;;  %v6263_v17 = vpop.f32.mrb[17].mxu1 }
 0xaac   : > { %v2841_v19 = vadd.f32 %v2840_v15, %v6791_v50  ;;  %v2838_v20 = vsub.f32 %v2837_v16, %v2754_v3 }
 0xaae   : > { %v2844_v21 = vadd.f32 1e-12, %v2841_v19  ;;  %v2842_v22 = vmul.f32 %v2839_v6, %v2838_v20 }
 0xab0   : > { %v2843_v5 = vadd.f32 %v2842_v22, %v6793_v51  ;;  %v2845_v23 = vmul.f32 %v2844_v21, %v2844_v21 }
 0xab2   : > { %v2846_v25 = vmul.f32 %v2843_v5, %v2843_v5 }
 0xab4   : > { %v2847_v27 = vadd.f32 %v2846_v25, %v2845_v23 }
 0xab6   : > { %6493 = vrsqrt.f32 %v2847_v27 }
 0xac0   : > { %v6494_v18 = vpop.eup %6493 }
 0xac1   : > { %v6977_v28 = vmul.f32 %v6494_v18, %v2843_v5  ;;  %v6979_v29 = vmul.f32 %v6494_v18, %v2841_v19 }
 0xac3   : > { %5640 = vst.msk [vmem:[#allocation3] sm:$0xff] %vm1206_vm8, %v6977_v28  ;;  %5645 = vst.msk [vmem:[%s6739_s26] sm:$0xff] %vm1206_vm8, %v6977_v28  ;;  %6265 = vmatpush3.msra.mxu0 %v6979_v29  ;;  %6270 = vmatpush3.msra.mxu1 %v6977_v28  ;;  %v6995_v50 = vadd.f32 %v6977_v28, %v6979_v29 }
 0xac4   : > { %5639 = vst.msk [vmem:[#allocation2] sm:$0xff] %vm1206_vm8, %v6979_v29  ;;  %5644 = vst.msk [vmem:[%s6734_s13] sm:$0xff] %vm1206_vm8, %v6979_v29  ;;  %6267 = vmatmul.mubr.msk.f32.vlgmr.msra.gmra.mrb[18].mxu0 %vm981_vm5, %v6697_v1  ;;  %6272 = vmatmul.mubr.msk.f32.vlgmr.msra.gmra.mrb[18].mxu1 %vm981_vm5, %v6705_v4 }
 0xac5   : > { %6274 = vmatprep.subr.mxu0 %v6561_v7  ;;  %6276 = vmatprep.mubr.msk.f32.mxu0 %vm6564_vm6, %v6561_v7 }
 0xac6   : > { %6275 = vmatpush3.msra.mxu0 %v6995_v50  ;;  %6279 = vmatprep.subr.mxu1 %v6561_v7 }
 0xac7   : > { %6280 = vmatpush3.msk.msra.mxu1 %vm1210_vm7, %v6822_v54  ;;  %6281 = vmatprep.mubr.msk.f32.mxu1 %vm6564_vm6, %v6561_v7 }
 0xac8   : > { %6277 = vmatmul.mubr.msk.f32.vlgmr.msra.gmra.mrb[20].mxu0 %vm981_vm5, %v6809_v53  ;;  %6284 = vmatprep.subr.mxu0 %v6561_v7 }
 0xac9   : > { %6285 = vmatpush3.msk.msra.mxu0 %vm1210_vm7, %v6827_v55  ;;  %6286 = vmatprep.mubr.msk.f32.mxu0 %vm6564_vm6, %v6561_v7 }
 0xaca   : > { %6289 = vmatprep.subr.mxu1 %v6561_v7  ;;  %6294 = vmatprep.subr.mxu0 %v6561_v7 }
 0xb97   : > { %v2917_v1 = vpop.f32.mrb[18].mxu0  ;;  %v2987_v4 = vpop.f32.mrb[18].mxu1 }
 0xb98   : > { %v7019_v51 = vsub.f32 %v2917_v1, %v2987_v4  ;;  %v6268_v54 = vpop.f32.mrb[19].mxu0  ;;  %v6273_v33 = vpop.f32.mrb[19].mxu1 }
 0xb9a   : > { %6282 = vmatmul.mubr.msk.f32.vlgmr.msra.gmra.mrb[20].mxu1 %vm1206_vm8, %v7019_v51 }
 0xb9b   : > { %v3058_v53 = vpop.f32.mrb[20].mxu0  ;;  %6290 = vmatpush3.msk.msra.mxu1 %vm1210_vm7, %v6834_v58  ;;  %6291 = vmatprep.mubr.msk.f32.mxu1 %vm6564_vm6, %v6561_v7 }
 0xb9c   : > { %v3063_v55 = vsub.f32 %v3058_v53, %v2917_v1  ;;  %v6278_v43 = vpop.f32.mrb[21].mxu0  ;;  %6299 = vmatprep.subr.mxu1 %v6561_v7 }
 0xb9e   : > { %v7028_v31 = vsub.f32 %v3063_v55, %v2987_v4 }
 0xba0   : > { %v7032_v34 = vadd.f32 %v7028_v31, %v7019_v51  ;;  %6287 = vmatmul.mubr.msk.f32.vlgmr.msra.gmra.mrb[22].mxu0 %vm1206_vm8, %v7028_v31 }
 0xba1   : > { %6296 = vmatprep.mubr.msk.f32.mxu0 %vm6564_vm6, %v6561_v7 }
 0xba2   : > { %6292 = vmatmul.mubr.msk.f32.vlgmr.msra.gmra.mrb[22].mxu1 %vm1206_vm8, %v7032_v34 }
 0xba3   : > { %6301 = vmatprep.mubr.msk.f32.mxu1 %vm6564_vm6, %v6561_v7 }
 0xc6d   : > { %v3134_v58 = vpop.f32.mrb[20].mxu1 }
 0xc6e   : > { %v6283_v45 = vpop.f32.mrb[21].mxu1 }
 0xc73   : > { %v3207_v44 = vpop.f32.mrb[22].mxu0 }
 0xc74   : > { %v7042_v30 = vsub.f32 %v3134_v58, %v3207_v44  ;;  %v6288_v32 = vpop.f32.mrb[23].mxu0 }
 0xc75   : > { %v3281_v13 = vpop.f32.mrb[22].mxu1 }
 0xc76   : > { %v3286_v41 = vsub.f32 %v3281_v13, %v3134_v58  ;;  %v6293_v47 = vpop.f32.mrb[23].mxu1  ;;  %3288 = vxpose.xlu0.b32.start.end [1/1] (short) (narrow) %v7042_v30, 8 }
 0xc78   : > { %v7045_v48 = vsub.f32 %v3286_v41, %v3207_v44 }
 0xc7a   : > { %3320 = vxpose.xlu1.b32.start.end [1/1] (short) (narrow) %v7045_v48, 8  ;;  %v3505_v57 = vadd.f32 %v7045_v48, %v7042_v30 }
 0xc98   : > { %6473 = vset.pattern.permute.xlu1 %v6565_v24 }
 0xc9f   : > { %6472 = vset.pattern.permute.xlu0 %v6565_v24 }
 0xcf6   : > { %v3304_v49 = vpop.trf.xlu0 }
 0xcf7   : > { %6295 = vmatpush3.msk.msra.mxu0 %vm1210_vm7, %v3304_v49 }
 0xcf8   : > { %6297 = vmatmul.mubr.msk.f32.vlgmr.msra.gmra.mrb[24].mxu0 %vm1206_vm8, %v7042_v30  ;;  %6304 = vmatprep.subr.mxu0 %v6561_v7 }
 0xcf9   : > { %6306 = vmatprep.mubr.msk.f32.mxu0 %vm6564_vm6, %v6561_v7 }
 0xcfa   : > { %v3336_v52 = vpop.trf.xlu1 }
 0xcfb   : > { %v3352_v42 = vsub.f32 0.0, %v3336_v52 }
 0xcfd   : > { %v3506_v56 = vadd.f32 %v3352_v42, %v3304_v49  ;;  %6300 = vmatpush3.msk.msra.mxu1 %vm1210_vm7, %v3352_v42 }
 0xcfe   : > { %6302 = vmatmul.mubr.msk.f32.vlgmr.msra.gmra.mrb[24].mxu1 %vm1206_vm8, %v7045_v48  ;;  %6309 = vmatprep.subr.mxu1 %v6561_v7 }
 0xcff   : > { %6305 = vmatpush3.msk.msra.mxu0 %vm1210_vm7, %v3506_v56  ;;  %6310 = vmatpush3.msra.mxu1 %v6755_v9 }
 0xd00   : > { %6307 = vmatmul.mubr.msk.f32.vlgmr.msra.gmra.mrb[26].mxu0 %vm1206_vm8, %v3505_v57  ;;  %6311 = vmatprep.mubr.msk.f32.mxu1 %vm6564_vm6, %v6561_v7 }
 0xd01   : > { %6319 = vmatprep.subr.mxu1 %v6561_v7  ;;  %6314 = vmatprep.subr.mxu0 %v6561_v7 }
 0xd02   : > { %6315 = vmatpush3.msra.mxu0 %v6757_v10  ;;  %6316 = vmatprep.mubr.msk.f32.mxu0 %vm6564_vm6, %v6561_v7 }
 0xd03   : > { %6324 = vmatprep.subr.mxu0 %v6561_v7 }
 0xdcb   : > { %v3425_v59 = vpop.f32.mrb[24].mxu0 }
 0xdcc   : > { %v6298_v60 = vpop.f32.mrb[25].mxu0 }
 0xdd1   : > { %v3501_v35 = vpop.f32.mrb[24].mxu1 }
 0xdd2   : > { %v3583_v9 = vsub.f32 %v3425_v59, %v3501_v35  ;;  %v6303_v36 = vpop.f32.mrb[25].mxu1 }
 0xdd3   : > { %v3579_v37 = vpop.f32.mrb[26].mxu0 }
 0xdd4   : > { %v3586_v63 = vadd.f32 %v6727_v8, %v3583_v9  ;;  %v3584_v0 = vsub.f32 %v3579_v37, %v3425_v59  ;;  %v6308_v3 = vpop.f32.mrb[27].mxu0 }
 0xdd6   : > { %v3585_v6 = vsub.f32 %v3584_v0, %v3501_v35  ;;  %3594 = vperm.xlu0 %6472, %v3586_v63   ;;  %v3587_v11 = vmul.f32 %v3586_v63, %v3586_v63  ;;  %v3623_v15 = vsub.f32 %v3586_v63, %v6727_v8 }
 0xdd8   : > { %v3588_v12 = vmul.f32 %v3585_v6, %v3585_v6  ;;  %3600 = vperm.xlu1 %6473, %v3585_v6  }
 0xdda   : > { %v3589_v10 = vadd.f32 %v3588_v12, %v3587_v11  ;;  %6475 = vset.pattern.permute.xlu0 %v6566_v40 }
 0xddc   : > { %6495 = vrcp.f32 %v3589_v10 }
 0xde6   : > { %v6496_v14 = vpop.eup %6495 }
 0xde7   : > { %3607 = vperm.xlu1 %6473, %v6496_v14  }
 0xdeb   : > { %3626 = vperm.xlu1 %6473, %v3623_v15  }
 0xdef   : > { %6474 = vset.pattern.permute.xlu1 %v6566_v40 }
 0xe55   : > { %v3595_v17 = vpop.permute.xlu0 %3594 }
 0xe56   : > { %v3597_v5 = vmul.f32 %v3595_v17, %v3586_v63  ;;  %v3611_v23 = vmul.f32 %v3595_v17, %v3585_v6  ;;  %v3615_v25 = vmul.f32 %v6727_v8, %v3595_v17  ;;  %v3619_v27 = vmul.f32 0.0, %v3595_v17 }
 0xe57   : > { %v3601_v16 = vpop.permute.xlu1 %3600 }
 0xe58   : > { %v3603_v19 = vmul.f32 %v3601_v16, %v3585_v6  ;;  %v3612_v20 = vmul.f32 %v3601_v16, %v3586_v63  ;;  %v3616_v21 = vmul.f32 0.0, %v3601_v16  ;;  %v3620_v22 = vmul.f32 %v6727_v8, %v3601_v16 }
 0xe5a   : > { %v3604_v18 = vadd.f32 %v3603_v19, %v3597_v5  ;;  %v3613_v1 = vsub.f32 %v3611_v23, %v3612_v20  ;;  %v3617_v4 = vadd.f32 %v3616_v21, %v3615_v25  ;;  %v3621_v54 = vsub.f32 %v3619_v27, %v3620_v22 }
 0xe66   : > { %v3608_v33 = vpop.permute.xlu1 %3607 }
 0xe67   : > { %v3610_v53 = vmul.f32 %v3608_v33, %v3604_v18  ;;  %v3614_v55 = vmul.f32 %v3613_v1, %v3608_v33  ;;  %v3618_v43 = vmul.f32 %v3617_v4, %v3608_v33  ;;  %v3622_v58 = vmul.f32 %v3621_v54, %v3608_v33 }
 0xe69   : > { %v3632_v45 = vrot.slane %v3610_v53, %v6881_v61  ;;  %v3637_v44 = vrot.slane %v3614_v55, %v6881_v61  ;;  %v3648_v32 = vrot.slane %v3618_v43, %v6881_v61  ;;  %v3653_v13 = vrot.slane %v3622_v58, %v6881_v61 }
 0xe6a   : > { %v3627_v41 = vpop.permute.xlu1 %3626 }
 0xe6b   : > { %v3638_v47 = vmul.f32 %v3637_v44, %v3601_v16  ;;  %v3642_v49 = vmul.f32 %v3632_v45, %v3601_v16  ;;  %v3654_v52 = vmul.f32 %v3653_v13, %v3601_v16  ;;  %v3658_v42 = vmul.f32 %v3648_v32, %v3601_v16 }
 0xe6c   : > { %v3633_v56 = vmul.f32 %v3632_v45, %v3627_v41  ;;  %v3641_v57 = vmul.f32 %v3637_v44, %v3627_v41  ;;  %v3649_v59 = vmul.f32 %v3648_v32, %v3627_v41  ;;  %v3657_v60 = vmul.f32 %v3653_v13, %v3627_v41 }
 0xe6e   : > { %v3639_v35 = vsub.f32 %v3633_v56, %v3638_v47  ;;  %v3643_v9 = vadd.f32 %v3642_v49, %v3641_v57  ;;  %v3655_v36 = vsub.f32 %v3649_v59, %v3654_v52  ;;  %v3659_v37 = vadd.f32 %v3658_v42, %v3657_v60 }
 0xe70   : > { %v3640_v0 = vsub.f32 %v3586_v63, %v3639_v35  ;;  %v3644_v3 = vsub.f32 %v3585_v6, %v3643_v9  ;;  %v3656_v63 = vsub.f32 %v6727_v8, %v3655_v36  ;;  %v3660_v6 = vsub.f32 0.0, %v3659_v37 }
 0xe72   : > { %v3661_v11 = vmul.f32 %v3640_v0, %v3640_v0  ;;  %v3662_v12 = vmul.f32 %v3644_v3, %v3644_v3  ;;  %3674 = vperm.xlu0 %6475, %v3644_v3   ;;  %3668 = vperm.xlu1 %6474, %v3640_v0   ;;  %v3697_v14 = vsub.f32 %v3640_v0, %v6727_v8 }
 0xe74   : > { %v3663_v10 = vadd.f32 %v3662_v12, %v3661_v11 }
 0xe76   : > { %3700 = vperm.xlu1 %6474, %v3697_v14   ;;  %6497 = vrcp.f32 %v3663_v10 }
 0xe80   : > { %v6498_v15 = vpop.eup %6497 }
 0xe81   : > { %3681 = vperm.xlu1 %6474, %v6498_v15  }
 0xe90   : > { %3859 = vxpose.xlu0.b32.start.end [1/1] (short) (narrow) %v6979_v29, 8 }
 0xeaa   : > { %3891 = vxpose.xlu1.b32.start.end [1/1] (short) (narrow) %v6977_v28, 8 }
 0xeb9   : > { %6476 = vset.pattern.permute.xlu0 %v6567_v39 }
 0xec8   : > { %6477 = vset.pattern.permute.xlu1 %v6567_v39 }
 0xef1   : > { %v3675_v16 = vpop.permute.xlu0 %3674  ;;  %v3669_v17 = vpop.permute.xlu1 %3668 }
 0xef2   : > { %v3689_v19 = vmul.f32 %v3669_v17, %v3656_v63  ;;  %v3693_v20 = vmul.f32 %v3669_v17, %v3660_v6  ;;  %v3690_v21 = vmul.f32 %v3675_v16, %v3660_v6  ;;  %v3694_v22 = vmul.f32 %v3675_v16, %v3656_v63 }
 0xef3   : > { %v3671_v25 = vmul.f32 %v3669_v17, %v3640_v0  ;;  %v3685_v27 = vmul.f32 %v3669_v17, %v3644_v3  ;;  %v3677_v18 = vmul.f32 %v3675_v16, %v3644_v3  ;;  %v3686_v1 = vmul.f32 %v3675_v16, %v3640_v0 }
 0xef4   : > { %v3691_v5 = vadd.f32 %v3690_v21, %v3689_v19  ;;  %v3695_v23 = vsub.f32 %v3693_v20, %v3694_v22 }
 0xef5   : > { %v3701_v4 = vpop.permute.xlu1 %3700  ;;  %v3678_v54 = vadd.f32 %v3677_v18, %v3671_v25  ;;  %v3687_v33 = vsub.f32 %v3685_v27, %v3686_v1 }
 0xf00   : > { %v3682_v53 = vpop.permute.xlu1 %3681 }
 0xf01   : > { %v3684_v55 = vmul.f32 %v3682_v53, %v3678_v54  ;;  %v3688_v43 = vmul.f32 %v3687_v33, %v3682_v53  ;;  %v3692_v58 = vmul.f32 %v3691_v5, %v3682_v53  ;;  %v3696_v45 = vmul.f32 %v3695_v23, %v3682_v53 }
 0xf03   : > { %v3706_v44 = vrot.slane %v3684_v55, %v6891_v62  ;;  %v3711_v32 = vrot.slane %v3688_v43, %v6891_v62  ;;  %v3722_v13 = vrot.slane %v3692_v58, %v6891_v62  ;;  %v3727_v41 = vrot.slane %v3696_v45, %v6891_v62 }
 0xf05   : > { %v3707_v47 = vmul.f32 %v3706_v44, %v3701_v4  ;;  %v3712_v49 = vmul.f32 %v3711_v32, %v3675_v16  ;;  %v3715_v52 = vmul.f32 %v3711_v32, %v3701_v4  ;;  %v3716_v42 = vmul.f32 %v3706_v44, %v3675_v16 }
 0xf06   : > { %v3723_v56 = vmul.f32 %v3722_v13, %v3701_v4  ;;  %v3728_v57 = vmul.f32 %v3727_v41, %v3675_v16  ;;  %v3731_v59 = vmul.f32 %v3727_v41, %v3701_v4  ;;  %v3732_v60 = vmul.f32 %v3722_v13, %v3675_v16 }
 0xf07   : > { %v3713_v35 = vsub.f32 %v3707_v47, %v3712_v49  ;;  %v3717_v9 = vadd.f32 %v3716_v42, %v3715_v52 }
 0xf08   : > { %v3729_v36 = vsub.f32 %v3723_v56, %v3728_v57  ;;  %v3733_v37 = vadd.f32 %v3732_v60, %v3731_v59 }
 0xf09   : > { %v7093_v11 = vsub.f32 %v3640_v0, %v3713_v35  ;;  %v7095_v12 = vsub.f32 %v3644_v3, %v3717_v9 }
 0xf0a   : > { %v3730_v10 = vsub.f32 %v3656_v63, %v3729_v36  ;;  %v3734_v14 = vsub.f32 %v3660_v6, %v3733_v37 }
 0xf0b   : > { %3748 = vperm.xlu1 %6477, %v7095_v12   ;;  %v3736_v15 = vmul.f32 %v7095_v12, %v7095_v12  ;;  %3742 = vperm.xlu0 %6476, %v7093_v11   ;;  %v3735_v16 = vmul.f32 %v7093_v11, %v7093_v11  ;;  %v3771_v17 = vsub.f32 %v7093_v11, %v6727_v8 }
 0xf0d   : > { %v3737_v19 = vadd.f32 %v3736_v15, %v3735_v16 }
 0xf0f   : > { %3774 = vperm.xlu1 %6477, %v3771_v17   ;;  %6499 = vrcp.f32 %v3737_v19 }
 0xf10   : > { %v3875_v0 = vpop.trf.xlu0 }
 0xf11   : > { %6312 = vmatmul.mubr.msk.f32.vlgmr.msra.gmra.mrb[26].mxu1 %vm981_vm5, %v3875_v0 }
 0xf12   : > { %6320 = vmatpush3.msra.mxu1 %v6923_v26  ;;  %6321 = vmatprep.mubr.msk.f32.mxu1 %vm6564_vm6, %v6561_v7 }
 0xf13   : > { %6479 = vset.pattern.permute.xlu1 %v6568_v46  ;;  %6329 = vmatprep.subr.mxu1 %v6561_v7 }
 0xf19   : > { %v6500_v3 = vpop.eup %6499 }
 0xf1a   : > { %3755 = vperm.xlu0 %6476, %v6500_v3  }
 0xf1e   : > { %6478 = vset.pattern.permute.xlu0 %v6568_v46 }
 0xf2a   : > { %v3907_v63 = vpop.trf.xlu1 }
 0xf2b   : > { %v4069_v6 = vadd.f32 %v3907_v63, %v3875_v0  ;;  %6317 = vmatmul.mubr.msk.f32.vlgmr.msra.gmra.mrb[28].mxu0 %vm981_vm5, %v3907_v63 }
 0xf2c   : > { %6326 = vmatprep.mubr.msk.f32.mxu0 %vm6564_vm6, %v6561_v7 }
 0xf2d   : > { %6322 = vmatmul.mubr.msk.f32.vlgmr.msra.gmra.mrb[28].mxu1 %vm981_vm5, %v4069_v6 }
 0xf2e   : > { %6331 = vmatprep.mubr.msk.f32.mxu1 %vm6564_vm6, %v6561_v7 }
 0xf8a   : > { %v3743_v26 = vpop.permute.xlu0 %3742  ;;  %v3749_v20 = vpop.permute.xlu1 %3748 }
 0xf8b   : > { %v3763_v21 = vmul.f32 %v3743_v26, %v3730_v10  ;;  %v3767_v22 = vmul.f32 %v3743_v26, %v3734_v14  ;;  %v3764_v5 = vmul.f32 %v3749_v20, %v3734_v14  ;;  %v3768_v23 = vmul.f32 %v3749_v20, %v3730_v10 }
 0xf8c   : > { %v3745_v27 = vmul.f32 %v3743_v26, %v7093_v11  ;;  %v3759_v18 = vmul.f32 %v3743_v26, %v7095_v12  ;;  %v3751_v1 = vmul.f32 %v3749_v20, %v7095_v12  ;;  %v3760_v4 = vmul.f32 %v3749_v20, %v7093_v11 }
 0xf8d   : > { %v3765_v25 = vadd.f32 %v3764_v5, %v3763_v21  ;;  %v3769_v46 = vsub.f32 %v3767_v22, %v3768_v23 }
 0xf8e   : > { %v3752_v54 = vadd.f32 %v3751_v1, %v3745_v27  ;;  %v3761_v33 = vsub.f32 %v3759_v18, %v3760_v4  ;;  %v3775_v47 = vpop.permute.xlu1 %3774 }
 0xf99   : > { %v3756_v53 = vpop.permute.xlu0 %3755 }
 0xf9a   : > { %v3758_v55 = vmul.f32 %v3756_v53, %v3752_v54  ;;  %v3762_v43 = vmul.f32 %v3761_v33, %v3756_v53  ;;  %v3766_v58 = vmul.f32 %v3765_v25, %v3756_v53  ;;  %v3770_v45 = vmul.f32 %v3769_v46, %v3756_v53 }
 0xf9c   : > { %v3780_v44 = vrot.slane %v3758_v55, %v6901_v2  ;;  %v3785_v32 = vrot.slane %v3762_v43, %v6901_v2  ;;  %v3796_v13 = vrot.slane %v3766_v58, %v6901_v2  ;;  %v3801_v41 = vrot.slane %v3770_v45, %v6901_v2 }
 0xf9e   : > { %v3797_v49 = vmul.f32 %v3796_v13, %v3775_v47  ;;  %v3802_v52 = vmul.f32 %v3801_v41, %v3749_v20  ;;  %v3805_v42 = vmul.f32 %v3801_v41, %v3775_v47  ;;  %v3806_v56 = vmul.f32 %v3796_v13, %v3749_v20 }
 0xf9f   : > { %v3789_v57 = vmul.f32 %v3785_v32, %v3775_v47  ;;  %v3790_v59 = vmul.f32 %v3780_v44, %v3749_v20  ;;  %v3781_v60 = vmul.f32 %v3780_v44, %v3775_v47  ;;  %v3786_v35 = vmul.f32 %v3785_v32, %v3749_v20 }
 0xfa0   : > { %v3803_v9 = vsub.f32 %v3797_v49, %v3802_v52  ;;  %v3807_v36 = vadd.f32 %v3806_v56, %v3805_v42 }
 0xfa1   : > { %v3791_v37 = vadd.f32 %v3790_v59, %v3789_v57  ;;  %v3787_v15 = vsub.f32 %v3781_v60, %v3786_v35 }
 0xfa2   : > { %v3804_v16 = vsub.f32 %v3730_v10, %v3803_v9  ;;  %v3808_v17 = vsub.f32 %v3734_v14, %v3807_v36 }
 0xfa3   : > { %v3792_v19 = vsub.f32 %v7095_v12, %v3791_v37  ;;  %v3788_v0 = vsub.f32 %v7093_v11, %v3787_v15 }
 0xfa5   : > { %3822 = vperm.xlu1 %6479, %v3792_v19   ;;  %v3810_v3 = vmul.f32 %v3792_v19, %v3792_v19  ;;  %3816 = vperm.xlu0 %6478, %v3788_v0   ;;  %v3809_v63 = vmul.f32 %v3788_v0, %v3788_v0  ;;  %v3837_v26 = vsub.f32 %v3788_v0, %v6727_v8 }
 0xfa7   : > { %v3811_v6 = vadd.f32 %v3810_v3, %v3809_v63 }
 0xfa9   : > { %6501 = vrcp.f32 %v3811_v6  ;;  %3840 = vperm.xlu0 %6478, %v3837_v26  }
 0xfb3   : > { %v6502_v20 = vpop.eup %6501 }
 0xfb4   : > { %3829 = vperm.xlu1 %6479, %v6502_v20  }
 0xfe4   : > { %v3992_v21 = vpop.f32.mrb[26].mxu1 }
 0xfe5   : > { %v6313_v22 = vpop.f32.mrb[27].mxu1 }
 0xffe   : > { %v4065_v5 = vpop.f32.mrb[28].mxu0 }
 0xfff   : > { %v4143_v10 = vsub.f32 %v3992_v21, %v4065_v5  ;;  %v6318_v14 = vpop.f32.mrb[29].mxu0 }
0x1000   : > { %v4139_v23 = vpop.f32.mrb[28].mxu1 }
0x1001   : > { %v4144_v12 = vsub.f32 %v4139_v23, %v3992_v21  ;;  %v6323_v25 = vpop.f32.mrb[29].mxu1 }
0x1003   : > { %v4145_v11 = vsub.f32 %v4144_v12, %v4065_v5 }
0x1005   : > { %v4362_v46 = vadd.f32 %v4145_v11, %v4143_v10 }
0x1024   : > { %v3823_v27 = vpop.permute.xlu1 %3822  ;;  %v3817_v18 = vpop.permute.xlu0 %3816 }
0x1025   : > { %v3819_v1 = vmul.f32 %v3817_v18, %v3804_v16  ;;  %v3833_v4 = vmul.f32 %v3817_v18, %v3808_v17  ;;  %v3825_v54 = vmul.f32 %v3823_v27, %v3808_v17  ;;  %v3834_v33 = vmul.f32 %v3823_v27, %v3804_v16 }
0x1027   : > { %v3826_v53 = vadd.f32 %v3825_v54, %v3819_v1  ;;  %v3835_v55 = vsub.f32 %v3833_v4, %v3834_v33  ;;  %v6520_v1 = vld [vmem:[#allocation5] sm:$0xf] }
0x1028   : > { %v3841_v13 = vpop.permute.xlu0 %3840 }
0x1033   : > { %v3830_v43 = vpop.permute.xlu1 %3829 }
0x1034   : > { %v3832_v58 = vmul.f32 %v3830_v43, %v3826_v53  ;;  %v3836_v45 = vmul.f32 %v3835_v55, %v3830_v43 }
0x1036   : > { %v3846_v44 = vrot.slane %v3832_v58, %v6909_v38  ;;  %v3851_v32 = vrot.slane %v3836_v45, %v6909_v38  ;;  %v4443_v38 = vsub.f32 0.0, %v7045_v48  ;;  %v979_v48 = vld [vmem:[%s7288_s30] sm:$0x1] }
0x1037   : > { %6405 = vpush %v979_v48 }
0x1038   : > { %v3847_v41 = vmul.f32 %v3846_v44, %v3841_v13  ;;  %v3852_v47 = vmul.f32 %v3851_v32, %v3823_v27  ;;  %v3855_v49 = vmul.f32 %v3851_v32, %v3841_v13  ;;  %v3856_v52 = vmul.f32 %v3846_v44, %v3823_v27 }
0x1039   : > { %v4596_v19 = vadd.f32 %v4443_v38, %v7042_v30 }
0x103a   : > { %v3853_v42 = vsub.f32 %v3847_v41, %v3852_v47  ;;  %v3857_v56 = vadd.f32 %v3856_v52, %v3855_v49 }
0x103c   : > { %v3858_v57 = vsub.f32 %v3808_v17, %v3857_v56  ;;  %v3854_v59 = vsub.f32 %v3804_v16, %v3853_v42 }
0x103e   : > { %4178 = vxpose.xlu0.b32.start.end [1/1] (short) (narrow) %v3858_v57, 8  ;;  %4146 = vxpose.xlu1.b32.start.end [1/1] (short) (narrow) %v3854_v59, 8 }
0x1067   : > { %6481 = vset.pattern.permute.xlu0 %v6565_v24 }
0x1068   : > { %s6406_s25 = spop %6405 }
0x1069   : > { %v4676_v22 = vstv %s6406_s25 }
0x10be   : > { %v4194_v60 = vpop.trf.xlu0  ;;  %v4162_v35 = vpop.trf.xlu1 }
0x10bf   : > { %v4363_v9 = vadd.f32 %v4194_v60, %v4162_v35  ;;  %6325 = vmatpush3.msk.msra.mxu0 %vm1210_vm7, %v4162_v35  ;;  %6330 = vmatpush3.msk.msra.mxu1 %vm1210_vm7, %v4194_v60 }
0x10c0   : > { %6327 = vmatmul.mubr.msk.f32.vlgmr.msra.gmra.mrb[30].mxu0 %vm1206_vm8, %v4143_v10  ;;  %6332 = vmatmul.mubr.msk.f32.vlgmr.msra.gmra.mrb[30].mxu1 %vm1206_vm8, %v4145_v11  ;;  %v6519_v11 = vld [vmem:[#allocation4] sm:$0xf] }
0x10c1   : > { %6334 = vmatprep.subr.mxu0 %v6561_v7  ;;  %6339 = vmatprep.subr.mxu1 %v6561_v7 }
0x10c2   : > { %6335 = vmatpush3.msk.msra.mxu0 %vm1210_vm7, %v4363_v9  ;;  %6340 = vmatpush3.msk.msra.mxu1 %vm1210_vm7, %v7042_v30 }
0x10c3   : > { %6336 = vmatprep.mubr.msk.f32.mxu0 %vm6564_vm6, %v6561_v7  ;;  %6344 = vmatprep.subr.mxu0 %v6561_v7 }
0x10c4   : > { %6337 = vmatmul.mubr.msk.f32.vlgmr.msra.gmra.mrb[32].mxu0 %vm1206_vm8, %v4362_v46  ;;  %6341 = vmatprep.mubr.msk.f32.mxu1 %vm6564_vm6, %v6561_v7 }
0x10c5   : > { %6345 = vmatpush3.msk.msra.mxu0 %vm1210_vm7, %v4443_v38  ;;  %6349 = vmatprep.subr.mxu1 %v6561_v7 }
0x10c6   : > { %6346 = vmatprep.mubr.msk.f32.mxu0 %vm6564_vm6, %v6561_v7  ;;  %6354 = vmatprep.subr.mxu0 %v6561_v7 }
0x1193   : > { %v4282_v36 = vpop.f32.mrb[30].mxu0  ;;  %v4358_v37 = vpop.f32.mrb[30].mxu1 }
0x1194   : > { %v4440_v15 = vsub.f32 %v4282_v36, %v4358_v37  ;;  %v6328_v16 = vpop.f32.mrb[31].mxu0  ;;  %v6333_v17 = vpop.f32.mrb[31].mxu1 }
0x1196   : > { %6342 = vmatmul.mubr.msk.f32.vlgmr.msra.gmra.mrb[32].mxu1 %vm1206_vm8, %v4440_v15 }
0x1197   : > { %6350 = vmatpush3.msk.msra.mxu1 %vm1210_vm7, %v4596_v19  ;;  %v4436_v0 = vpop.f32.mrb[32].mxu0  ;;  %6351 = vmatprep.mubr.msk.f32.mxu1 %vm6564_vm6, %v6561_v7 }
0x1198   : > { %v4441_v3 = vsub.f32 %v4436_v0, %v4282_v36  ;;  %v6338_v63 = vpop.f32.mrb[33].mxu0  ;;  %6359 = vmatprep.subr.mxu1 %v6561_v7 }
0x119a   : > { %v4442_v6 = vsub.f32 %v4441_v3, %v4358_v37 }
0x119c   : > { %v4595_v26 = vadd.f32 %v4442_v6, %v4440_v15  ;;  %6347 = vmatmul.mubr.msk.f32.vlgmr.msra.gmra.mrb[34].mxu0 %vm1206_vm8, %v4442_v6 }
0x119d   : > { %6356 = vmatprep.mubr.msk.f32.mxu0 %vm6564_vm6, %v6561_v7 }
0x119e   : > { %6352 = vmatmul.mubr.msk.f32.vlgmr.msra.gmra.mrb[34].mxu1 %vm1206_vm8, %v4595_v26 }
0x119f   : > { %6361 = vmatprep.mubr.msk.f32.mxu1 %vm6564_vm6, %v6561_v7 }
0x1269   : > { %v4515_v30 = vpop.f32.mrb[32].mxu1 }
0x126a   : > { %v6343_v20 = vpop.f32.mrb[33].mxu1 }
0x126f   : > { %v4591_v21 = vpop.f32.mrb[34].mxu0 }
0x1270   : > { %v4673_v5 = vsub.f32 %v4515_v30, %v4591_v21  ;;  %v6348_v10 = vpop.f32.mrb[35].mxu0 }
0x1271   : > { %v4669_v14 = vpop.f32.mrb[34].mxu1 }
0x1272   : > { %v4677_v23 = vmul.f32 %v4676_v22, %v4673_v5  ;;  %v4674_v12 = vsub.f32 %v4669_v14, %v4515_v30  ;;  %v6353_v25 = vpop.f32.mrb[35].mxu1 }
0x1274   : > { %v4678_v46 = vadd.f32 %v6519_v11, %v4677_v23  ;;  %v4675_v27 = vsub.f32 %v4674_v12, %v4591_v21 }
0x1276   : > { %v4679_v18 = vmul.f32 %v4676_v22, %v4675_v27  ;;  %6355 = vmatpush3.msk.msra.mxu0 %vm1210_vm7, %v4678_v46 }
0x1277   : > { %6357 = vmatmul.mubr.msk.f32.vlgmr.msra.gmra.mrb[36].mxu0 %vm1206_vm8, %v6979_v29  ;;  %6364 = vmatprep.subr.mxu0 %v6561_v7 }
0x1278   : > { %v4680_v4 = vadd.f32 %v6520_v1, %v4679_v18  ;;  %6366 = vmatprep.mubr.msk.f32.mxu0 %vm6564_vm6, %v6561_v7 }
0x127a   : > { %v4833_v54 = vadd.f32 %v4680_v4, %v4678_v46  ;;  %6360 = vmatpush3.msk.msra.mxu1 %vm1210_vm7, %v4680_v4 }
0x127b   : > { %6362 = vmatmul.mubr.msk.f32.vlgmr.msra.gmra.mrb[36].mxu1 %vm1206_vm8, %v6977_v28  ;;  %6369 = vmatprep.subr.mxu1 %v6561_v7 }
0x127c   : > { %6365 = vmatpush3.msk.msra.mxu0 %vm1210_vm7, %v4833_v54  ;;  %6371 = vmatprep.mubr.msk.f32.mxu1 %vm6564_vm6, %v6561_v7 }
0x127d   : > { %6367 = vmatmul.mubr.msk.f32.vlgmr.msra.gmra.mrb[38].mxu0 %vm1206_vm8, %v6995_v50  ;;  %6374 = vmatprep.subr.mxu0 %v6561_v7 }
0x127e   : > { %6376 = vmatprep.mubr.msk.f32.mxu0 %vm6564_vm6, %v6561_v7 }
0x134a   : > { %v4753_v29 = vpop.f32.mrb[36].mxu0 }
0x134b   : > { %v6358_v33 = vpop.f32.mrb[37].mxu0 }
0x134e   : > { %v4829_v53 = vpop.f32.mrb[36].mxu1 }
0x134f   : > { %v4910_v55 = vsub.f32 %v4753_v29, %v4829_v53  ;;  %v6363_v28 = vpop.f32.mrb[37].mxu1 }
0x1350   : > { %v4906_v43 = vpop.f32.mrb[38].mxu0 }
0x1351   : > { %v4911_v58 = vsub.f32 %v4906_v43, %v4753_v29  ;;  %v6368_v45 = vpop.f32.mrb[39].mxu0  ;;  %v4913_v32 = vmul.f32 %v4910_v55, %v4910_v55 }
0x1353   : > { %v4912_v44 = vsub.f32 %v4911_v58, %v4829_v53 }
0x1355   : > { %v4914_v13 = vmul.f32 %v4912_v44, %v4912_v44 }
0x1357   : > { %v4915_v41 = vadd.f32 %v4914_v13, %v4913_v32 }
0x1359   : > { %v4916_v47 = vsel %vm1206_vm8, %v4915_v41, 0.0 }
0x135a   : > { %4917 = vadd.xlane.f32.xlu0 %v4916_v47 }
0x13e7   : > { %v4918_v50 = vpop.xlane.xlu0 %4917 }
0x13e8   : > { %v4919_v49 = vrot.slane %v4918_v50, 4 }
0x13ea   : > { %v4920_v52 = vadd.f32 %v4919_v49, %v4918_v50 }
0x13ec   : > { %v4921_v42 = vrot.slane %v4920_v52, 2 }
0x13ee   : > { %v4922_v56 = vadd.f32 %v4921_v42, %v4920_v52 }
0x13f0   : > { %v4923_v57 = vrot.slane %v4922_v56, 1 }
0x13f2   : > { %v4924_v59 = vadd.f32 %v4923_v57, %v4922_v56 }
0x13f4   : > { %6407 = vpush %v4924_v59 }
0x1425   : > { %s6408_s20 = spop %6407 }
0x1426   : > { %v4926_v60 = vstv %s6408_s20 }
0x1427   : > { %6503 = vrsqrt.f32 %v4926_v60 }
0x1431   : > { %v6504_v35 = vpop.eup %6503 }
0x1432   : > { %6409 = vpush %v6504_v35 }
0x1463   : > { %s6410_s0 = spop %6409 }
0x1464   : > { %s4929_s23 = smul.f32 2.0, %s6410_s0 }
0x1466   : > { %v4930_v9 = vstv %s4929_s23 }
0x1467   : > { %v4931_v38 = vmul.f32 %v4930_v9, %v4678_v46  ;;  %v4932_v48 = vmul.f32 %v4930_v9, %v4680_v4 }
0x1469   : > { %v5079_v36 = vadd.f32 %v4932_v48, %v4931_v38  ;;  %5642 = vst.msk [vmem:[#allocation4] sm:$0xf] %vm5641_vm9, %v4931_v38  ;;  %5643 = vst.msk [vmem:[#allocation5] sm:$0xf] %vm5641_vm9, %v4932_v48  ;;  %6370 = vmatpush3.msk.msra.mxu1 %vm1210_vm7, %v4931_v38  ;;  %6375 = vmatpush3.msk.msra.mxu0 %vm1210_vm7, %v4932_v48 }
0x146a   : > { %5646 = vst.msk [vmem:[%s6744_s15] sm:$0xf] %vm5641_vm9, %v4931_v38  ;;  %5647 = vst.msk [vmem:[%s6749_s1] sm:$0xf] %vm5641_vm9, %v4932_v48  ;;  %6372 = vmatmul.mubr.msk.f32.vlgmr.msra.gmra.mrb[38].mxu1 %vm1206_vm8, %v7019_v51  ;;  %6377 = vmatmul.mubr.msk.f32.vlgmr.msra.gmra.mrb[40].mxu0 %vm1206_vm8, %v7028_v31  ;;  %s6569_s1 = smov 126   ;;  %s6570_s15 = smov 127  }
0x146b   : > { %6379 = vmatprep.subr.mxu1 %v6561_v7  ;;  %6381 = vmatprep.mubr.msk.f32.mxu1 %vm6564_vm6, %v6561_v7 }
0x146c   : > { %6380 = vmatpush3.msk.msra.mxu1 %vm1210_vm7, %v5079_v36  ;;  %6384 = vmatprep.subr.mxu0 %v6561_v7 }
0x146d   : > { %6386 = vmatprep.mubr.msk.f32.mxu0 %vm6564_vm6, %v6561_v7  ;;  %6389 = vmatprep.subr.mxu1 %v6561_v7 }
0x146e   : > { %6382 = vmatmul.mubr.msk.f32.vlgmr.msra.gmra.mrb[40].mxu1 %vm1206_vm8, %v7032_v34 }
0x146f   : > { %6391 = vmatprep.mubr.msk.f32.mxu1 %vm6564_vm6, %v6561_v7 }
0x153d   : > { %v5002_v51 = vpop.f32.mrb[38].mxu1  ;;  %v5075_v31 = vpop.f32.mrb[40].mxu0 }
0x153e   : > { %v5153_v37 = vsub.f32 %v5002_v51, %v5075_v31  ;;  %v6373_v15 = vpop.f32.mrb[39].mxu1  ;;  %v6378_v16 = vpop.f32.mrb[41].mxu0 }
0x1540   : > { %5156 = vxpose.xlu1.b32.start.end [1/1] (short) (narrow) %v5153_v37, 8 }
0x1541   : > { %v5149_v17 = vpop.f32.mrb[40].mxu1 }
0x1542   : > { %v5154_v19 = vsub.f32 %v5149_v17, %v5002_v51  ;;  %v6383_v0 = vpop.f32.mrb[41].mxu1 }
0x1544   : > { %v5155_v3 = vsub.f32 %v5154_v19, %v5075_v31 }
0x1546   : > { %5188 = vxpose.xlu1.b32.start.end [1/1] (short) (narrow) %v5155_v3, 8  ;;  %v5373_v30 = vadd.f32 %v5155_v3, %v5153_v37 }
0x1564   : > { %6480 = vset.pattern.permute.xlu1 %v6565_v24 }
0x15c0   : > { %v5172_v63 = vpop.trf.xlu1 }
0x15c1   : > { %6385 = vmatpush3.msk.msra.mxu0 %vm1210_vm7, %v5172_v63 }
0x15c2   : > { %6387 = vmatmul.mubr.msk.f32.vlgmr.msra.gmra.mrb[42].mxu0 %vm1206_vm8, %v5153_v37  ;;  %6394 = vmatprep.subr.mxu0 %v6561_v7 }
0x15c3   : > { %6396 = vmatprep.mubr.msk.f32.mxu0 %vm6564_vm6, %v6561_v7 }
0x15c6   : > { %v5204_v34 = vpop.trf.xlu1 }
0x15c7   : > { %v5220_v6 = vsub.f32 0.0, %v5204_v34 }
0x15c9   : > { %v5374_v26 = vadd.f32 %v5220_v6, %v5172_v63  ;;  %6390 = vmatpush3.msk.msra.mxu1 %vm1210_vm7, %v5220_v6 }
0x15ca   : > { %6392 = vmatmul.mubr.msk.f32.vlgmr.msra.gmra.mrb[42].mxu1 %vm1206_vm8, %v5155_v3 }
0x15cb   : > { %6395 = vmatpush3.msk.msra.mxu0 %vm1210_vm7, %v5374_v26 }
0x15cc   : > { %6397 = vmatmul.mubr.msk.f32.vlgmr.msra.gmra.mrb[44].mxu0 %vm1206_vm8, %v5373_v30 }
0x1695   : > { %v5293_v24 = vpop.f32.mrb[42].mxu0 }
0x1696   : > { %v6388_v20 = vpop.f32.mrb[43].mxu0 }
0x169d   : > { %v5369_v21 = vpop.f32.mrb[42].mxu1 }
0x169e   : > { %v5451_v22 = vsub.f32 %v5293_v24, %v5369_v21  ;;  %v6393_v5 = vpop.f32.mrb[43].mxu1 }
0x169f   : > { %v5447_v10 = vpop.f32.mrb[44].mxu0 }
0x16a0   : > { %v5454_v7 = vadd.f32 %v6727_v8, %v5451_v22  ;;  %v5452_v14 = vsub.f32 %v5447_v10, %v5293_v24  ;;  %v6398_v23 = vpop.f32.mrb[45].mxu0 }
0x16a2   : > { %v5453_v12 = vsub.f32 %v5452_v14, %v5369_v21  ;;  %5466 = vperm.xlu1 %6480, %v5454_v7   ;;  %v5455_v25 = vmul.f32 %v5454_v7, %v5454_v7  ;;  %v5487_v18 = vsub.f32 %v5454_v7, %v6727_v8 }
0x16a4   : > { %v5456_v11 = vmul.f32 %v5453_v12, %v5453_v12  ;;  %5472 = vperm.xlu0 %6481, %v5453_v12  }
0x16a6   : > { %v7220_v46 = vadd.f32 %v5456_v11, %v5455_v25 }
0x16a8   : > { %6505 = vrcp.f32 %v7220_v46  ;;  %6484 = vset.pattern.permute.xlu0 %v6567_v39 }
0x16b2   : > { %v6506_v27 = vpop.eup %6505 }
0x16b3   : > { %5479 = vperm.xlu1 %6480, %v6506_v27  }
0x16b7   : > { %5490 = vperm.xlu1 %6480, %v5487_v18  }
0x16bb   : > { %6482 = vset.pattern.permute.xlu1 %v6566_v40 }
0x1721   : > { %v5467_v4 = vpop.permute.xlu1 %5466 }
0x1722   : > { %v5469_v33 = vmul.f32 %v5467_v4, %v5454_v7  ;;  %v5483_v53 = vmul.f32 %v5467_v4, %v5453_v12 }
0x1723   : > { %v5473_v1 = vpop.permute.xlu0 %5472 }
0x1724   : > { %v5475_v54 = vmul.f32 %v5473_v1, %v5453_v12  ;;  %v5484_v29 = vmul.f32 %v5473_v1, %v5454_v7 }
0x1726   : > { %v5476_v55 = vadd.f32 %v5475_v54, %v5469_v33  ;;  %v5485_v28 = vsub.f32 %v5483_v53, %v5484_v29 }
0x1732   : > { %v5480_v43 = vpop.permute.xlu1 %5479 }
0x1733   : > { %v5482_v58 = vmul.f32 %v5480_v43, %v5476_v55  ;;  %v5486_v45 = vmul.f32 %v5485_v28, %v5480_v43 }
0x1735   : > { %v5496_v44 = vrot.slane %v5482_v58, %v6881_v61  ;;  %v5501_v32 = vrot.slane %v5486_v45, %v6881_v61 }
0x1736   : > { %v5491_v13 = vpop.permute.xlu1 %5490 }
0x1737   : > { %v5502_v41 = vmul.f32 %v5501_v32, %v5473_v1  ;;  %v5506_v47 = vmul.f32 %v5496_v44, %v5473_v1  ;;  %v5497_v50 = vmul.f32 %v5496_v44, %v5491_v13  ;;  %v5505_v40 = vmul.f32 %v5501_v32, %v5491_v13 }
0x1739   : > { %v5503_v49 = vsub.f32 %v5497_v50, %v5502_v41  ;;  %v5507_v52 = vadd.f32 %v5506_v47, %v5505_v40 }
0x173b   : > { %v5504_v42 = vsub.f32 %v5454_v7, %v5503_v49  ;;  %v5508_v56 = vsub.f32 %v5453_v12, %v5507_v52 }
0x173d   : > { %v5509_v57 = vmul.f32 %v5504_v42, %v5504_v42  ;;  %v5510_v59 = vmul.f32 %v5508_v56, %v5508_v56  ;;  %5525 = vperm.xlu1 %6482, %v5504_v42   ;;  %v5546_v9 = vsub.f32 %v5504_v42, %v6727_v8 }
0x173f   : > { %v5511_v60 = vadd.f32 %v5510_v59, %v5509_v57 }
0x1741   : > { %6507 = vrcp.f32 %v5511_v60  ;;  %5531 = vperm.xlu1 %6482, %v5508_v56  }
0x1742   : > { %6509 = vlog2.f32 %v5511_v60 }
0x174b   : > { %v6508_v35 = vpop.eup %6507 }
0x174c   : > { %5538 = vperm.xlu1 %6482, %v6508_v35   ;;  %v6510_v7 = vpop.eup %6509 }
0x174d   : > { %v5515_v14 = vmul.f32 0.6931472, %v6510_v7 }
0x174f   : > { %v5516_v11 = vmul.f32 0.5, %v5515_v14 }
0x1750   : > { %5549 = vperm.xlu1 %6482, %v5546_v9  }
0x1751   : > { %v5518_v1 = vrot.slane %v5516_v11, 1 }
0x1754   : > { %6483 = vset.pattern.permute.xlu1 %v6567_v39 }
0x17bc   : > { %v5526_v61 = vpop.permute.xlu1 %5525 }
0x17bd   : > { %v5528_v51 = vmul.f32 %v5526_v61, %v5504_v42  ;;  %v5542_v31 = vmul.f32 %v5526_v61, %v5508_v56 }
0x17c0   : > { %v5532_v38 = vpop.permute.xlu1 %5531 }
0x17c1   : > { %v5534_v48 = vmul.f32 %v5532_v38, %v5508_v56  ;;  %v5543_v36 = vmul.f32 %v5532_v38, %v5504_v42 }
0x17c3   : > { %v5535_v37 = vadd.f32 %v5534_v48, %v5528_v51  ;;  %v5544_v15 = vsub.f32 %v5542_v31, %v5543_v36 }
0x17cb   : > { %v5539_v16 = vpop.permute.xlu1 %5538 }
0x17cc   : > { %v5541_v17 = vmul.f32 %v5539_v16, %v5535_v37  ;;  %v5545_v19 = vmul.f32 %v5544_v15, %v5539_v16 }
0x17ce   : > { %v5555_v0 = vrot.slane %v5541_v17, %v6891_v62  ;;  %v5560_v3 = vrot.slane %v5545_v19, %v6891_v62 }
0x17cf   : > { %v5550_v63 = vpop.permute.xlu1 %5549 }
0x17d0   : > { %v5561_v34 = vmul.f32 %v5560_v3, %v5532_v38  ;;  %v5565_v6 = vmul.f32 %v5555_v0, %v5532_v38  ;;  %v5556_v26 = vmul.f32 %v5555_v0, %v5550_v63  ;;  %v5564_v39 = vmul.f32 %v5560_v3, %v5550_v63 }
0x17d2   : > { %v5562_v30 = vsub.f32 %v5556_v26, %v5561_v34  ;;  %v5566_v24 = vadd.f32 %v5565_v6, %v5564_v39 }
0x17d4   : > { %v5563_v20 = vsub.f32 %v5504_v42, %v5562_v30  ;;  %v5567_v21 = vsub.f32 %v5508_v56, %v5566_v24 }
0x17d6   : > { %v5568_v22 = vmul.f32 %v5563_v20, %v5563_v20  ;;  %v5569_v5 = vmul.f32 %v5567_v21, %v5567_v21  ;;  %5584 = vperm.xlu1 %6483, %v5563_v20   ;;  %v5605_v25 = vsub.f32 %v5563_v20, %v6727_v8 }
0x17d8   : > { %v5570_v10 = vadd.f32 %v5569_v5, %v5568_v22 }
0x17da   : > { %6511 = vrcp.f32 %v5570_v10  ;;  %5590 = vperm.xlu1 %6483, %v5567_v21  }
0x17db   : > { %6513 = vlog2.f32 %v5570_v10 }
0x17e4   : > { %v6512_v62 = vpop.eup %6511 }
0x17e5   : > { %v6514_v23 = vpop.eup %6513  ;;  %5597 = vperm.xlu1 %6483, %v6512_v62  }
0x17e6   : > { %v5574_v12 = vmul.f32 0.6931472, %v6514_v23 }
0x17e8   : > { %v5575_v27 = vmul.f32 0.5, %v5574_v12 }
0x17e9   : > { %5608 = vperm.xlu1 %6483, %v5605_v25  }
0x17ea   : > { %v5577_v18 = vrot.slane %v5575_v27, 2 }
0x17ec   : > { %5578 = vrot.lane.b32.xlu0 %v5577_v18, %s6569_s1 }
0x17ed   : > { %5519 = vrot.lane.b32.xlu1 %v5518_v1, %s6570_s15 }
0x1855   : > { %v5585_v4 = vpop.permute.xlu1 %5584 }
0x1856   : > { %v5587_v53 = vmul.f32 %v5585_v4, %v5563_v20  ;;  %v5601_v55 = vmul.f32 %v5585_v4, %v5567_v21 }
0x1859   : > { %v5591_v54 = vpop.permute.xlu1 %5590 }
0x185a   : > { %v5593_v29 = vmul.f32 %v5591_v54, %v5567_v21  ;;  %v5602_v33 = vmul.f32 %v5591_v54, %v5563_v20 }
0x185c   : > { %v5594_v28 = vadd.f32 %v5593_v29, %v5587_v53  ;;  %v5603_v43 = vsub.f32 %v5601_v55, %v5602_v33 }
0x185e   : > { %v5579_v37 = vpop.permute.xlu0 %5578 }
0x1864   : > { %v5598_v58 = vpop.permute.xlu1 %5597 }
0x1865   : > { %v5600_v45 = vmul.f32 %v5598_v58, %v5594_v28  ;;  %v5604_v8 = vmul.f32 %v5603_v43, %v5598_v58 }
0x1867   : > { %v5614_v44 = vrot.slane %v5600_v45, %v6901_v2  ;;  %v5619_v32 = vrot.slane %v5604_v8, %v6901_v2 }
0x1868   : > { %v5609_v13 = vpop.permute.xlu1 %5608 }
0x1869   : > { %v5620_v41 = vmul.f32 %v5619_v32, %v5591_v54  ;;  %v5624_v47 = vmul.f32 %v5614_v44, %v5591_v54  ;;  %v5615_v50 = vmul.f32 %v5614_v44, %v5609_v13  ;;  %v5623_v40 = vmul.f32 %v5619_v32, %v5609_v13 }
0x186b   : > { %v5621_v49 = vsub.f32 %v5615_v50, %v5620_v41  ;;  %v5625_v52 = vadd.f32 %v5624_v47, %v5623_v40 }
0x186c   : > { %v5520_v36 = vpop.permute.xlu1 %5519 }
0x186d   : > { %v5622_v42 = vsub.f32 %v5563_v20, %v5621_v49  ;;  %v5626_v56 = vsub.f32 %v5567_v21, %v5625_v52 }
0x186f   : > { %v5627_v57 = vmul.f32 %v5622_v42, %v5622_v42  ;;  %v5628_v59 = vmul.f32 %v5626_v56, %v5626_v56 }
0x1871   : > { %v5629_v60 = vadd.f32 %v5628_v59, %v5627_v57 }
0x1873   : > { %6515 = vlog2.f32 %v5629_v60 }
0x1874   : > { %6517 = vlog2.f32 %v7220_v46 }
0x187d   : > { %v6516_v35 = vpop.eup %6515 }
0x187e   : > { %v5631_v9 = vmul.f32 0.6931472, %v6516_v35  ;;  %v6518_v2 = vpop.eup %6517 }
0x187f   : > { %v5461_v48 = vmul.f32 0.6931472, %v6518_v2 }
0x1880   : > { %v5632_v61 = vmul.f32 0.5, %v5631_v9 }
0x1881   : > { %v5462_v51 = vmul.f32 0.5, %v5461_v48 }
0x1882   : > { %v5634_v38 = vrot.slane %v5632_v61, 3 }
0x1883   : > { %v5522_v31 = vadd.f32 %v5520_v36, %v5462_v51 }
0x1884   : > { %5635 = vrot.lane.b32.xlu1 %v5634_v38, %s6571_s22 }
0x1885   : > { %v5581_v15 = vadd.f32 %v5579_v37, %v5522_v31 }
0x18f6   : > { %v5636_v16 = vpop.permute.xlu1 %5635 }
0x18f7   : > { %v5638_v17 = vadd.f32 %v5636_v16, %v5581_v15 }
0x18f9   : > { %v5648_v19 = vand.u32 2147483647, %v5638_v17 }
0x18fb   : > { %5650 = vst.msk [vmem:[%s620_s17] sm:$0x1] %vm5649_vm10, %v5648_v19 }
0x18fc PF: > { %s7289_s21 = sld [smem:[#allocation8_spill]]  ;;  %s7291_s22 = sld [smem:[#allocation7_spill]] }
0x18fd   : > { %s7292_s23 = sld [smem:[#allocation9_spill]]  ;;  %s7293_s24 = sld [smem:[#allocation10_spill]] }
0x1902   : > { %s23_s25 = sadd.s32 1, %s7289_s21   ;;  %s7290_s21 = sld [smem:[#allocation6_spill]] }
0x1903   : > { %p20_p9 = scmp.ge.s32.totalorder %s23_s25, 8  }
0x1905   :  { %22 = sbr.rel (!%p20_p9) target bundleno = 5 (0x5), region = 155 }

</bundles_post_ra>
